<compile_context>
chip_gen: v7x
topology: tpu7x:2x2x1
jax: 0.10.0
libtpu: 0.0.40
codegen_flags: <defaults>
</compile_context>

<pallas_src>
import itertools
from functools import partial

import numpy as np
import jax
import jax.numpy as jnp
from jax import lax
from jax.experimental import pallas as pl
from jax.experimental.pallas import tpu as pltpu

BIG = 1e9      # finite sentinel for invalid orderings / padded targets (never reaches the assignment)
TILE_N = 128   # fixed prediction-row tile -> no per-N retrace; rows padded to 2*TILE_N buckets


def _round_up(x, m):
    return ((x + m - 1) // m) * m


# ----------------------------------------------------------------------------
# Pallas kernel: masked L1 distance, min over cyclic orderings.
#   out[n, t] = min_{k valid for t} sum_{j < len(t)} | src[n, j] - rolled[t, k, j] |
# Layouts:
#   src_cols_ref : [2Q, tile_n, 1]   coordinate j on the leading axis (dynamic ref[j] load)
#   rolled_ref   : [Q*2Q, T_pad]     row = k*2Q + j, lane = target (k-major, lane-dense)
#   cm_ref       : [2Q,   T_pad]     per-target coordinate-validity mask (k-independent)
#   bias_ref     : [Q,    T_pad]     0 for valid (target, ordering k), BIG otherwise
#   out_ref      : [tile_n, T_pad]   unmasked lane-dense store
# ----------------------------------------------------------------------------
def cost_coords_kernel(src_cols_ref, rolled_ref, cm_ref, bias_ref, out_ref):
    tile_n, t_pad = out_ref.shape
    q = bias_ref.shape[0]
    two_q = cm_ref.shape[0]
    inner_unroll = two_q if two_q <= 16 else 8   # partial unroll once 2Q grows

    def ordering_body(k, best):
        # partial-sum accumulator for ordering k, seeded with the validity bias chunk
        acc0 = jnp.broadcast_to(bias_ref[pl.ds(k, 1), :], (tile_n, t_pad))

        def coord_body(j, acc):
            sj = src_cols_ref[j]                           # [tile_n, 1]  prediction coord j
            rj = rolled_ref[pl.ds(k * two_q + j, 1), :]    # [1, t_pad]   target coord j, ordering k
            cj = cm_ref[pl.ds(j, 1), :]                    # [1, t_pad]   coord-validity mask
            return acc + jnp.abs(sj - rj) * cj             # lane-dense VPU work

        acc = lax.fori_loop(0, two_q, coord_body, acc0, unroll=inner_unroll)
        return jnp.minimum(best, acc)                      # fused running min over orderings

    best0 = jnp.full((tile_n, t_pad), BIG, jnp.float32)
    out_ref[...] = lax.fori_loop(0, q, ordering_body, best0)


@partial(jax.jit, static_argnames=("q",))
def _cost_coords_pallas(src_padded, rolled_kt, cm_t, bias_kt, *, q):
    """src_padded: [n_pad, 2Q] f32 (n_pad a multiple of 2*TILE_N).
       rolled_kt: [Q*2Q, T_pad], cm_t: [2Q, T_pad], bias_kt: [Q, T_pad]."""
    n_pad, two_q = src_padded.shape
    t_pad = cm_t.shape[1]
    tile_n = TILE_N

    # [2Q, n_pad, 1]: coordinate index on the leading axis so the kernel can use ref[j].
    src_cols = jnp.transpose(src_padded)[:, :, None]

    flops = 4 * n_pad * two_q * q * t_pad                    # sub/abs/mul/add per element
    bytes_accessed = 4 * (src_cols.size + rolled_kt.size + cm_t.size
                          + bias_kt.size + n_pad * t_pad)
    ce = pl.CostEstimate(flops=int(flops), transcendentals=0,
                         bytes_accessed=int(bytes_accessed))

    # NOTE: rolled/cm/bias have constant index maps (fetched once, stay resident).  Their
    # footprint is small after dropping the Q-replicated mask, so default buffering is fine.
    # TODO(synk): at production sizes (large Q, hundreds of targets) add an "arbitrary"
    # grid axis over the target-lane dimension so the resident slabs fit v7x's 64 MiB VMEM.
    out = pl.pallas_call(
        cost_coords_kernel,
        out_shape=jax.ShapeDtypeStruct((n_pad, t_pad), jnp.float32),
        grid=(n_pad // tile_n,),
        in_specs=[
            pl.BlockSpec((two_q, tile_n, 1), lambda i: (0, i, 0)),   # predictions, row-tiled
            pl.BlockSpec((q * two_q, t_pad), lambda i: (0, 0)),      # rolled targets (resident)
            pl.BlockSpec((two_q, t_pad), lambda i: (0, 0)),          # coord mask (resident)
            pl.BlockSpec((q, t_pad), lambda i: (0, 0)),              # ordering-validity bias (resident)
        ],
        out_specs=pl.BlockSpec((tile_n, t_pad), lambda i: (i, 0)),
        compiler_params=pltpu.CompilerParams(
            dimension_semantics=("parallel",)),                      # shard row tiles across v7x TCs
        cost_estimate=ce,
    )(src_cols, rolled_kt, cm_t, bias_kt)
    return out


# ----------------------------------------------------------------------------
# Host-side glue (vectorized numpy): expand get_all_order_corners into kernel-ready,
# lane-dense padded slabs.  Pure index shuffling, no math.
# ----------------------------------------------------------------------------
def build_target_tensors(tgt_polys, tgt_len, Q, T_pad, big=BIG):
    """Returns (rolled_kt [Q*2Q, T_pad], cm_t [2Q, T_pad], bias_kt [Q, T_pad]).
    rolled_kt row index is k-major: row = k*2Q + j; lane axis is the (padded) target index."""
    tgt_polys = np.asarray(tgt_polys, np.float32)
    tgt_len = np.asarray(tgt_len, np.int64)
    assert np.all(tgt_len % 2 == 0), "target lengths must be even (x,y pairs), like the torch reference"
    T = tgt_polys.shape[0]
    n_pts = np.maximum(tgt_len // 2, 1)                                            # [T]

    k = np.arange(Q)
    m = np.arange(Q)
    # np.roll(pts, k, axis=0)[m] == pts[(m - k) mod n_pts]
    pt_idx = np.mod(m[None, None, :] - k[None, :, None], n_pts[:, None, None])     # [T, Q, Q]
    coord_idx = (2 * pt_idx[..., None] + np.arange(2)).reshape(T, Q, 2 * Q)        # [T, Q, 2Q]
    rolled = tgt_polys[np.arange(T)[:, None, None], coord_idx]                     # [T, Q, 2Q]

    cmask = (np.arange(2 * Q)[None, :] < tgt_len[:, None]).astype(np.float32)      # [T, 2Q]
    valid_order = np.arange(Q)[None, :] < (tgt_len[:, None] // 2)                  # [T, Q]

    # pad targets to the static T_pad bucket (lane-dense output, no recompiles)
    rolled_p = np.zeros((T_pad, Q, 2 * Q), np.float32); rolled_p[:T] = rolled
    cmask_p = np.zeros((T_pad, 2 * Q), np.float32); cmask_p[:T] = cmask
    valid_p = np.zeros((T_pad, Q), bool); valid_p[:T] = valid_order

    rolled_kt = np.ascontiguousarray(
        np.transpose(rolled_p, (1, 2, 0)).reshape(Q * 2 * Q, T_pad))               # [Q*2Q, T_pad]
    cm_t = np.ascontiguousarray(cmask_p.T)                                         # [2Q, T_pad] (no Q-tile)
    bias_kt = np.ascontiguousarray(
        np.where(valid_p, 0.0, big).astype(np.float32).T)                          # [Q, T_pad]
    return rolled_kt, cm_t, bias_kt


def pallas_cost_coords(src_polys_dev, tgt_polys_np, tgt_len_np, Q):
    """Full pipeline: host layout prep + Pallas kernel.  Returns np.ndarray [N, T]."""
    T = tgt_polys_np.shape[0]
    T_pad = max(128, _round_up(T, 128))
    rolled_kt, cm_t, bias_kt = build_target_tensors(tgt_polys_np, tgt_len_np, Q, T_pad)

    N = src_polys_dev.shape[0]
    # fixed 2*TILE_N-row buckets: static kernel shapes across calls AND >= 2 grid steps
    n_pad = _round_up(max(N, 1), 2 * TILE_N)
    src = jnp.asarray(src_polys_dev, jnp.float32)
    src_padded = jnp.pad(src, ((0, n_pad - N), (0, 0)))

    out_dev = _cost_coords_pallas(src_padded, jnp.asarray(rolled_kt), jnp.asarray(cm_t),
                                  jnp.asarray(bias_kt), q=Q)
    jax.block_until_ready(out_dev)
    return np.asarray(out_dev)[:N, :T]        # single device->host copy, padding sliced off


def linear_sum_assignment_bruteforce(c):
    # TODO(synk): Hungarian (linear_sum_assignment) is a sequential combinatorial algorithm
    # with no clean Pallas equivalent; solved on host (brute force, small test sizes only).
    c = np.asarray(c)
    R, Cn = c.shape
    assert Cn <= R, "synthetic test assumes num_targets <= num_polys"
    best_cost, best_perm = None, None
    for perm in itertools.permutations(range(R), Cn):
        cost = sum(c[perm[j], j] for j in range(Cn))
        if best_cost is None or cost < best_cost:
            best_cost, best_perm = cost, perm
    pairs = sorted(zip(best_perm, range(Cn)))
    rows = np.array([p[0] for p in pairs], dtype=np.int64)
    cols = np.array([p[1] for p in pairs], dtype=np.int64)
    return rows, cols


class HungarianMatcherPallas:
    def __init__(self, cost_class: float = 1.0, cost_coords: float = 1.0):
        self.cost_class = cost_class
        self.cost_coords = cost_coords
        assert cost_class != 0 or cost_coords != 0, "all costs cant be 0"

    def __call__(self, outputs, targets):
        bs, num_polys, Q = outputs["pred_logits"].shape
        src_polys = outputs["pred_coords"].reshape(bs * num_polys, 2 * Q)

        # NOTE: cost_class (cdist(sigmoid(pred_logits), tgt_ids, p=1)) is computed but never
        # added into C in the reference forward (C = cost_coords * cost_coords); omitted.
        tgt_polys = np.concatenate([np.asarray(t["coords"], np.float32) for t in targets], 0)
        tgt_len = np.concatenate([np.asarray(t["lengths"]) for t in targets], 0)

        cost_coords = pallas_cost_coords(src_polys, tgt_polys, tgt_len, Q)

        C = (self.cost_coords * cost_coords).reshape(bs, num_polys, -1)
        sizes = [int(np.asarray(t["coords"]).shape[0]) for t in targets]
        indices, offset = [], 0
        for b in range(bs):
            c_b = C[b, :, offset:offset + sizes[b]]
            indices.append(linear_sum_assignment_bruteforce(c_b))
            offset += sizes[b]
        return [(np.asarray(i, dtype=np.int64), np.asarray(j, dtype=np.int64))
                for i, j in indices]


# ----------------------------------------------------------------------------
# numpy reference for the coordinate cost (mirrors the torch loop), for validation.
# ----------------------------------------------------------------------------
def ref_cost_coords(src_polys, tgt_polys, tgt_len):
    N, T = src_polys.shape[0], tgt_polys.shape[0]
    out = np.zeros((N, T), np.float32)
    for i in range(T):
        L = int(tgt_len[i]); n_pts = L // 2
        pts = tgt_polys[i, :L].reshape(n_pts, 2)
        all_polys = np.stack([np.roll(pts, k, axis=0).reshape(-1) for k in range(n_pts)])
        d = np.abs(src_polys[:, None, :L] - all_polys[None, :, :]).sum(-1)
        out[:, i] = d.min(-1)
    return out


if __name__ == "__main__":
    key = jax.random.PRNGKey(0)
    bs, num_polys, Q = 2, 8, 8  # 8 corners per polygon -> 16 coordinate scalars

    k1, k2, k3, k4, k5, k6 = jax.random.split(key, 6)
    pred_logits = jax.random.normal(k1, (bs, num_polys, Q), dtype=jnp.float32)
    pred_coords = jax.random.uniform(k2, (bs, num_polys, Q, 2), dtype=jnp.float32)

    # batch 0 has 3 target polygons, batch 1 has 2 (variable corner counts via "lengths")
    targets = [
        {"labels": (jax.random.uniform(k3, (3, Q)) > 0.5).astype(jnp.float32),
         "coords": jax.random.uniform(k4, (3, 2 * Q), dtype=jnp.float32),
         "lengths": np.array([8, 12, 16], np.int32)},   # valid coord scalars (even)
        {"labels": (jax.random.uniform(k5, (2, Q)) > 0.5).astype(jnp.float32),
         "coords": jax.random.uniform(k6, (2, 2 * Q), dtype=jnp.float32),
         "lengths": np.array([6, 10], np.int32)},
    ]
    outputs = {"pred_logits": pred_logits, "pred_coords": pred_coords}

    matcher = HungarianMatcherPallas(cost_class=1.0, cost_coords=1.0)
    indices = matcher(outputs, targets)

    # --- validate the kernel's coordinate-cost matrix against the numpy reference
    src_polys_np = np.asarray(pred_coords).reshape(bs * num_polys, 2 * Q)
    tgt_polys_np = np.concatenate([np.asarray(t["coords"]) for t in targets], 0).astype(np.float32)
    tgt_len_np = np.concatenate([np.asarray(t["lengths"]) for t in targets], 0)

    cost_coords_k = pallas_cost_coords(
        jnp.asarray(src_polys_np, jnp.float32), tgt_polys_np, tgt_len_np, Q)
    ref_coords = ref_cost_coords(src_polys_np, tgt_polys_np, tgt_len_np)
    np.testing.assert_allclose(cost_coords_k, ref_coords, rtol=1e-5, atol=1e-5)

    # --- structural checks on the assignment output (matches reference forward semantics)
    for b, (i_idx, j_idx) in enumerate(indices):
        n_tgt = np.asarray(targets[b]["coords"]).shape[0]
        assert len(i_idx) == len(j_idx) == min(num_polys, n_tgt)
        assert i_idx.max() < num_polys and j_idx.max() < n_tgt
        assert len(set(i_idx.tolist())) == len(i_idx)   # one prediction per target

    print("KERNEL_OK")
</pallas_src>

<mosaic_0001>
module attributes {stable_mosaic.version = 11 : i64} {
  func.func @cost_coords_kernel(%arg0: i32, %arg1: memref<16x128x1xf32, #tpu.memory_space<vmem>>, %arg2: memref<128x128xf32, #tpu.memory_space<vmem>>, %arg3: memref<16x128xf32, #tpu.memory_space<vmem>>, %arg4: memref<8x128xf32, #tpu.memory_space<vmem>>, %arg5: memref<128x128xf32, #tpu.memory_space<vmem>>) attributes {dimension_semantics = [#tpu.dimension_semantics<parallel>], iteration_bounds = array<i64: 2>, scalar_prefetch = 0 : i64, scratch_operands = 0 : i64, tpu.core_type = #tpu.core_type<tc>, window_params = [{transform_indices = @transform_0, window_bounds = array<i64: 16, 128, 1>}, {pipeline_mode = #tpu.pipeline_mode<synchronous>, transform_indices = @transform_1, window_bounds = array<i64: 128, 128>}, {pipeline_mode = #tpu.pipeline_mode<synchronous>, transform_indices = @transform_2, window_bounds = array<i64: 16, 128>}, {pipeline_mode = #tpu.pipeline_mode<synchronous>, transform_indices = @transform_3, window_bounds = array<i64: 8, 128>}, {transform_indices = @transform_4, window_bounds = array<i64: 128, 128>}]} {
    %cst = arith.constant 1.000000e+09 : f32
    %0 = vector.broadcast %cst : f32 to vector<128x128xf32>
    %c0_i32 = arith.constant 0 : i32
    %c8_i32 = arith.constant 8 : i32
    %1 = arith.addi %c0_i32, %c8_i32 : i32
    %c1_i32 = arith.constant 1 : i32
    %2 = scf.for %arg6 = %c0_i32 to %1 step %c1_i32 iter_args(%arg7 = %0) -> (vector<128x128xf32>)  : i32 {
      %4 = arith.index_cast %arg6 : i32 to index
      %c0_2 = arith.constant 0 : index
      %5 = vector.load %arg4[%4, %c0_2] : memref<8x128xf32, #tpu.memory_space<vmem>>, vector<1x128xf32>
      %6 = vector.shape_cast %5 : vector<1x128xf32> to vector<1x128xf32>
      %7 = vector.broadcast %6 : vector<1x128xf32> to vector<128x128xf32>
      %c0_i32_3 = arith.constant 0 : i32
      %8 = arith.index_cast %c0_i32_3 : i32 to index
      %c0_4 = arith.constant 0 : index
      %c0_5 = arith.constant 0 : index
      %9 = vector.load %arg1[%8, %c0_4, %c0_5] : memref<16x128x1xf32, #tpu.memory_space<vmem>>, vector<1x128x1xf32>
      %10 = vector.shape_cast %9 : vector<1x128x1xf32> to vector<128x1xf32>
      %c16_i32 = arith.constant 16 : i32
      %11 = arith.muli %arg6, %c16_i32 : i32
      %12 = arith.addi %11, %c0_i32_3 : i32
      %13 = arith.index_cast %12 : i32 to index
      %c0_6 = arith.constant 0 : index
      %14 = vector.load %arg2[%13, %c0_6] : memref<128x128xf32, #tpu.memory_space<vmem>>, vector<1x128xf32>
      %15 = arith.index_cast %c0_i32_3 : i32 to index
      %c0_7 = arith.constant 0 : index
      %16 = vector.load %arg3[%15, %c0_7] : memref<16x128xf32, #tpu.memory_space<vmem>>, vector<1x128xf32>
      %17 = vector.broadcast %10 : vector<128x1xf32> to vector<128x128xf32>
      %18 = vector.broadcast %14 : vector<1x128xf32> to vector<128x128xf32>
      %19 = arith.subf %17, %18 : vector<128x128xf32>
      %20 = math.absf %19 : vector<128x128xf32>
      %21 = vector.broadcast %16 : vector<1x128xf32> to vector<128x128xf32>
      %22 = arith.mulf %20, %21 : vector<128x128xf32>
      %23 = arith.addf %7, %22 : vector<128x128xf32>
      %c1_i32_8 = arith.constant 1 : i32
      %24 = arith.index_cast %c1_i32_8 : i32 to index
      %c0_9 = arith.constant 0 : index
      %c0_10 = arith.constant 0 : index
      %25 = vector.load %arg1[%24, %c0_9, %c0_10] : memref<16x128x1xf32, #tpu.memory_space<vmem>>, vector<1x128x1xf32>
      %26 = vector.shape_cast %25 : vector<1x128x1xf32> to vector<128x1xf32>
      %c16_i32_11 = arith.constant 16 : i32
      %27 = arith.muli %arg6, %c16_i32_11 : i32
      %28 = arith.addi %27, %c1_i32_8 : i32
      %29 = arith.index_cast %28 : i32 to index
      %c0_12 = arith.constant 0 : index
      %30 = vector.load %arg2[%29, %c0_12] : memref<128x128xf32, #tpu.memory_space<vmem>>, vector<1x128xf32>
      %31 = arith.index_cast %c1_i32_8 : i32 to index
      %c0_13 = arith.constant 0 : index
      %32 = vector.load %arg3[%31, %c0_13] : memref<16x128xf32, #tpu.memory_space<vmem>>, vector<1x128xf32>
      %33 = vector.broadcast %26 : vector<128x1xf32> to vector<128x128xf32>
      %34 = vector.broadcast %30 : vector<1x128xf32> to vector<128x128xf32>
      %35 = arith.subf %33, %34 : vector<128x128xf32>
      %36 = math.absf %35 : vector<128x128xf32>
      %37 = vector.broadcast %32 : vector<1x128xf32> to vector<128x128xf32>
      %38 = arith.mulf %36, %37 : vector<128x128xf32>
      %39 = arith.addf %23, %38 : vector<128x128xf32>
      %c2_i32 = arith.constant 2 : i32
      %40 = arith.index_cast %c2_i32 : i32 to index
      %c0_14 = arith.constant 0 : index
      %c0_15 = arith.constant 0 : index
      %41 = vector.load %arg1[%40, %c0_14, %c0_15] : memref<16x128x1xf32, #tpu.memory_space<vmem>>, vector<1x128x1xf32>
      %42 = vector.shape_cast %41 : vector<1x128x1xf32> to vector<128x1xf32>
      %c16_i32_16 = arith.constant 16 : i32
      %43 = arith.muli %arg6, %c16_i32_16 : i32
      %44 = arith.addi %43, %c2_i32 : i32
      %45 = arith.index_cast %44 : i32 to index
      %c0_17 = arith.constant 0 : index
      %46 = vector.load %arg2[%45, %c0_17] : memref<128x128xf32, #tpu.memory_space<vmem>>, vector<1x128xf32>
      %47 = arith.index_cast %c2_i32 : i32 to index
      %c0_18 = arith.constant 0 : index
      %48 = vector.load %arg3[%47, %c0_18] : memref<16x128xf32, #tpu.memory_space<vmem>>, vector<1x128xf32>
      %49 = vector.broadcast %42 : vector<128x1xf32> to vector<128x128xf32>
      %50 = vector.broadcast %46 : vector<1x128xf32> to vector<128x128xf32>
      %51 = arith.subf %49, %50 : vector<128x128xf32>
      %52 = math.absf %51 : vector<128x128xf32>
      %53 = vector.broadcast %48 : vector<1x128xf32> to vector<128x128xf32>
      %54 = arith.mulf %52, %53 : vector<128x128xf32>
      %55 = arith.addf %39, %54 : vector<128x128xf32>
      %c3_i32 = arith.constant 3 : i32
      %56 = arith.index_cast %c3_i32 : i32 to index
      %c0_19 = arith.constant 0 : index
      %c0_20 = arith.constant 0 : index
      %57 = vector.load %arg1[%56, %c0_19, %c0_20] : memref<16x128x1xf32, #tpu.memory_space<vmem>>, vector<1x128x1xf32>
      %58 = vector.shape_cast %57 : vector<1x128x1xf32> to vector<128x1xf32>
      %c16_i32_21 = arith.constant 16 : i32
      %59 = arith.muli %arg6, %c16_i32_21 : i32
      %60 = arith.addi %59, %c3_i32 : i32
      %61 = arith.index_cast %60 : i32 to index
      %c0_22 = arith.constant 0 : index
      %62 = vector.load %arg2[%61, %c0_22] : memref<128x128xf32, #tpu.memory_space<vmem>>, vector<1x128xf32>
      %63 = arith.index_cast %c3_i32 : i32 to index
      %c0_23 = arith.constant 0 : index
      %64 = vector.load %arg3[%63, %c0_23] : memref<16x128xf32, #tpu.memory_space<vmem>>, vector<1x128xf32>
      %65 = vector.broadcast %58 : vector<128x1xf32> to vector<128x128xf32>
      %66 = vector.broadcast %62 : vector<1x128xf32> to vector<128x128xf32>
      %67 = arith.subf %65, %66 : vector<128x128xf32>
      %68 = math.absf %67 : vector<128x128xf32>
      %69 = vector.broadcast %64 : vector<1x128xf32> to vector<128x128xf32>
      %70 = arith.mulf %68, %69 : vector<128x128xf32>
      %71 = arith.addf %55, %70 : vector<128x128xf32>
      %c4_i32 = arith.constant 4 : i32
      %72 = arith.index_cast %c4_i32 : i32 to index
      %c0_24 = arith.constant 0 : index
      %c0_25 = arith.constant 0 : index
      %73 = vector.load %arg1[%72, %c0_24, %c0_25] : memref<16x128x1xf32, #tpu.memory_space<vmem>>, vector<1x128x1xf32>
      %74 = vector.shape_cast %73 : vector<1x128x1xf32> to vector<128x1xf32>
      %c16_i32_26 = arith.constant 16 : i32
      %75 = arith.muli %arg6, %c16_i32_26 : i32
      %76 = arith.addi %75, %c4_i32 : i32
      %77 = arith.index_cast %76 : i32 to index
      %c0_27 = arith.constant 0 : index
      %78 = vector.load %arg2[%77, %c0_27] : memref<128x128xf32, #tpu.memory_space<vmem>>, vector<1x128xf32>
      %79 = arith.index_cast %c4_i32 : i32 to index
      %c0_28 = arith.constant 0 : index
      %80 = vector.load %arg3[%79, %c0_28] : memref<16x128xf32, #tpu.memory_space<vmem>>, vector<1x128xf32>
      %81 = vector.broadcast %74 : vector<128x1xf32> to vector<128x128xf32>
      %82 = vector.broadcast %78 : vector<1x128xf32> to vector<128x128xf32>
      %83 = arith.subf %81, %82 : vector<128x128xf32>
      %84 = math.absf %83 : vector<128x128xf32>
      %85 = vector.broadcast %80 : vector<1x128xf32> to vector<128x128xf32>
      %86 = arith.mulf %84, %85 : vector<128x128xf32>
      %87 = arith.addf %71, %86 : vector<128x128xf32>
      %c5_i32 = arith.constant 5 : i32
      %88 = arith.index_cast %c5_i32 : i32 to index
      %c0_29 = arith.constant 0 : index
      %c0_30 = arith.constant 0 : index
      %89 = vector.load %arg1[%88, %c0_29, %c0_30] : memref<16x128x1xf32, #tpu.memory_space<vmem>>, vector<1x128x1xf32>
      %90 = vector.shape_cast %89 : vector<1x128x1xf32> to vector<128x1xf32>
      %c16_i32_31 = arith.constant 16 : i32
      %91 = arith.muli %arg6, %c16_i32_31 : i32
      %92 = arith.addi %91, %c5_i32 : i32
      %93 = arith.index_cast %92 : i32 to index
      %c0_32 = arith.constant 0 : index
      %94 = vector.load %arg2[%93, %c0_32] : memref<128x128xf32, #tpu.memory_space<vmem>>, vector<1x128xf32>
      %95 = arith.index_cast %c5_i32 : i32 to index
      %c0_33 = arith.constant 0 : index
      %96 = vector.load %arg3[%95, %c0_33] : memref<16x128xf32, #tpu.memory_space<vmem>>, vector<1x128xf32>
      %97 = vector.broadcast %90 : vector<128x1xf32> to vector<128x128xf32>
      %98 = vector.broadcast %94 : vector<1x128xf32> to vector<128x128xf32>
      %99 = arith.subf %97, %98 : vector<128x128xf32>
      %100 = math.absf %99 : vector<128x128xf32>
      %101 = vector.broadcast %96 : vector<1x128xf32> to vector<128x128xf32>
      %102 = arith.mulf %100, %101 : vector<128x128xf32>
      %103 = arith.addf %87, %102 : vector<128x128xf32>
      %c6_i32 = arith.constant 6 : i32
      %104 = arith.index_cast %c6_i32 : i32 to index
      %c0_34 = arith.constant 0 : index
      %c0_35 = arith.constant 0 : index
      %105 = vector.load %arg1[%104, %c0_34, %c0_35] : memref<16x128x1xf32, #tpu.memory_space<vmem>>, vector<1x128x1xf32>
      %106 = vector.shape_cast %105 : vector<1x128x1xf32> to vector<128x1xf32>
      %c16_i32_36 = arith.constant 16 : i32
      %107 = arith.muli %arg6, %c16_i32_36 : i32
      %108 = arith.addi %107, %c6_i32 : i32
      %109 = arith.index_cast %108 : i32 to index
      %c0_37 = arith.constant 0 : index
      %110 = vector.load %arg2[%109, %c0_37] : memref<128x128xf32, #tpu.memory_space<vmem>>, vector<1x128xf32>
      %111 = arith.index_cast %c6_i32 : i32 to index
      %c0_38 = arith.constant 0 : index
      %112 = vector.load %arg3[%111, %c0_38] : memref<16x128xf32, #tpu.memory_space<vmem>>, vector<1x128xf32>
      %113 = vector.broadcast %106 : vector<128x1xf32> to vector<128x128xf32>
      %114 = vector.broadcast %110 : vector<1x128xf32> to vector<128x128xf32>
      %115 = arith.subf %113, %114 : vector<128x128xf32>
      %116 = math.absf %115 : vector<128x128xf32>
      %117 = vector.broadcast %112 : vector<1x128xf32> to vector<128x128xf32>
      %118 = arith.mulf %116, %117 : vector<128x128xf32>
      %119 = arith.addf %103, %118 : vector<128x128xf32>
      %c7_i32 = arith.constant 7 : i32
      %120 = arith.index_cast %c7_i32 : i32 to index
      %c0_39 = arith.constant 0 : index
      %c0_40 = arith.constant 0 : index
      %121 = vector.load %arg1[%120, %c0_39, %c0_40] : memref<16x128x1xf32, #tpu.memory_space<vmem>>, vector<1x128x1xf32>
      %122 = vector.shape_cast %121 : vector<1x128x1xf32> to vector<128x1xf32>
      %c16_i32_41 = arith.constant 16 : i32
      %123 = arith.muli %arg6, %c16_i32_41 : i32
      %124 = arith.addi %123, %c7_i32 : i32
      %125 = arith.index_cast %124 : i32 to index
      %c0_42 = arith.constant 0 : index
      %126 = vector.load %arg2[%125, %c0_42] : memref<128x128xf32, #tpu.memory_space<vmem>>, vector<1x128xf32>
      %127 = arith.index_cast %c7_i32 : i32 to index
      %c0_43 = arith.constant 0 : index
      %128 = vector.load %arg3[%127, %c0_43] : memref<16x128xf32, #tpu.memory_space<vmem>>, vector<1x128xf32>
      %129 = vector.broadcast %122 : vector<128x1xf32> to vector<128x128xf32>
      %130 = vector.broadcast %126 : vector<1x128xf32> to vector<128x128xf32>
      %131 = arith.subf %129, %130 : vector<128x128xf32>
      %132 = math.absf %131 : vector<128x128xf32>
      %133 = vector.broadcast %128 : vector<1x128xf32> to vector<128x128xf32>
      %134 = arith.mulf %132, %133 : vector<128x128xf32>
      %135 = arith.addf %119, %134 : vector<128x128xf32>
      %c8_i32_44 = arith.constant 8 : i32
      %136 = arith.index_cast %c8_i32_44 : i32 to index
      %c0_45 = arith.constant 0 : index
      %c0_46 = arith.constant 0 : index
      %137 = vector.load %arg1[%136, %c0_45, %c0_46] : memref<16x128x1xf32, #tpu.memory_space<vmem>>, vector<1x128x1xf32>
      %138 = vector.shape_cast %137 : vector<1x128x1xf32> to vector<128x1xf32>
      %c16_i32_47 = arith.constant 16 : i32
      %139 = arith.muli %arg6, %c16_i32_47 : i32
      %140 = arith.addi %139, %c8_i32_44 : i32
      %141 = arith.index_cast %140 : i32 to index
      %c0_48 = arith.constant 0 : index
      %142 = vector.load %arg2[%141, %c0_48] : memref<128x128xf32, #tpu.memory_space<vmem>>, vector<1x128xf32>
      %143 = arith.index_cast %c8_i32_44 : i32 to index
      %c0_49 = arith.constant 0 : index
      %144 = vector.load %arg3[%143, %c0_49] : memref<16x128xf32, #tpu.memory_space<vmem>>, vector<1x128xf32>
      %145 = vector.broadcast %138 : vector<128x1xf32> to vector<128x128xf32>
      %146 = vector.broadcast %142 : vector<1x128xf32> to vector<128x128xf32>
      %147 = arith.subf %145, %146 : vector<128x128xf32>
      %148 = math.absf %147 : vector<128x128xf32>
      %149 = vector.broadcast %144 : vector<1x128xf32> to vector<128x128xf32>
      %150 = arith.mulf %148, %149 : vector<128x128xf32>
      %151 = arith.addf %135, %150 : vector<128x128xf32>
      %c9_i32 = arith.constant 9 : i32
      %152 = arith.index_cast %c9_i32 : i32 to index
      %c0_50 = arith.constant 0 : index
      %c0_51 = arith.constant 0 : index
      %153 = vector.load %arg1[%152, %c0_50, %c0_51] : memref<16x128x1xf32, #tpu.memory_space<vmem>>, vector<1x128x1xf32>
      %154 = vector.shape_cast %153 : vector<1x128x1xf32> to vector<128x1xf32>
      %c16_i32_52 = arith.constant 16 : i32
      %155 = arith.muli %arg6, %c16_i32_52 : i32
      %156 = arith.addi %155, %c9_i32 : i32
      %157 = arith.index_cast %156 : i32 to index
      %c0_53 = arith.constant 0 : index
      %158 = vector.load %arg2[%157, %c0_53] : memref<128x128xf32, #tpu.memory_space<vmem>>, vector<1x128xf32>
      %159 = arith.index_cast %c9_i32 : i32 to index
      %c0_54 = arith.constant 0 : index
      %160 = vector.load %arg3[%159, %c0_54] : memref<16x128xf32, #tpu.memory_space<vmem>>, vector<1x128xf32>
      %161 = vector.broadcast %154 : vector<128x1xf32> to vector<128x128xf32>
      %162 = vector.broadcast %158 : vector<1x128xf32> to vector<128x128xf32>
      %163 = arith.subf %161, %162 : vector<128x128xf32>
      %164 = math.absf %163 : vector<128x128xf32>
      %165 = vector.broadcast %160 : vector<1x128xf32> to vector<128x128xf32>
      %166 = arith.mulf %164, %165 : vector<128x128xf32>
      %167 = arith.addf %151, %166 : vector<128x128xf32>
      %c10_i32 = arith.constant 10 : i32
      %168 = arith.index_cast %c10_i32 : i32 to index
      %c0_55 = arith.constant 0 : index
      %c0_56 = arith.constant 0 : index
      %169 = vector.load %arg1[%168, %c0_55, %c0_56] : memref<16x128x1xf32, #tpu.memory_space<vmem>>, vector<1x128x1xf32>
      %170 = vector.shape_cast %169 : vector<1x128x1xf32> to vector<128x1xf32>
      %c16_i32_57 = arith.constant 16 : i32
      %171 = arith.muli %arg6, %c16_i32_57 : i32
      %172 = arith.addi %171, %c10_i32 : i32
      %173 = arith.index_cast %172 : i32 to index
      %c0_58 = arith.constant 0 : index
      %174 = vector.load %arg2[%173, %c0_58] : memref<128x128xf32, #tpu.memory_space<vmem>>, vector<1x128xf32>
      %175 = arith.index_cast %c10_i32 : i32 to index
      %c0_59 = arith.constant 0 : index
      %176 = vector.load %arg3[%175, %c0_59] : memref<16x128xf32, #tpu.memory_space<vmem>>, vector<1x128xf32>
      %177 = vector.broadcast %170 : vector<128x1xf32> to vector<128x128xf32>
      %178 = vector.broadcast %174 : vector<1x128xf32> to vector<128x128xf32>
      %179 = arith.subf %177, %178 : vector<128x128xf32>
      %180 = math.absf %179 : vector<128x128xf32>
      %181 = vector.broadcast %176 : vector<1x128xf32> to vector<128x128xf32>
      %182 = arith.mulf %180, %181 : vector<128x128xf32>
      %183 = arith.addf %167, %182 : vector<128x128xf32>
      %c11_i32 = arith.constant 11 : i32
      %184 = arith.index_cast %c11_i32 : i32 to index
      %c0_60 = arith.constant 0 : index
      %c0_61 = arith.constant 0 : index
      %185 = vector.load %arg1[%184, %c0_60, %c0_61] : memref<16x128x1xf32, #tpu.memory_space<vmem>>, vector<1x128x1xf32>
      %186 = vector.shape_cast %185 : vector<1x128x1xf32> to vector<128x1xf32>
      %c16_i32_62 = arith.constant 16 : i32
      %187 = arith.muli %arg6, %c16_i32_62 : i32
      %188 = arith.addi %187, %c11_i32 : i32
      %189 = arith.index_cast %188 : i32 to index
      %c0_63 = arith.constant 0 : index
      %190 = vector.load %arg2[%189, %c0_63] : memref<128x128xf32, #tpu.memory_space<vmem>>, vector<1x128xf32>
      %191 = arith.index_cast %c11_i32 : i32 to index
      %c0_64 = arith.constant 0 : index
      %192 = vector.load %arg3[%191, %c0_64] : memref<16x128xf32, #tpu.memory_space<vmem>>, vector<1x128xf32>
      %193 = vector.broadcast %186 : vector<128x1xf32> to vector<128x128xf32>
      %194 = vector.broadcast %190 : vector<1x128xf32> to vector<128x128xf32>
      %195 = arith.subf %193, %194 : vector<128x128xf32>
      %196 = math.absf %195 : vector<128x128xf32>
      %197 = vector.broadcast %192 : vector<1x128xf32> to vector<128x128xf32>
      %198 = arith.mulf %196, %197 : vector<128x128xf32>
      %199 = arith.addf %183, %198 : vector<128x128xf32>
      %c12_i32 = arith.constant 12 : i32
      %200 = arith.index_cast %c12_i32 : i32 to index
      %c0_65 = arith.constant 0 : index
      %c0_66 = arith.constant 0 : index
      %201 = vector.load %arg1[%200, %c0_65, %c0_66] : memref<16x128x1xf32, #tpu.memory_space<vmem>>, vector<1x128x1xf32>
      %202 = vector.shape_cast %201 : vector<1x128x1xf32> to vector<128x1xf32>
      %c16_i32_67 = arith.constant 16 : i32
      %203 = arith.muli %arg6, %c16_i32_67 : i32
      %204 = arith.addi %203, %c12_i32 : i32
      %205 = arith.index_cast %204 : i32 to index
      %c0_68 = arith.constant 0 : index
      %206 = vector.load %arg2[%205, %c0_68] : memref<128x128xf32, #tpu.memory_space<vmem>>, vector<1x128xf32>
      %207 = arith.index_cast %c12_i32 : i32 to index
      %c0_69 = arith.constant 0 : index
      %208 = vector.load %arg3[%207, %c0_69] : memref<16x128xf32, #tpu.memory_space<vmem>>, vector<1x128xf32>
      %209 = vector.broadcast %202 : vector<128x1xf32> to vector<128x128xf32>
      %210 = vector.broadcast %206 : vector<1x128xf32> to vector<128x128xf32>
      %211 = arith.subf %209, %210 : vector<128x128xf32>
      %212 = math.absf %211 : vector<128x128xf32>
      %213 = vector.broadcast %208 : vector<1x128xf32> to vector<128x128xf32>
      %214 = arith.mulf %212, %213 : vector<128x128xf32>
      %215 = arith.addf %199, %214 : vector<128x128xf32>
      %c13_i32 = arith.constant 13 : i32
      %216 = arith.index_cast %c13_i32 : i32 to index
      %c0_70 = arith.constant 0 : index
      %c0_71 = arith.constant 0 : index
      %217 = vector.load %arg1[%216, %c0_70, %c0_71] : memref<16x128x1xf32, #tpu.memory_space<vmem>>, vector<1x128x1xf32>
      %218 = vector.shape_cast %217 : vector<1x128x1xf32> to vector<128x1xf32>
      %c16_i32_72 = arith.constant 16 : i32
      %219 = arith.muli %arg6, %c16_i32_72 : i32
      %220 = arith.addi %219, %c13_i32 : i32
      %221 = arith.index_cast %220 : i32 to index
      %c0_73 = arith.constant 0 : index
      %222 = vector.load %arg2[%221, %c0_73] : memref<128x128xf32, #tpu.memory_space<vmem>>, vector<1x128xf32>
      %223 = arith.index_cast %c13_i32 : i32 to index
      %c0_74 = arith.constant 0 : index
      %224 = vector.load %arg3[%223, %c0_74] : memref<16x128xf32, #tpu.memory_space<vmem>>, vector<1x128xf32>
      %225 = vector.broadcast %218 : vector<128x1xf32> to vector<128x128xf32>
      %226 = vector.broadcast %222 : vector<1x128xf32> to vector<128x128xf32>
      %227 = arith.subf %225, %226 : vector<128x128xf32>
      %228 = math.absf %227 : vector<128x128xf32>
      %229 = vector.broadcast %224 : vector<1x128xf32> to vector<128x128xf32>
      %230 = arith.mulf %228, %229 : vector<128x128xf32>
      %231 = arith.addf %215, %230 : vector<128x128xf32>
      %c14_i32 = arith.constant 14 : i32
      %232 = arith.index_cast %c14_i32 : i32 to index
      %c0_75 = arith.constant 0 : index
      %c0_76 = arith.constant 0 : index
      %233 = vector.load %arg1[%232, %c0_75, %c0_76] : memref<16x128x1xf32, #tpu.memory_space<vmem>>, vector<1x128x1xf32>
      %234 = vector.shape_cast %233 : vector<1x128x1xf32> to vector<128x1xf32>
      %c16_i32_77 = arith.constant 16 : i32
      %235 = arith.muli %arg6, %c16_i32_77 : i32
      %236 = arith.addi %235, %c14_i32 : i32
      %237 = arith.index_cast %236 : i32 to index
      %c0_78 = arith.constant 0 : index
      %238 = vector.load %arg2[%237, %c0_78] : memref<128x128xf32, #tpu.memory_space<vmem>>, vector<1x128xf32>
      %239 = arith.index_cast %c14_i32 : i32 to index
      %c0_79 = arith.constant 0 : index
      %240 = vector.load %arg3[%239, %c0_79] : memref<16x128xf32, #tpu.memory_space<vmem>>, vector<1x128xf32>
      %241 = vector.broadcast %234 : vector<128x1xf32> to vector<128x128xf32>
      %242 = vector.broadcast %238 : vector<1x128xf32> to vector<128x128xf32>
      %243 = arith.subf %241, %242 : vector<128x128xf32>
      %244 = math.absf %243 : vector<128x128xf32>
      %245 = vector.broadcast %240 : vector<1x128xf32> to vector<128x128xf32>
      %246 = arith.mulf %244, %245 : vector<128x128xf32>
      %247 = arith.addf %231, %246 : vector<128x128xf32>
      %c15_i32 = arith.constant 15 : i32
      %248 = arith.index_cast %c15_i32 : i32 to index
      %c0_80 = arith.constant 0 : index
      %c0_81 = arith.constant 0 : index
      %249 = vector.load %arg1[%248, %c0_80, %c0_81] : memref<16x128x1xf32, #tpu.memory_space<vmem>>, vector<1x128x1xf32>
      %250 = vector.shape_cast %249 : vector<1x128x1xf32> to vector<128x1xf32>
      %c16_i32_82 = arith.constant 16 : i32
      %251 = arith.muli %arg6, %c16_i32_82 : i32
      %252 = arith.addi %251, %c15_i32 : i32
      %253 = arith.index_cast %252 : i32 to index
      %c0_83 = arith.constant 0 : index
      %254 = vector.load %arg2[%253, %c0_83] : memref<128x128xf32, #tpu.memory_space<vmem>>, vector<1x128xf32>
      %255 = arith.index_cast %c15_i32 : i32 to index
      %c0_84 = arith.constant 0 : index
      %256 = vector.load %arg3[%255, %c0_84] : memref<16x128xf32, #tpu.memory_space<vmem>>, vector<1x128xf32>
      %257 = vector.broadcast %250 : vector<128x1xf32> to vector<128x128xf32>
      %258 = vector.broadcast %254 : vector<1x128xf32> to vector<128x128xf32>
      %259 = arith.subf %257, %258 : vector<128x128xf32>
      %260 = math.absf %259 : vector<128x128xf32>
      %261 = vector.broadcast %256 : vector<1x128xf32> to vector<128x128xf32>
      %262 = arith.mulf %260, %261 : vector<128x128xf32>
      %263 = arith.addf %247, %262 : vector<128x128xf32>
      %c16_i32_85 = arith.constant 16 : i32
      %264 = arith.minimumf %arg7, %263 : vector<128x128xf32>
      scf.yield %264 : vector<128x128xf32>
    }
    %c8_i32_0 = arith.constant 8 : i32
    %c0 = arith.constant 0 : index
    %c0_1 = arith.constant 0 : index
    %3 = vector.load %arg5[%c0, %c0_1] : memref<128x128xf32, #tpu.memory_space<vmem>>, vector<128x128xf32>
    tpu.vector_store %arg5[%c0, %c0_1], %2 {strides = array<i32>} : memref<128x128xf32, #tpu.memory_space<vmem>>, vector<128x128xf32>,
    return
  }
  func.func @transform_0(%arg0: i32) -> (i32, i32, i32) {
    %c0_i32 = arith.constant 0 : i32
    %c0_i32_0 = arith.constant 0 : i32
    %c0_i32_1 = arith.constant 0 : i32
    return %c0_i32, %arg0, %c0_i32_0 : i32, i32, i32
  }
  func.func @transform_1(%arg0: i32) -> (i32, i32) {
    %c0_i32 = arith.constant 0 : i32
    %c0_i32_0 = arith.constant 0 : i32
    %c0_i32_1 = arith.constant 0 : i32
    return %c0_i32, %c0_i32_0 : i32, i32
  }
  func.func @transform_2(%arg0: i32) -> (i32, i32) {
    %c0_i32 = arith.constant 0 : i32
    %c0_i32_0 = arith.constant 0 : i32
    %c0_i32_1 = arith.constant 0 : i32
    return %c0_i32, %c0_i32_0 : i32, i32
  }
  func.func @transform_3(%arg0: i32) -> (i32, i32) {
    %c0_i32 = arith.constant 0 : i32
    %c0_i32_0 = arith.constant 0 : i32
    %c0_i32_1 = arith.constant 0 : i32
    return %c0_i32, %c0_i32_0 : i32, i32
  }
  func.func @transform_4(%arg0: i32) -> (i32, i32) {
    %c0_i32 = arith.constant 0 : i32
    %c0_i32_0 = arith.constant 0 : i32
    return %arg0, %c0_i32 : i32, i32
  }
}

</mosaic_0001>

<bundles_post_ra>
// kernel: _cost_coords_pallas.1
= control target key start
LH: loop header
LB: loop body
LE: loop exit
PB: predicated region body
PF: predicated region fallthrough
CT: control target
= control target key end

     0   :  { %9 = vsyncpa [#allocation4], 0  ;;  %s7917_s0 = inlined_call_operand.vmem [shape: f32[16,256,1], index: 0, kind: input, shape index: {}]   ;;  %s7918_s1 = inlined_call_operand.vmem [shape: f32[128,128], index: 1, kind: input, shape index: {}]   ;;  %s7919_s2 = inlined_call_operand.vmem [shape: f32[16,128], index: 2, kind: input, shape index: {}]   ;;  %s7920_s3 = inlined_call_operand.vmem [shape: f32[8,128], index: 3, kind: input, shape index: {}]   ;;  %s7921_s4 = inlined_call_operand.hbm [shape: f32[256,128], index: 4, kind: output, shape index: {}]  }
   0x1   :  { %11 = vsyncpa [#allocation4 + $0x1], 0  ;;  %s4992_s15 = smov 0   ;;  %s4994_s16 = smov 0  }
   0x2   :  { %s4996_s17 = smov 0   ;;  %s4998_s18 = smov 0  }
   0x3 LB: > { %s4262_s19 = sadd.s32 4294967295, %s4893_s18   ;;  %s4263_s20 = sadd.s32 4294967294, %s4893_s18   ;;  %s4893_s18 = sphi %s4998_s18, %s8137_s18   ;;  %s4889_s17 = sphi %s4996_s17, %s8136_s17   ;;  %s4885_s16 = sphi %s4994_s16, %s8135_s16   ;;  %s4881_s15 = sphi %s4992_s15, %s8134_s15  }
   0x4   : > { %s5015_s21 = sadd.s32 1, %s4893_s18   ;;  %s24_s22 = sadd.s32 1, %s4889_s17 }
   0x5   : > { %s21_s23 = ssub.s32 %s4893_s18, %s5015_s21  ;;  %p31_p0 = scmp.ne.s32.totalorder %s4889_s17, %s4885_s16 }
   0x6   : > { %p22_p1 = scmp.eq.s32.totalorder %s21_s23, 0  ;;  %p32_p2 = scmp.eq.s32.totalorder %s4893_s18, 0 }
   0x7   : > { %p124_p3 = scmp.eq.s32.totalorder %s4262_s19, 1  ;;  %p129_p4 = scmp.ne.s32.totalorder %s4885_s16, %s4881_s15 }
   0x8   : > { %s5028_s24 = scalar_select %p22_p1, %s4889_s17, %s24_s22  }
   0x9   : > { %p33_p5 = por %p32_p2, %p31_p0  ;;  %p5030_p6 = por %p124_p3, %p31_p0 }
   0xa   : > { %p130_p7 = scmp.eq.s32.totalorder %s4263_s20, 1  ;;  %p4265_p9 = scmp.ge.s32.totalorder %s4893_s18, 2 }
   0xc   : > { %p5034_p8 = por %p130_p7, %p129_p4  ;;  %155 = sbr.rel (%p4265_p9) target bundleno = 151 (0x97), region = 28 }
  0x13   : > { %158 = sbr.rel (!%p33_p5) target bundleno = 151 (0x97), region = 32  ;;  %s160_s27 = sand.u32 (%p33_p5), 1, %s4889_s17  }
  0x14   : > { %s4581_s28 = sshll.u32 (%p33_p5), %s4893_s18, 7  ;;  %s4266_s29 = sshll.u32 (%p33_p5), %s160_s27, 11 }
  0x15   : > { %s5046_s6 = scalar_lea.vmem (%p33_p5), %s7917_s0, %s4581_s28  ;;  %s5051_s7 = scalar_lea.vmem (%p33_p5), [#allocation2], %s4266_s29 }
  0x16   : > { %v703_v0 = vld [vmem:[%s5046_s6] sm:$0xff] (%p33_p5)  ;;  %v705_v1 = vld [vmem:[%s5046_s6 + $0x8] sm:$0xff] (%p33_p5)  ;;  %v707_v2 = vld [vmem:[%s5046_s6 + $0x10] sm:$0xff] (%p33_p5) }
  0x17   : > { %704 = vst [vmem:[%s5051_s7] sm:$0xff] (%p33_p5), %v703_v0  ;;  %706 = vst [vmem:[%s5051_s7 + $0x8] sm:$0xff] (%p33_p5), %v705_v1  ;;  %v709_v3 = vld [vmem:[%s5046_s6 + $0x18] sm:$0xff] (%p33_p5)  ;;  %v711_v4 = vld [vmem:[%s5046_s6 + $0x20] sm:$0xff] (%p33_p5) }
  0x18   : > { %708 = vst [vmem:[%s5051_s7 + $0x10] sm:$0xff] (%p33_p5), %v707_v2  ;;  %v713_v5 = vld [vmem:[%s5046_s6 + $0x28] sm:$0xff] (%p33_p5)  ;;  %710 = vst [vmem:[%s5051_s7 + $0x18] sm:$0xff] (%p33_p5), %v709_v3  ;;  %v715_v6 = vld [vmem:[%s5046_s6 + $0x30] sm:$0xff] (%p33_p5) }
  0x19   : > { %712 = vst [vmem:[%s5051_s7 + $0x20] sm:$0xff] (%p33_p5), %v711_v4  ;;  %714 = vst [vmem:[%s5051_s7 + $0x28] sm:$0xff] (%p33_p5), %v713_v5  ;;  %v717_v7 = vld [vmem:[%s5046_s6 + $0x38] sm:$0xff] (%p33_p5)  ;;  %v719_v8 = vld [vmem:[%s5046_s6 + $0x40] sm:$0xff] (%p33_p5) }
  0x1a   : > { %716 = vst [vmem:[%s5051_s7 + $0x30] sm:$0xff] %v715_v6  ;;  %718 = vst [vmem:[%s5051_s7 + $0x38] sm:$0xff] %v717_v7  ;;  %v721_v9 = vld [vmem:[%s5046_s6 + $0x48] sm:$0xff]  ;;  %v723_v10 = vld [vmem:[%s5046_s6 + $0x50] sm:$0xff] }
  0x1b   : > { %720 = vst [vmem:[%s5051_s7 + $0x40] sm:$0xff] %v719_v8  ;;  %v725_v11 = vld [vmem:[%s5046_s6 + $0x58] sm:$0xff]  ;;  %722 = vst [vmem:[%s5051_s7 + $0x48] sm:$0xff] %v721_v9  ;;  %v727_v12 = vld [vmem:[%s5046_s6 + $0x60] sm:$0xff] }
  0x1c   : > { %724 = vst [vmem:[%s5051_s7 + $0x50] sm:$0xff] %v723_v10  ;;  %726 = vst [vmem:[%s5051_s7 + $0x58] sm:$0xff] %v725_v11  ;;  %v729_v13 = vld [vmem:[%s5046_s6 + $0x68] sm:$0xff]  ;;  %v731_v14 = vld [vmem:[%s5046_s6 + $0x70] sm:$0xff] }
  0x1d   : > { %728 = vst [vmem:[%s5051_s7 + $0x60] sm:$0xff] %v727_v12  ;;  %730 = vst [vmem:[%s5051_s7 + $0x68] sm:$0xff] %v729_v13  ;;  %v733_v15 = vld [vmem:[%s5046_s6 + $0x78] sm:$0xff]  ;;  %v735_v16 = vld [vmem:[%s5046_s6 + $0x100] sm:$0xff] }
  0x1e   : > { %732 = vst [vmem:[%s5051_s7 + $0x70] sm:$0xff] %v731_v14  ;;  %v737_v17 = vld [vmem:[%s5046_s6 + $0x108] sm:$0xff]  ;;  %734 = vst [vmem:[%s5051_s7 + $0x78] sm:$0xff] %v733_v15  ;;  %v739_v18 = vld [vmem:[%s5046_s6 + $0x110] sm:$0xff] }
  0x1f   : > { %736 = vst [vmem:[%s5051_s7 + $0x80] sm:$0xff] %v735_v16  ;;  %738 = vst [vmem:[%s5051_s7 + $0x88] sm:$0xff] %v737_v17  ;;  %v741_v19 = vld [vmem:[%s5046_s6 + $0x118] sm:$0xff]  ;;  %v743_v20 = vld [vmem:[%s5046_s6 + $0x120] sm:$0xff] }
  0x20   : > { %740 = vst [vmem:[%s5051_s7 + $0x90] sm:$0xff] %v739_v18  ;;  %742 = vst [vmem:[%s5051_s7 + $0x98] sm:$0xff] %v741_v19  ;;  %v745_v21 = vld [vmem:[%s5046_s6 + $0x128] sm:$0xff]  ;;  %v747_v22 = vld [vmem:[%s5046_s6 + $0x130] sm:$0xff] }
  0x21   : > { %744 = vst [vmem:[%s5051_s7 + $0xa0] sm:$0xff] %v743_v20  ;;  %v749_v23 = vld [vmem:[%s5046_s6 + $0x138] sm:$0xff]  ;;  %746 = vst [vmem:[%s5051_s7 + $0xa8] sm:$0xff] %v745_v21  ;;  %v751_v24 = vld [vmem:[%s5046_s6 + $0x140] sm:$0xff] }
  0x22   : > { %748 = vst [vmem:[%s5051_s7 + $0xb0] sm:$0xff] %v747_v22  ;;  %750 = vst [vmem:[%s5051_s7 + $0xb8] sm:$0xff] %v749_v23  ;;  %v753_v25 = vld [vmem:[%s5046_s6 + $0x148] sm:$0xff]  ;;  %v755_v26 = vld [vmem:[%s5046_s6 + $0x150] sm:$0xff] }
  0x23   : > { %752 = vst [vmem:[%s5051_s7 + $0xc0] sm:$0xff] %v751_v24  ;;  %754 = vst [vmem:[%s5051_s7 + $0xc8] sm:$0xff] %v753_v25  ;;  %v757_v27 = vld [vmem:[%s5046_s6 + $0x158] sm:$0xff]  ;;  %v759_v28 = vld [vmem:[%s5046_s6 + $0x160] sm:$0xff] }
  0x24   : > { %756 = vst [vmem:[%s5051_s7 + $0xd0] sm:$0xff] %v755_v26  ;;  %v761_v29 = vld [vmem:[%s5046_s6 + $0x168] sm:$0xff]  ;;  %758 = vst [vmem:[%s5051_s7 + $0xd8] sm:$0xff] %v757_v27  ;;  %v763_v30 = vld [vmem:[%s5046_s6 + $0x170] sm:$0xff] }
  0x25   : > { %760 = vst [vmem:[%s5051_s7 + $0xe0] sm:$0xff] %v759_v28  ;;  %762 = vst [vmem:[%s5051_s7 + $0xe8] sm:$0xff] %v761_v29  ;;  %v765_v31 = vld [vmem:[%s5046_s6 + $0x178] sm:$0xff]  ;;  %v767_v32 = vld [vmem:[%s5046_s6 + $0x200] sm:$0xff] }
  0x26   : > { %764 = vst [vmem:[%s5051_s7 + $0xf0] sm:$0xff] %v763_v30  ;;  %766 = vst [vmem:[%s5051_s7 + $0xf8] sm:$0xff] %v765_v31  ;;  %v769_v33 = vld [vmem:[%s5046_s6 + $0x208] sm:$0xff]  ;;  %v771_v34 = vld [vmem:[%s5046_s6 + $0x210] sm:$0xff] }
  0x27   : > { %768 = vst [vmem:[%s5051_s7 + $0x100] sm:$0xff] %v767_v32  ;;  %v773_v35 = vld [vmem:[%s5046_s6 + $0x218] sm:$0xff]  ;;  %770 = vst [vmem:[%s5051_s7 + $0x108] sm:$0xff] %v769_v33  ;;  %v775_v36 = vld [vmem:[%s5046_s6 + $0x220] sm:$0xff] }
  0x28   : > { %772 = vst [vmem:[%s5051_s7 + $0x110] sm:$0xff] %v771_v34  ;;  %774 = vst [vmem:[%s5051_s7 + $0x118] sm:$0xff] %v773_v35  ;;  %v777_v37 = vld [vmem:[%s5046_s6 + $0x228] sm:$0xff]  ;;  %v779_v38 = vld [vmem:[%s5046_s6 + $0x230] sm:$0xff] }
  0x29   : > { %776 = vst [vmem:[%s5051_s7 + $0x120] sm:$0xff] %v775_v36  ;;  %778 = vst [vmem:[%s5051_s7 + $0x128] sm:$0xff] %v777_v37  ;;  %v781_v39 = vld [vmem:[%s5046_s6 + $0x238] sm:$0xff]  ;;  %v783_v40 = vld [vmem:[%s5046_s6 + $0x240] sm:$0xff] }
  0x2a   : > { %780 = vst [vmem:[%s5051_s7 + $0x130] sm:$0xff] %v779_v38  ;;  %v785_v41 = vld [vmem:[%s5046_s6 + $0x248] sm:$0xff]  ;;  %782 = vst [vmem:[%s5051_s7 + $0x138] sm:$0xff] %v781_v39  ;;  %v787_v42 = vld [vmem:[%s5046_s6 + $0x250] sm:$0xff] }
  0x2b   : > { %784 = vst [vmem:[%s5051_s7 + $0x140] sm:$0xff] %v783_v40  ;;  %786 = vst [vmem:[%s5051_s7 + $0x148] sm:$0xff] %v785_v41  ;;  %v789_v43 = vld [vmem:[%s5046_s6 + $0x258] sm:$0xff]  ;;  %v791_v44 = vld [vmem:[%s5046_s6 + $0x260] sm:$0xff] }
  0x2c   : > { %788 = vst [vmem:[%s5051_s7 + $0x150] sm:$0xff] %v787_v42  ;;  %790 = vst [vmem:[%s5051_s7 + $0x158] sm:$0xff] %v789_v43  ;;  %v793_v45 = vld [vmem:[%s5046_s6 + $0x268] sm:$0xff]  ;;  %v795_v46 = vld [vmem:[%s5046_s6 + $0x270] sm:$0xff] }
  0x2d   : > { %792 = vst [vmem:[%s5051_s7 + $0x160] sm:$0xff] %v791_v44  ;;  %v797_v47 = vld [vmem:[%s5046_s6 + $0x278] sm:$0xff]  ;;  %794 = vst [vmem:[%s5051_s7 + $0x168] sm:$0xff] %v793_v45  ;;  %v799_v48 = vld [vmem:[%s5046_s6 + $0x300] sm:$0xff] }
  0x2e   : > { %796 = vst [vmem:[%s5051_s7 + $0x170] sm:$0xff] %v795_v46  ;;  %798 = vst [vmem:[%s5051_s7 + $0x178] sm:$0xff] %v797_v47  ;;  %v801_v49 = vld [vmem:[%s5046_s6 + $0x308] sm:$0xff]  ;;  %v803_v50 = vld [vmem:[%s5046_s6 + $0x310] sm:$0xff] }
  0x2f   : > { %800 = vst [vmem:[%s5051_s7 + $0x180] sm:$0xff] %v799_v48  ;;  %802 = vst [vmem:[%s5051_s7 + $0x188] sm:$0xff] %v801_v49  ;;  %v805_v51 = vld [vmem:[%s5046_s6 + $0x318] sm:$0xff]  ;;  %v807_v52 = vld [vmem:[%s5046_s6 + $0x320] sm:$0xff] }
  0x30   : > { %804 = vst [vmem:[%s5051_s7 + $0x190] sm:$0xff] %v803_v50  ;;  %v809_v53 = vld [vmem:[%s5046_s6 + $0x328] sm:$0xff]  ;;  %806 = vst [vmem:[%s5051_s7 + $0x198] sm:$0xff] %v805_v51  ;;  %v811_v54 = vld [vmem:[%s5046_s6 + $0x330] sm:$0xff] }
  0x31   : > { %808 = vst [vmem:[%s5051_s7 + $0x1a0] sm:$0xff] %v807_v52  ;;  %810 = vst [vmem:[%s5051_s7 + $0x1a8] sm:$0xff] %v809_v53  ;;  %v813_v55 = vld [vmem:[%s5046_s6 + $0x338] sm:$0xff]  ;;  %v815_v56 = vld [vmem:[%s5046_s6 + $0x340] sm:$0xff] }
  0x32   : > { %812 = vst [vmem:[%s5051_s7 + $0x1b0] sm:$0xff] %v811_v54  ;;  %814 = vst [vmem:[%s5051_s7 + $0x1b8] sm:$0xff] %v813_v55  ;;  %v817_v57 = vld [vmem:[%s5046_s6 + $0x348] sm:$0xff]  ;;  %v819_v58 = vld [vmem:[%s5046_s6 + $0x350] sm:$0xff] }
  0x33   : > { %816 = vst [vmem:[%s5051_s7 + $0x1c0] sm:$0xff] %v815_v56  ;;  %v821_v59 = vld [vmem:[%s5046_s6 + $0x358] sm:$0xff]  ;;  %818 = vst [vmem:[%s5051_s7 + $0x1c8] sm:$0xff] %v817_v57  ;;  %v823_v60 = vld [vmem:[%s5046_s6 + $0x360] sm:$0xff] }
  0x34   : > { %820 = vst [vmem:[%s5051_s7 + $0x1d0] sm:$0xff] %v819_v58  ;;  %822 = vst [vmem:[%s5051_s7 + $0x1d8] sm:$0xff] %v821_v59  ;;  %v825_v61 = vld [vmem:[%s5046_s6 + $0x368] sm:$0xff]  ;;  %v827_v62 = vld [vmem:[%s5046_s6 + $0x370] sm:$0xff] }
  0x35   : > { %824 = vst [vmem:[%s5051_s7 + $0x1e0] sm:$0xff] %v823_v60  ;;  %826 = vst [vmem:[%s5051_s7 + $0x1e8] sm:$0xff] %v825_v61  ;;  %v829_v63 = vld [vmem:[%s5046_s6 + $0x378] sm:$0xff]  ;;  %v831_v0 = vld [vmem:[%s5046_s6 + $0x400] sm:$0xff] }
  0x36   : > { %828 = vst [vmem:[%s5051_s7 + $0x1f0] sm:$0xff] %v827_v62  ;;  %v833_v1 = vld [vmem:[%s5046_s6 + $0x408] sm:$0xff]  ;;  %830 = vst [vmem:[%s5051_s7 + $0x1f8] sm:$0xff] %v829_v63  ;;  %v835_v2 = vld [vmem:[%s5046_s6 + $0x410] sm:$0xff] }
  0x37   : > { %832 = vst [vmem:[%s5051_s7 + $0x200] sm:$0xff] %v831_v0  ;;  %834 = vst [vmem:[%s5051_s7 + $0x208] sm:$0xff] %v833_v1  ;;  %v837_v3 = vld [vmem:[%s5046_s6 + $0x418] sm:$0xff]  ;;  %v839_v4 = vld [vmem:[%s5046_s6 + $0x420] sm:$0xff] }
  0x38   : > { %836 = vst [vmem:[%s5051_s7 + $0x210] sm:$0xff] %v835_v2  ;;  %838 = vst [vmem:[%s5051_s7 + $0x218] sm:$0xff] %v837_v3  ;;  %v841_v5 = vld [vmem:[%s5046_s6 + $0x428] sm:$0xff]  ;;  %v843_v6 = vld [vmem:[%s5046_s6 + $0x430] sm:$0xff] }
  0x39   : > { %840 = vst [vmem:[%s5051_s7 + $0x220] sm:$0xff] %v839_v4  ;;  %v845_v7 = vld [vmem:[%s5046_s6 + $0x438] sm:$0xff]  ;;  %842 = vst [vmem:[%s5051_s7 + $0x228] sm:$0xff] %v841_v5  ;;  %v847_v8 = vld [vmem:[%s5046_s6 + $0x440] sm:$0xff] }
  0x3a   : > { %844 = vst [vmem:[%s5051_s7 + $0x230] sm:$0xff] %v843_v6  ;;  %846 = vst [vmem:[%s5051_s7 + $0x238] sm:$0xff] %v845_v7  ;;  %v849_v9 = vld [vmem:[%s5046_s6 + $0x448] sm:$0xff]  ;;  %v851_v10 = vld [vmem:[%s5046_s6 + $0x450] sm:$0xff] }
  0x3b   : > { %848 = vst [vmem:[%s5051_s7 + $0x240] sm:$0xff] %v847_v8  ;;  %850 = vst [vmem:[%s5051_s7 + $0x248] sm:$0xff] %v849_v9  ;;  %v853_v11 = vld [vmem:[%s5046_s6 + $0x458] sm:$0xff]  ;;  %v855_v12 = vld [vmem:[%s5046_s6 + $0x460] sm:$0xff] }
  0x3c   : > { %852 = vst [vmem:[%s5051_s7 + $0x250] sm:$0xff] %v851_v10  ;;  %v857_v13 = vld [vmem:[%s5046_s6 + $0x468] sm:$0xff]  ;;  %854 = vst [vmem:[%s5051_s7 + $0x258] sm:$0xff] %v853_v11  ;;  %v859_v14 = vld [vmem:[%s5046_s6 + $0x470] sm:$0xff] }
  0x3d   : > { %856 = vst [vmem:[%s5051_s7 + $0x260] sm:$0xff] %v855_v12  ;;  %858 = vst [vmem:[%s5051_s7 + $0x268] sm:$0xff] %v857_v13  ;;  %v861_v15 = vld [vmem:[%s5046_s6 + $0x478] sm:$0xff]  ;;  %v863_v16 = vld [vmem:[%s5046_s6 + $0x500] sm:$0xff] }
  0x3e   : > { %860 = vst [vmem:[%s5051_s7 + $0x270] sm:$0xff] %v859_v14  ;;  %862 = vst [vmem:[%s5051_s7 + $0x278] sm:$0xff] %v861_v15  ;;  %v865_v17 = vld [vmem:[%s5046_s6 + $0x508] sm:$0xff]  ;;  %v867_v18 = vld [vmem:[%s5046_s6 + $0x510] sm:$0xff] }
  0x3f   : > { %864 = vst [vmem:[%s5051_s7 + $0x280] sm:$0xff] %v863_v16  ;;  %v869_v19 = vld [vmem:[%s5046_s6 + $0x518] sm:$0xff]  ;;  %866 = vst [vmem:[%s5051_s7 + $0x288] sm:$0xff] %v865_v17  ;;  %v871_v20 = vld [vmem:[%s5046_s6 + $0x520] sm:$0xff] }
  0x40   : > { %868 = vst [vmem:[%s5051_s7 + $0x290] sm:$0xff] %v867_v18  ;;  %870 = vst [vmem:[%s5051_s7 + $0x298] sm:$0xff] %v869_v19  ;;  %v873_v21 = vld [vmem:[%s5046_s6 + $0x528] sm:$0xff]  ;;  %v875_v22 = vld [vmem:[%s5046_s6 + $0x530] sm:$0xff] }
  0x41   : > { %872 = vst [vmem:[%s5051_s7 + $0x2a0] sm:$0xff] %v871_v20  ;;  %874 = vst [vmem:[%s5051_s7 + $0x2a8] sm:$0xff] %v873_v21  ;;  %v877_v23 = vld [vmem:[%s5046_s6 + $0x538] sm:$0xff]  ;;  %v879_v24 = vld [vmem:[%s5046_s6 + $0x540] sm:$0xff] }
  0x42   : > { %876 = vst [vmem:[%s5051_s7 + $0x2b0] sm:$0xff] %v875_v22  ;;  %v881_v25 = vld [vmem:[%s5046_s6 + $0x548] sm:$0xff]  ;;  %878 = vst [vmem:[%s5051_s7 + $0x2b8] sm:$0xff] %v877_v23  ;;  %v883_v26 = vld [vmem:[%s5046_s6 + $0x550] sm:$0xff] }
  0x43   : > { %880 = vst [vmem:[%s5051_s7 + $0x2c0] sm:$0xff] %v879_v24  ;;  %882 = vst [vmem:[%s5051_s7 + $0x2c8] sm:$0xff] %v881_v25  ;;  %v885_v27 = vld [vmem:[%s5046_s6 + $0x558] sm:$0xff]  ;;  %v887_v28 = vld [vmem:[%s5046_s6 + $0x560] sm:$0xff] }
  0x44   : > { %884 = vst [vmem:[%s5051_s7 + $0x2d0] sm:$0xff] %v883_v26  ;;  %886 = vst [vmem:[%s5051_s7 + $0x2d8] sm:$0xff] %v885_v27  ;;  %v889_v29 = vld [vmem:[%s5046_s6 + $0x568] sm:$0xff]  ;;  %v891_v30 = vld [vmem:[%s5046_s6 + $0x570] sm:$0xff] }
  0x45   : > { %888 = vst [vmem:[%s5051_s7 + $0x2e0] sm:$0xff] %v887_v28  ;;  %v893_v31 = vld [vmem:[%s5046_s6 + $0x578] sm:$0xff]  ;;  %890 = vst [vmem:[%s5051_s7 + $0x2e8] sm:$0xff] %v889_v29  ;;  %v895_v32 = vld [vmem:[%s5046_s6 + $0x600] sm:$0xff] }
  0x46   : > { %892 = vst [vmem:[%s5051_s7 + $0x2f0] sm:$0xff] %v891_v30  ;;  %894 = vst [vmem:[%s5051_s7 + $0x2f8] sm:$0xff] %v893_v31  ;;  %v897_v33 = vld [vmem:[%s5046_s6 + $0x608] sm:$0xff]  ;;  %v899_v34 = vld [vmem:[%s5046_s6 + $0x610] sm:$0xff] }
  0x47   : > { %896 = vst [vmem:[%s5051_s7 + $0x300] sm:$0xff] %v895_v32  ;;  %898 = vst [vmem:[%s5051_s7 + $0x308] sm:$0xff] %v897_v33  ;;  %v901_v35 = vld [vmem:[%s5046_s6 + $0x618] sm:$0xff]  ;;  %v903_v36 = vld [vmem:[%s5046_s6 + $0x620] sm:$0xff] }
  0x48   : > { %900 = vst [vmem:[%s5051_s7 + $0x310] sm:$0xff] %v899_v34  ;;  %v905_v37 = vld [vmem:[%s5046_s6 + $0x628] sm:$0xff]  ;;  %902 = vst [vmem:[%s5051_s7 + $0x318] sm:$0xff] %v901_v35  ;;  %v907_v38 = vld [vmem:[%s5046_s6 + $0x630] sm:$0xff] }
  0x49   : > { %904 = vst [vmem:[%s5051_s7 + $0x320] sm:$0xff] %v903_v36  ;;  %906 = vst [vmem:[%s5051_s7 + $0x328] sm:$0xff] %v905_v37  ;;  %v909_v39 = vld [vmem:[%s5046_s6 + $0x638] sm:$0xff]  ;;  %v911_v40 = vld [vmem:[%s5046_s6 + $0x640] sm:$0xff] }
  0x4a   : > { %908 = vst [vmem:[%s5051_s7 + $0x330] sm:$0xff] %v907_v38  ;;  %910 = vst [vmem:[%s5051_s7 + $0x338] sm:$0xff] %v909_v39  ;;  %v913_v41 = vld [vmem:[%s5046_s6 + $0x648] sm:$0xff]  ;;  %v915_v42 = vld [vmem:[%s5046_s6 + $0x650] sm:$0xff] }
  0x4b   : > { %912 = vst [vmem:[%s5051_s7 + $0x340] sm:$0xff] %v911_v40  ;;  %v917_v43 = vld [vmem:[%s5046_s6 + $0x658] sm:$0xff]  ;;  %914 = vst [vmem:[%s5051_s7 + $0x348] sm:$0xff] %v913_v41  ;;  %v919_v44 = vld [vmem:[%s5046_s6 + $0x660] sm:$0xff] }
  0x4c   : > { %916 = vst [vmem:[%s5051_s7 + $0x350] sm:$0xff] %v915_v42  ;;  %918 = vst [vmem:[%s5051_s7 + $0x358] sm:$0xff] %v917_v43  ;;  %v921_v45 = vld [vmem:[%s5046_s6 + $0x668] sm:$0xff]  ;;  %v923_v46 = vld [vmem:[%s5046_s6 + $0x670] sm:$0xff] }
  0x4d   : > { %920 = vst [vmem:[%s5051_s7 + $0x360] sm:$0xff] %v919_v44  ;;  %922 = vst [vmem:[%s5051_s7 + $0x368] sm:$0xff] %v921_v45  ;;  %v925_v47 = vld [vmem:[%s5046_s6 + $0x678] sm:$0xff]  ;;  %v927_v48 = vld [vmem:[%s5046_s6 + $0x700] sm:$0xff] }
  0x4e   : > { %924 = vst [vmem:[%s5051_s7 + $0x370] sm:$0xff] %v923_v46  ;;  %v929_v49 = vld [vmem:[%s5046_s6 + $0x708] sm:$0xff]  ;;  %926 = vst [vmem:[%s5051_s7 + $0x378] sm:$0xff] %v925_v47  ;;  %v931_v50 = vld [vmem:[%s5046_s6 + $0x710] sm:$0xff] }
  0x4f   : > { %928 = vst [vmem:[%s5051_s7 + $0x380] sm:$0xff] %v927_v48  ;;  %930 = vst [vmem:[%s5051_s7 + $0x388] sm:$0xff] %v929_v49  ;;  %v933_v51 = vld [vmem:[%s5046_s6 + $0x718] sm:$0xff]  ;;  %v935_v52 = vld [vmem:[%s5046_s6 + $0x720] sm:$0xff] }
  0x50   : > { %932 = vst [vmem:[%s5051_s7 + $0x390] sm:$0xff] %v931_v50  ;;  %934 = vst [vmem:[%s5051_s7 + $0x398] sm:$0xff] %v933_v51  ;;  %v937_v53 = vld [vmem:[%s5046_s6 + $0x728] sm:$0xff]  ;;  %v939_v54 = vld [vmem:[%s5046_s6 + $0x730] sm:$0xff] }
  0x51   : > { %936 = vst [vmem:[%s5051_s7 + $0x3a0] sm:$0xff] %v935_v52  ;;  %v941_v55 = vld [vmem:[%s5046_s6 + $0x738] sm:$0xff]  ;;  %938 = vst [vmem:[%s5051_s7 + $0x3a8] sm:$0xff] %v937_v53  ;;  %v943_v56 = vld [vmem:[%s5046_s6 + $0x740] sm:$0xff] }
  0x52   : > { %940 = vst [vmem:[%s5051_s7 + $0x3b0] sm:$0xff] %v939_v54  ;;  %942 = vst [vmem:[%s5051_s7 + $0x3b8] sm:$0xff] %v941_v55  ;;  %v945_v57 = vld [vmem:[%s5046_s6 + $0x748] sm:$0xff]  ;;  %v947_v58 = vld [vmem:[%s5046_s6 + $0x750] sm:$0xff] }
  0x53   : > { %944 = vst [vmem:[%s5051_s7 + $0x3c0] sm:$0xff] %v943_v56  ;;  %946 = vst [vmem:[%s5051_s7 + $0x3c8] sm:$0xff] %v945_v57  ;;  %v949_v59 = vld [vmem:[%s5046_s6 + $0x758] sm:$0xff]  ;;  %v951_v60 = vld [vmem:[%s5046_s6 + $0x760] sm:$0xff] }
  0x54   : > { %948 = vst [vmem:[%s5051_s7 + $0x3d0] sm:$0xff] %v947_v58  ;;  %v953_v61 = vld [vmem:[%s5046_s6 + $0x768] sm:$0xff]  ;;  %950 = vst [vmem:[%s5051_s7 + $0x3d8] sm:$0xff] %v949_v59  ;;  %v955_v62 = vld [vmem:[%s5046_s6 + $0x770] sm:$0xff] }
  0x55   : > { %952 = vst [vmem:[%s5051_s7 + $0x3e0] sm:$0xff] %v951_v60  ;;  %954 = vst [vmem:[%s5051_s7 + $0x3e8] sm:$0xff] %v953_v61  ;;  %v957_v63 = vld [vmem:[%s5046_s6 + $0x778] sm:$0xff]  ;;  %v959_v0 = vld [vmem:[%s5046_s6 + $0x800] sm:$0xff] }
  0x56   : > { %956 = vst [vmem:[%s5051_s7 + $0x3f0] sm:$0xff] %v955_v62  ;;  %958 = vst [vmem:[%s5051_s7 + $0x3f8] sm:$0xff] %v957_v63  ;;  %v961_v1 = vld [vmem:[%s5046_s6 + $0x808] sm:$0xff]  ;;  %v963_v2 = vld [vmem:[%s5046_s6 + $0x810] sm:$0xff] }
  0x57   : > { %960 = vst [vmem:[%s5051_s7 + $0x400] sm:$0xff] %v959_v0  ;;  %v965_v3 = vld [vmem:[%s5046_s6 + $0x818] sm:$0xff]  ;;  %962 = vst [vmem:[%s5051_s7 + $0x408] sm:$0xff] %v961_v1  ;;  %v967_v4 = vld [vmem:[%s5046_s6 + $0x820] sm:$0xff] }
  0x58   : > { %964 = vst [vmem:[%s5051_s7 + $0x410] sm:$0xff] %v963_v2  ;;  %966 = vst [vmem:[%s5051_s7 + $0x418] sm:$0xff] %v965_v3  ;;  %v969_v5 = vld [vmem:[%s5046_s6 + $0x828] sm:$0xff]  ;;  %v971_v6 = vld [vmem:[%s5046_s6 + $0x830] sm:$0xff] }
  0x59   : > { %968 = vst [vmem:[%s5051_s7 + $0x420] sm:$0xff] %v967_v4  ;;  %970 = vst [vmem:[%s5051_s7 + $0x428] sm:$0xff] %v969_v5  ;;  %v973_v7 = vld [vmem:[%s5046_s6 + $0x838] sm:$0xff]  ;;  %v975_v8 = vld [vmem:[%s5046_s6 + $0x840] sm:$0xff] }
  0x5a   : > { %972 = vst [vmem:[%s5051_s7 + $0x430] sm:$0xff] %v971_v6  ;;  %v977_v9 = vld [vmem:[%s5046_s6 + $0x848] sm:$0xff]  ;;  %974 = vst [vmem:[%s5051_s7 + $0x438] sm:$0xff] %v973_v7  ;;  %v979_v10 = vld [vmem:[%s5046_s6 + $0x850] sm:$0xff] }
  0x5b   : > { %976 = vst [vmem:[%s5051_s7 + $0x440] sm:$0xff] %v975_v8  ;;  %978 = vst [vmem:[%s5051_s7 + $0x448] sm:$0xff] %v977_v9  ;;  %v981_v11 = vld [vmem:[%s5046_s6 + $0x858] sm:$0xff]  ;;  %v983_v12 = vld [vmem:[%s5046_s6 + $0x860] sm:$0xff] }
  0x5c   : > { %980 = vst [vmem:[%s5051_s7 + $0x450] sm:$0xff] %v979_v10  ;;  %982 = vst [vmem:[%s5051_s7 + $0x458] sm:$0xff] %v981_v11  ;;  %v985_v13 = vld [vmem:[%s5046_s6 + $0x868] sm:$0xff]  ;;  %v987_v14 = vld [vmem:[%s5046_s6 + $0x870] sm:$0xff] }
  0x5d   : > { %984 = vst [vmem:[%s5051_s7 + $0x460] sm:$0xff] %v983_v12  ;;  %v989_v15 = vld [vmem:[%s5046_s6 + $0x878] sm:$0xff]  ;;  %986 = vst [vmem:[%s5051_s7 + $0x468] sm:$0xff] %v985_v13  ;;  %v991_v16 = vld [vmem:[%s5046_s6 + $0x900] sm:$0xff] }
  0x5e   : > { %988 = vst [vmem:[%s5051_s7 + $0x470] sm:$0xff] %v987_v14  ;;  %990 = vst [vmem:[%s5051_s7 + $0x478] sm:$0xff] %v989_v15  ;;  %v993_v17 = vld [vmem:[%s5046_s6 + $0x908] sm:$0xff]  ;;  %v995_v18 = vld [vmem:[%s5046_s6 + $0x910] sm:$0xff] }
  0x5f   : > { %992 = vst [vmem:[%s5051_s7 + $0x480] sm:$0xff] %v991_v16  ;;  %994 = vst [vmem:[%s5051_s7 + $0x488] sm:$0xff] %v993_v17  ;;  %v997_v19 = vld [vmem:[%s5046_s6 + $0x918] sm:$0xff]  ;;  %v999_v20 = vld [vmem:[%s5046_s6 + $0x920] sm:$0xff] }
  0x60   : > { %996 = vst [vmem:[%s5051_s7 + $0x490] sm:$0xff] %v995_v18  ;;  %v1001_v21 = vld [vmem:[%s5046_s6 + $0x928] sm:$0xff]  ;;  %998 = vst [vmem:[%s5051_s7 + $0x498] sm:$0xff] %v997_v19  ;;  %v1003_v22 = vld [vmem:[%s5046_s6 + $0x930] sm:$0xff] }
  0x61   : > { %1000 = vst [vmem:[%s5051_s7 + $0x4a0] sm:$0xff] %v999_v20  ;;  %1002 = vst [vmem:[%s5051_s7 + $0x4a8] sm:$0xff] %v1001_v21  ;;  %v1005_v23 = vld [vmem:[%s5046_s6 + $0x938] sm:$0xff]  ;;  %v1007_v24 = vld [vmem:[%s5046_s6 + $0x940] sm:$0xff] }
  0x62   : > { %1004 = vst [vmem:[%s5051_s7 + $0x4b0] sm:$0xff] %v1003_v22  ;;  %1006 = vst [vmem:[%s5051_s7 + $0x4b8] sm:$0xff] %v1005_v23  ;;  %v1009_v25 = vld [vmem:[%s5046_s6 + $0x948] sm:$0xff]  ;;  %v1011_v26 = vld [vmem:[%s5046_s6 + $0x950] sm:$0xff] }
  0x63   : > { %1008 = vst [vmem:[%s5051_s7 + $0x4c0] sm:$0xff] %v1007_v24  ;;  %v1013_v27 = vld [vmem:[%s5046_s6 + $0x958] sm:$0xff]  ;;  %1010 = vst [vmem:[%s5051_s7 + $0x4c8] sm:$0xff] %v1009_v25  ;;  %v1015_v28 = vld [vmem:[%s5046_s6 + $0x960] sm:$0xff] }
  0x64   : > { %1012 = vst [vmem:[%s5051_s7 + $0x4d0] sm:$0xff] %v1011_v26  ;;  %1014 = vst [vmem:[%s5051_s7 + $0x4d8] sm:$0xff] %v1013_v27  ;;  %v1017_v29 = vld [vmem:[%s5046_s6 + $0x968] sm:$0xff]  ;;  %v1019_v30 = vld [vmem:[%s5046_s6 + $0x970] sm:$0xff] }
  0x65   : > { %1016 = vst [vmem:[%s5051_s7 + $0x4e0] sm:$0xff] %v1015_v28  ;;  %1018 = vst [vmem:[%s5051_s7 + $0x4e8] sm:$0xff] %v1017_v29  ;;  %v1021_v31 = vld [vmem:[%s5046_s6 + $0x978] sm:$0xff]  ;;  %v1023_v32 = vld [vmem:[%s5046_s6 + $0xa00] sm:$0xff] }
  0x66   : > { %1020 = vst [vmem:[%s5051_s7 + $0x4f0] sm:$0xff] %v1019_v30  ;;  %v1025_v33 = vld [vmem:[%s5046_s6 + $0xa08] sm:$0xff]  ;;  %1022 = vst [vmem:[%s5051_s7 + $0x4f8] sm:$0xff] %v1021_v31  ;;  %v1027_v34 = vld [vmem:[%s5046_s6 + $0xa10] sm:$0xff] }
  0x67   : > { %1024 = vst [vmem:[%s5051_s7 + $0x500] sm:$0xff] %v1023_v32  ;;  %1026 = vst [vmem:[%s5051_s7 + $0x508] sm:$0xff] %v1025_v33  ;;  %v1029_v35 = vld [vmem:[%s5046_s6 + $0xa18] sm:$0xff]  ;;  %v1031_v36 = vld [vmem:[%s5046_s6 + $0xa20] sm:$0xff] }
  0x68   : > { %1028 = vst [vmem:[%s5051_s7 + $0x510] sm:$0xff] %v1027_v34  ;;  %1030 = vst [vmem:[%s5051_s7 + $0x518] sm:$0xff] %v1029_v35  ;;  %v1033_v37 = vld [vmem:[%s5046_s6 + $0xa28] sm:$0xff]  ;;  %v1035_v38 = vld [vmem:[%s5046_s6 + $0xa30] sm:$0xff] }
  0x69   : > { %1032 = vst [vmem:[%s5051_s7 + $0x520] sm:$0xff] %v1031_v36  ;;  %v1037_v39 = vld [vmem:[%s5046_s6 + $0xa38] sm:$0xff]  ;;  %1034 = vst [vmem:[%s5051_s7 + $0x528] sm:$0xff] %v1033_v37  ;;  %v1039_v40 = vld [vmem:[%s5046_s6 + $0xa40] sm:$0xff] }
  0x6a   : > { %1036 = vst [vmem:[%s5051_s7 + $0x530] sm:$0xff] %v1035_v38  ;;  %1038 = vst [vmem:[%s5051_s7 + $0x538] sm:$0xff] %v1037_v39  ;;  %v1041_v41 = vld [vmem:[%s5046_s6 + $0xa48] sm:$0xff]  ;;  %v1043_v42 = vld [vmem:[%s5046_s6 + $0xa50] sm:$0xff] }
  0x6b   : > { %1040 = vst [vmem:[%s5051_s7 + $0x540] sm:$0xff] %v1039_v40  ;;  %1042 = vst [vmem:[%s5051_s7 + $0x548] sm:$0xff] %v1041_v41  ;;  %v1045_v43 = vld [vmem:[%s5046_s6 + $0xa58] sm:$0xff]  ;;  %v1047_v44 = vld [vmem:[%s5046_s6 + $0xa60] sm:$0xff] }
  0x6c   : > { %1044 = vst [vmem:[%s5051_s7 + $0x550] sm:$0xff] %v1043_v42  ;;  %v1049_v45 = vld [vmem:[%s5046_s6 + $0xa68] sm:$0xff]  ;;  %1046 = vst [vmem:[%s5051_s7 + $0x558] sm:$0xff] %v1045_v43  ;;  %v1051_v46 = vld [vmem:[%s5046_s6 + $0xa70] sm:$0xff] }
  0x6d   : > { %1048 = vst [vmem:[%s5051_s7 + $0x560] sm:$0xff] %v1047_v44  ;;  %1050 = vst [vmem:[%s5051_s7 + $0x568] sm:$0xff] %v1049_v45  ;;  %v1053_v47 = vld [vmem:[%s5046_s6 + $0xa78] sm:$0xff]  ;;  %v1055_v48 = vld [vmem:[%s5046_s6 + $0xb00] sm:$0xff] }
  0x6e   : > { %1052 = vst [vmem:[%s5051_s7 + $0x570] sm:$0xff] %v1051_v46  ;;  %1054 = vst [vmem:[%s5051_s7 + $0x578] sm:$0xff] %v1053_v47  ;;  %v1057_v49 = vld [vmem:[%s5046_s6 + $0xb08] sm:$0xff]  ;;  %v1059_v50 = vld [vmem:[%s5046_s6 + $0xb10] sm:$0xff] }
  0x6f   : > { %1056 = vst [vmem:[%s5051_s7 + $0x580] sm:$0xff] %v1055_v48  ;;  %v1061_v51 = vld [vmem:[%s5046_s6 + $0xb18] sm:$0xff]  ;;  %1058 = vst [vmem:[%s5051_s7 + $0x588] sm:$0xff] %v1057_v49  ;;  %v1063_v52 = vld [vmem:[%s5046_s6 + $0xb20] sm:$0xff] }
  0x70   : > { %1060 = vst [vmem:[%s5051_s7 + $0x590] sm:$0xff] %v1059_v50  ;;  %1062 = vst [vmem:[%s5051_s7 + $0x598] sm:$0xff] %v1061_v51  ;;  %v1065_v53 = vld [vmem:[%s5046_s6 + $0xb28] sm:$0xff]  ;;  %v1067_v54 = vld [vmem:[%s5046_s6 + $0xb30] sm:$0xff] }
  0x71   : > { %1064 = vst [vmem:[%s5051_s7 + $0x5a0] sm:$0xff] %v1063_v52  ;;  %1066 = vst [vmem:[%s5051_s7 + $0x5a8] sm:$0xff] %v1065_v53  ;;  %v1069_v55 = vld [vmem:[%s5046_s6 + $0xb38] sm:$0xff]  ;;  %v1071_v56 = vld [vmem:[%s5046_s6 + $0xb40] sm:$0xff] }
  0x72   : > { %1068 = vst [vmem:[%s5051_s7 + $0x5b0] sm:$0xff] %v1067_v54  ;;  %v1073_v57 = vld [vmem:[%s5046_s6 + $0xb48] sm:$0xff]  ;;  %1070 = vst [vmem:[%s5051_s7 + $0x5b8] sm:$0xff] %v1069_v55  ;;  %v1075_v58 = vld [vmem:[%s5046_s6 + $0xb50] sm:$0xff] }
  0x73   : > { %1072 = vst [vmem:[%s5051_s7 + $0x5c0] sm:$0xff] %v1071_v56  ;;  %1074 = vst [vmem:[%s5051_s7 + $0x5c8] sm:$0xff] %v1073_v57  ;;  %v1077_v59 = vld [vmem:[%s5046_s6 + $0xb58] sm:$0xff]  ;;  %v1079_v60 = vld [vmem:[%s5046_s6 + $0xb60] sm:$0xff] }
  0x74   : > { %1076 = vst [vmem:[%s5051_s7 + $0x5d0] sm:$0xff] %v1075_v58  ;;  %1078 = vst [vmem:[%s5051_s7 + $0x5d8] sm:$0xff] %v1077_v59  ;;  %v1081_v61 = vld [vmem:[%s5046_s6 + $0xb68] sm:$0xff]  ;;  %v1083_v62 = vld [vmem:[%s5046_s6 + $0xb70] sm:$0xff] }
  0x75   : > { %1080 = vst [vmem:[%s5051_s7 + $0x5e0] sm:$0xff] %v1079_v60  ;;  %v1085_v63 = vld [vmem:[%s5046_s6 + $0xb78] sm:$0xff]  ;;  %1082 = vst [vmem:[%s5051_s7 + $0x5e8] sm:$0xff] %v1081_v61  ;;  %v1087_v0 = vld [vmem:[%s5046_s6 + $0xc00] sm:$0xff] }
  0x76   : > { %1084 = vst [vmem:[%s5051_s7 + $0x5f0] sm:$0xff] %v1083_v62  ;;  %1086 = vst [vmem:[%s5051_s7 + $0x5f8] sm:$0xff] %v1085_v63  ;;  %v1089_v1 = vld [vmem:[%s5046_s6 + $0xc08] sm:$0xff]  ;;  %v1091_v2 = vld [vmem:[%s5046_s6 + $0xc10] sm:$0xff] }
  0x77   : > { %1088 = vst [vmem:[%s5051_s7 + $0x600] sm:$0xff] %v1087_v0  ;;  %1090 = vst [vmem:[%s5051_s7 + $0x608] sm:$0xff] %v1089_v1  ;;  %v1093_v3 = vld [vmem:[%s5046_s6 + $0xc18] sm:$0xff]  ;;  %v1095_v4 = vld [vmem:[%s5046_s6 + $0xc20] sm:$0xff] }
  0x78   : > { %1092 = vst [vmem:[%s5051_s7 + $0x610] sm:$0xff] %v1091_v2  ;;  %v1097_v5 = vld [vmem:[%s5046_s6 + $0xc28] sm:$0xff]  ;;  %1094 = vst [vmem:[%s5051_s7 + $0x618] sm:$0xff] %v1093_v3  ;;  %v1099_v6 = vld [vmem:[%s5046_s6 + $0xc30] sm:$0xff] }
  0x79   : > { %1096 = vst [vmem:[%s5051_s7 + $0x620] sm:$0xff] %v1095_v4  ;;  %1098 = vst [vmem:[%s5051_s7 + $0x628] sm:$0xff] %v1097_v5  ;;  %v1101_v7 = vld [vmem:[%s5046_s6 + $0xc38] sm:$0xff]  ;;  %v1103_v8 = vld [vmem:[%s5046_s6 + $0xc40] sm:$0xff] }
  0x7a   : > { %1100 = vst [vmem:[%s5051_s7 + $0x630] sm:$0xff] %v1099_v6  ;;  %1102 = vst [vmem:[%s5051_s7 + $0x638] sm:$0xff] %v1101_v7  ;;  %v1105_v9 = vld [vmem:[%s5046_s6 + $0xc48] sm:$0xff]  ;;  %v1107_v10 = vld [vmem:[%s5046_s6 + $0xc50] sm:$0xff] }
  0x7b   : > { %1104 = vst [vmem:[%s5051_s7 + $0x640] sm:$0xff] %v1103_v8  ;;  %v1109_v11 = vld [vmem:[%s5046_s6 + $0xc58] sm:$0xff]  ;;  %1106 = vst [vmem:[%s5051_s7 + $0x648] sm:$0xff] %v1105_v9  ;;  %v1111_v12 = vld [vmem:[%s5046_s6 + $0xc60] sm:$0xff] }
  0x7c   : > { %1108 = vst [vmem:[%s5051_s7 + $0x650] sm:$0xff] %v1107_v10  ;;  %1110 = vst [vmem:[%s5051_s7 + $0x658] sm:$0xff] %v1109_v11  ;;  %v1113_v13 = vld [vmem:[%s5046_s6 + $0xc68] sm:$0xff]  ;;  %v1115_v14 = vld [vmem:[%s5046_s6 + $0xc70] sm:$0xff] }
  0x7d   : > { %1112 = vst [vmem:[%s5051_s7 + $0x660] sm:$0xff] %v1111_v12  ;;  %1114 = vst [vmem:[%s5051_s7 + $0x668] sm:$0xff] %v1113_v13  ;;  %v1117_v15 = vld [vmem:[%s5046_s6 + $0xc78] sm:$0xff]  ;;  %v1119_v16 = vld [vmem:[%s5046_s6 + $0xd00] sm:$0xff] }
  0x7e   : > { %1116 = vst [vmem:[%s5051_s7 + $0x670] sm:$0xff] %v1115_v14  ;;  %v1121_v17 = vld [vmem:[%s5046_s6 + $0xd08] sm:$0xff]  ;;  %1118 = vst [vmem:[%s5051_s7 + $0x678] sm:$0xff] %v1117_v15  ;;  %v1123_v18 = vld [vmem:[%s5046_s6 + $0xd10] sm:$0xff] }
  0x7f   : > { %1120 = vst [vmem:[%s5051_s7 + $0x680] sm:$0xff] %v1119_v16  ;;  %1122 = vst [vmem:[%s5051_s7 + $0x688] sm:$0xff] %v1121_v17  ;;  %v1125_v19 = vld [vmem:[%s5046_s6 + $0xd18] sm:$0xff]  ;;  %v1127_v20 = vld [vmem:[%s5046_s6 + $0xd20] sm:$0xff] }
  0x80   : > { %1124 = vst [vmem:[%s5051_s7 + $0x690] sm:$0xff] %v1123_v18  ;;  %1126 = vst [vmem:[%s5051_s7 + $0x698] sm:$0xff] %v1125_v19  ;;  %v1129_v21 = vld [vmem:[%s5046_s6 + $0xd28] sm:$0xff]  ;;  %v1131_v22 = vld [vmem:[%s5046_s6 + $0xd30] sm:$0xff] }
  0x81   : > { %1128 = vst [vmem:[%s5051_s7 + $0x6a0] sm:$0xff] %v1127_v20  ;;  %v1133_v23 = vld [vmem:[%s5046_s6 + $0xd38] sm:$0xff]  ;;  %1130 = vst [vmem:[%s5051_s7 + $0x6a8] sm:$0xff] %v1129_v21  ;;  %v1135_v24 = vld [vmem:[%s5046_s6 + $0xd40] sm:$0xff] }
  0x82   : > { %1132 = vst [vmem:[%s5051_s7 + $0x6b0] sm:$0xff] %v1131_v22  ;;  %1134 = vst [vmem:[%s5051_s7 + $0x6b8] sm:$0xff] %v1133_v23  ;;  %v1137_v25 = vld [vmem:[%s5046_s6 + $0xd48] sm:$0xff]  ;;  %v1139_v26 = vld [vmem:[%s5046_s6 + $0xd50] sm:$0xff] }
  0x83   : > { %1136 = vst [vmem:[%s5051_s7 + $0x6c0] sm:$0xff] %v1135_v24  ;;  %1138 = vst [vmem:[%s5051_s7 + $0x6c8] sm:$0xff] %v1137_v25  ;;  %v1141_v27 = vld [vmem:[%s5046_s6 + $0xd58] sm:$0xff]  ;;  %v1143_v28 = vld [vmem:[%s5046_s6 + $0xd60] sm:$0xff] }
  0x84   : > { %1140 = vst [vmem:[%s5051_s7 + $0x6d0] sm:$0xff] %v1139_v26  ;;  %v1145_v29 = vld [vmem:[%s5046_s6 + $0xd68] sm:$0xff]  ;;  %1142 = vst [vmem:[%s5051_s7 + $0x6d8] sm:$0xff] %v1141_v27  ;;  %v1147_v30 = vld [vmem:[%s5046_s6 + $0xd70] sm:$0xff] }
  0x85   : > { %1144 = vst [vmem:[%s5051_s7 + $0x6e0] sm:$0xff] %v1143_v28  ;;  %1146 = vst [vmem:[%s5051_s7 + $0x6e8] sm:$0xff] %v1145_v29  ;;  %v1149_v31 = vld [vmem:[%s5046_s6 + $0xd78] sm:$0xff]  ;;  %v1151_v32 = vld [vmem:[%s5046_s6 + $0xe00] sm:$0xff] }
  0x86   : > { %1148 = vst [vmem:[%s5051_s7 + $0x6f0] sm:$0xff] %v1147_v30  ;;  %1150 = vst [vmem:[%s5051_s7 + $0x6f8] sm:$0xff] %v1149_v31  ;;  %v1153_v33 = vld [vmem:[%s5046_s6 + $0xe08] sm:$0xff]  ;;  %v1155_v34 = vld [vmem:[%s5046_s6 + $0xe10] sm:$0xff] }
  0x87   : > { %1152 = vst [vmem:[%s5051_s7 + $0x700] sm:$0xff] %v1151_v32  ;;  %v1157_v35 = vld [vmem:[%s5046_s6 + $0xe18] sm:$0xff]  ;;  %1154 = vst [vmem:[%s5051_s7 + $0x708] sm:$0xff] %v1153_v33  ;;  %v1159_v36 = vld [vmem:[%s5046_s6 + $0xe20] sm:$0xff] }
  0x88   : > { %1156 = vst [vmem:[%s5051_s7 + $0x710] sm:$0xff] %v1155_v34  ;;  %1158 = vst [vmem:[%s5051_s7 + $0x718] sm:$0xff] %v1157_v35  ;;  %v1161_v37 = vld [vmem:[%s5046_s6 + $0xe28] sm:$0xff]  ;;  %v1163_v38 = vld [vmem:[%s5046_s6 + $0xe30] sm:$0xff] }
  0x89   : > { %1160 = vst [vmem:[%s5051_s7 + $0x720] sm:$0xff] %v1159_v36  ;;  %1162 = vst [vmem:[%s5051_s7 + $0x728] sm:$0xff] %v1161_v37  ;;  %v1165_v39 = vld [vmem:[%s5046_s6 + $0xe38] sm:$0xff]  ;;  %v1167_v40 = vld [vmem:[%s5046_s6 + $0xe40] sm:$0xff] }
  0x8a   : > { %1164 = vst [vmem:[%s5051_s7 + $0x730] sm:$0xff] %v1163_v38  ;;  %v1169_v41 = vld [vmem:[%s5046_s6 + $0xe48] sm:$0xff]  ;;  %1166 = vst [vmem:[%s5051_s7 + $0x738] sm:$0xff] %v1165_v39  ;;  %v1171_v42 = vld [vmem:[%s5046_s6 + $0xe50] sm:$0xff] }
  0x8b   : > { %1168 = vst [vmem:[%s5051_s7 + $0x740] sm:$0xff] %v1167_v40  ;;  %1170 = vst [vmem:[%s5051_s7 + $0x748] sm:$0xff] %v1169_v41  ;;  %v1173_v43 = vld [vmem:[%s5046_s6 + $0xe58] sm:$0xff]  ;;  %v1175_v44 = vld [vmem:[%s5046_s6 + $0xe60] sm:$0xff] }
  0x8c   : > { %1172 = vst [vmem:[%s5051_s7 + $0x750] sm:$0xff] %v1171_v42  ;;  %1174 = vst [vmem:[%s5051_s7 + $0x758] sm:$0xff] %v1173_v43  ;;  %v1177_v45 = vld [vmem:[%s5046_s6 + $0xe68] sm:$0xff]  ;;  %v1179_v46 = vld [vmem:[%s5046_s6 + $0xe70] sm:$0xff] }
  0x8d   : > { %1176 = vst [vmem:[%s5051_s7 + $0x760] sm:$0xff] %v1175_v44  ;;  %v1181_v47 = vld [vmem:[%s5046_s6 + $0xe78] sm:$0xff]  ;;  %1178 = vst [vmem:[%s5051_s7 + $0x768] sm:$0xff] %v1177_v45  ;;  %v1183_v48 = vld [vmem:[%s5046_s6 + $0xf00] sm:$0xff] }
  0x8e   : > { %1180 = vst [vmem:[%s5051_s7 + $0x770] sm:$0xff] %v1179_v46  ;;  %1182 = vst [vmem:[%s5051_s7 + $0x778] sm:$0xff] %v1181_v47  ;;  %v1185_v49 = vld [vmem:[%s5046_s6 + $0xf08] sm:$0xff]  ;;  %v1187_v50 = vld [vmem:[%s5046_s6 + $0xf10] sm:$0xff] }
  0x8f   : > { %1184 = vst [vmem:[%s5051_s7 + $0x780] sm:$0xff] %v1183_v48  ;;  %1186 = vst [vmem:[%s5051_s7 + $0x788] sm:$0xff] %v1185_v49  ;;  %v1189_v51 = vld [vmem:[%s5046_s6 + $0xf18] sm:$0xff]  ;;  %v1191_v52 = vld [vmem:[%s5046_s6 + $0xf20] sm:$0xff] }
  0x90   : > { %1188 = vst [vmem:[%s5051_s7 + $0x790] sm:$0xff] %v1187_v50  ;;  %v1193_v53 = vld [vmem:[%s5046_s6 + $0xf28] sm:$0xff]  ;;  %1190 = vst [vmem:[%s5051_s7 + $0x798] sm:$0xff] %v1189_v51  ;;  %v1195_v54 = vld [vmem:[%s5046_s6 + $0xf30] sm:$0xff] }
  0x91   : > { %1192 = vst [vmem:[%s5051_s7 + $0x7a0] sm:$0xff] %v1191_v52  ;;  %1194 = vst [vmem:[%s5051_s7 + $0x7a8] sm:$0xff] %v1193_v53  ;;  %v1197_v55 = vld [vmem:[%s5046_s6 + $0xf38] sm:$0xff]  ;;  %v1199_v56 = vld [vmem:[%s5046_s6 + $0xf40] sm:$0xff] }
  0x92   : > { %1196 = vst [vmem:[%s5051_s7 + $0x7b0] sm:$0xff] %v1195_v54  ;;  %1198 = vst [vmem:[%s5051_s7 + $0x7b8] sm:$0xff] %v1197_v55  ;;  %v1201_v57 = vld [vmem:[%s5046_s6 + $0xf48] sm:$0xff]  ;;  %v1203_v58 = vld [vmem:[%s5046_s6 + $0xf50] sm:$0xff] }
  0x93   : > { %1200 = vst [vmem:[%s5051_s7 + $0x7c0] sm:$0xff] %v1199_v56  ;;  %v1205_v59 = vld [vmem:[%s5046_s6 + $0xf58] sm:$0xff]  ;;  %1202 = vst [vmem:[%s5051_s7 + $0x7c8] sm:$0xff] %v1201_v57  ;;  %v1207_v60 = vld [vmem:[%s5046_s6 + $0xf60] sm:$0xff] }
  0x94   : > { %1204 = vst [vmem:[%s5051_s7 + $0x7d0] sm:$0xff] %v1203_v58  ;;  %1206 = vst [vmem:[%s5051_s7 + $0x7d8] sm:$0xff] %v1205_v59  ;;  %v1209_v61 = vld [vmem:[%s5046_s6 + $0xf68] sm:$0xff]  ;;  %v1211_v62 = vld [vmem:[%s5046_s6 + $0xf70] sm:$0xff] }
  0x95   : > { %1208 = vst [vmem:[%s5051_s7 + $0x7e0] sm:$0xff] %v1207_v60  ;;  %1210 = vst [vmem:[%s5051_s7 + $0x7e8] sm:$0xff] %v1209_v61  ;;  %v1213_v63 = vld [vmem:[%s5046_s6 + $0xf78] sm:$0xff] }
  0x96   : > { %1212 = vst [vmem:[%s5051_s7 + $0x7f0] sm:$0xff] %v1211_v62  ;;  %1214 = vst [vmem:[%s5051_s7 + $0x7f8] sm:$0xff] %v1213_v63 }
  0x97 PF: > { %p4269_p10 = scmp.ge.s32.totalorder %s4893_s18, 1  ;;  %p1219_p11 = scmp.lt.s32.totalorder %s4893_s18, 3 }
  0x99   : > { %p1220_p12 = pnand %p4269_p10, %p1219_p11 }
  0x9a   : > { %s5565_s8 = sand.u32 (!%p1220_p12), 1, %s4885_s16   ;;  %v5573_v0 = vmov (!%p1220_p12), 1e+09   ;;  %v5575_v1 = vmov (!%p1220_p12), 1e+09   ;;  %s5605_s13 = smov (!%p1220_p12), 0  }
  0x9b   : > { %1223 = sbr.rel (%p1220_p12) target bundleno = 826 (0x33a), region = 70  ;;  %s4270_s9 = sshll.u32 (!%p1220_p12), %s5565_s8, 11  ;;  %v5577_v2 = vmov (!%p1220_p12), 1e+09   ;;  %v5579_v3 = vmov (!%p1220_p12), 1e+09  }
  0x9c   : > { %s4271_s10 = sshll.u32 (!%p1220_p12), %s5565_s8, 7  ;;  %s5569_s11 = scalar_lea.vmem (!%p1220_p12), [#allocation2], %s4270_s9  ;;  %v5581_v4 = vmov (!%p1220_p12), 1e+09   ;;  %v5583_v5 = vmov (!%p1220_p12), 1e+09  }
  0x9d   : > { %s5571_s12 = scalar_lea.vmem (!%p1220_p12), [#allocation3], %s4271_s10  ;;  %v5585_v6 = vmov (!%p1220_p12), 1e+09   ;;  %v5587_v7 = vmov (!%p1220_p12), 1e+09  }
  0x9e   : > { %v5589_v8 = vmov (!%p1220_p12), 1e+09   ;;  %v5591_v9 = vmov (!%p1220_p12), 1e+09   ;;  %v5593_v10 = vmov (!%p1220_p12), 1e+09  }
  0x9f   : > { %v5595_v11 = vmov (!%p1220_p12), 1e+09   ;;  %v5597_v12 = vmov (!%p1220_p12), 1e+09   ;;  %v5599_v13 = vmov (!%p1220_p12), 1e+09  }
  0xa0   : > { %v5601_v14 = vmov (!%p1220_p12), 1e+09   ;;  %v5603_v15 = vmov (!%p1220_p12), 1e+09  }
  0xa2 LB: >> { %7924 = vst [vmem:[#allocation6_spill] sm:$0xff] %v4897_v0  ;;  %7925 = vst [vmem:[#allocation7_spill] sm:$0xff] %v4901_v1  ;;  %v1283_v16 = vld [vmem:[%s5569_s11 + $0x10] sm:$0xff]  ;;  %v1281_v17 = vld [vmem:[%s5569_s11] sm:$0xff]  ;;  %v4963_v18 = vmov 0   ;;  %s4273_s14 = sshll.u32 %s4961_s13, 4  ;;  %s1275_s5 = scalar_lea.vmem %s7920_s3, %s4961_s13  ;;  %s4961_s13 = sphi %s5605_s13, %s1258_s13   ;;  %v4957_v15 = vphi %v5603_v15, %v8133_v15   ;;  %v4953_v14 = vphi %v5601_v14, %v8132_v14   ;;  %v4949_v13 = vphi %v5599_v13, %v8131_v13   ;;  %v4945_v12 = vphi %v5597_v12, %v8130_v12   ;;  %v4941_v11 = vphi %v5595_v11, %v8129_v11   ;;  %v4937_v10 = vphi %v5593_v10, %v8128_v10   ;;  %v4933_v9 = vphi %v5591_v9, %v8127_v9   ;;  %v4929_v8 = vphi %v5589_v8, %v8126_v8   ;;  %v4925_v7 = vphi %v5587_v7, %v8125_v7   ;;  %v4921_v6 = vphi %v5585_v6, %v8124_v6   ;;  %v4917_v5 = vphi %v5583_v5, %v8123_v5   ;;  %v4913_v4 = vphi %v5581_v4, %v8122_v4   ;;  %v4909_v3 = vphi %v5579_v3, %v8121_v3   ;;  %v4905_v2 = vphi %v5577_v2, %v8120_v2   ;;  %v4901_v1 = vphi %v5575_v1, %v8119_v1   ;;  %v4897_v0 = vphi %v5573_v0, %v8118_v0  }
  0xa3   : >> { %7926 = vst [vmem:[#allocation8_spill] sm:$0xff] %v4905_v2  ;;  %7927 = vst [vmem:[#allocation9_spill] sm:$0xff] %v4909_v3  ;;  %4762 = vset.pattern.permute.xlu1 %v4963_v18  ;;  %4761 = vset.pattern.permute.xlu0 %v4963_v18  ;;  %v1284_v19 = vld [vmem:[%s5569_s11 + $0x18] sm:$0xff]  ;;  %v1282_v20 = vld [vmem:[%s5569_s11 + $0x8] sm:$0xff]  ;;  %s6002_s23 = scalar_lea.vmem %s7918_s1, %s4273_s14  ;;  %s1258_s13 = sadd.s32 1, %s4961_s13  }
  0xa4   : >> { %7928 = vst [vmem:[#allocation10_spill] sm:$0xff] %v4913_v4  ;;  %7929 = vst [vmem:[#allocation11_spill] sm:$0xff] %v4917_v5  ;;  %1313 = vperm.xlu1 %4762, %v1283_v16   ;;  %1303 = vperm.xlu0 %4761, %v1281_v17   ;;  %v1286_v21 = vld [vmem:[%s5569_s11 + $0x28] sm:$0xff]  ;;  %v1285_v22 = vld [vmem:[%s5569_s11 + $0x20] sm:$0xff]  ;;  %p7789_p13 = scmp.ge.s32.totalorder %s1258_s13, 8  }
  0xa5   : >> { %7930 = vst [vmem:[#allocation12_spill] sm:$0xff] %v4921_v6  ;;  %7931 = vst [vmem:[#allocation13_spill] sm:$0xff] %v4925_v7  ;;  %v1288_v23 = vld [vmem:[%s5569_s11 + $0x38] sm:$0xff]  ;;  %v1287_v24 = vld [vmem:[%s5569_s11 + $0x30] sm:$0xff]  ;;  %s4094_s28 = sshll.u32 (%p7789_p13), %s5571_s12, 4  ;;  %s4081_s29 = scalar_lea.sflag (%p7789_p13), [#allocation4], %s5565_s8  ;;  %s7873_s28 = int_to_ptr.vmem [resolvable:$true] %s4094_s28 }
  0xa6   : >> { %7932 = vst [vmem:[#allocation14_spill] sm:$0xff] %v4929_v8  ;;  %7933 = vst [vmem:[#allocation15_spill] sm:$0xff] %v4933_v9  ;;  %v1290_v25 = vld [vmem:[%s5569_s11 + $0x48] sm:$0xff]  ;;  %v1289_v26 = vld [vmem:[%s5569_s11 + $0x40] sm:$0xff]  ;;  %s4763_s30 = scalar_lea.vmem (%p7789_p13), %s7873_s28, 2048 }
  0xa7   : >> { %7934 = vst [vmem:[#allocation16_spill] sm:$0xff] %v4937_v10  ;;  %7935 = vst [vmem:[#allocation17_spill] sm:$0xff] %v4941_v11  ;;  %v1292_v27 = vld [vmem:[%s5569_s11 + $0x58] sm:$0xff]  ;;  %v1291_v28 = vld [vmem:[%s5569_s11 + $0x50] sm:$0xff]  ;;  %p4764_p0 = scmp.ne.s32.totalorder (%p7789_p13), %s7873_s28, %s4763_s30 }
  0xa8   : >> { %7936 = vst [vmem:[#allocation18_spill] sm:$0xff] %v4945_v12  ;;  %7937 = vst [vmem:[#allocation19_spill] sm:$0xff] %v4949_v13  ;;  %1318 = vperm.xlu1 %4762, %v1284_v19   ;;  %1308 = vperm.xlu0 %4761, %v1282_v20   ;;  %v1294_v29 = vld [vmem:[%s5569_s11 + $0x68] sm:$0xff]  ;;  %v1293_v30 = vld [vmem:[%s5569_s11 + $0x60] sm:$0xff] }
  0xa9   : >> { %7938 = vst [vmem:[#allocation20_spill] sm:$0xff] %v4953_v14  ;;  %7939 = vst [vmem:[#allocation21_spill] sm:$0xff] %v4957_v15  ;;  %v1296_v31 = vld [vmem:[%s5569_s11 + $0x78] sm:$0xff]  ;;  %v1295_v32 = vld [vmem:[%s5569_s11 + $0x70] sm:$0xff]  ;;  %p4765_p1 = pnand (%p7789_p13), %p4764_p0, %p5030_p6 }
  0xaa   : >> { %v4277_v33 = vld [vmem:[%s5569_s11 + $0x88] sm:$0xff]  ;;  %v4276_v34 = vld [vmem:[%s5569_s11 + $0x80] sm:$0xff]  ;;  %v4279_v35 = vld [vmem:[%s5569_s11 + $0x98] sm:$0xff] }
  0xab   : >> { %v4278_v36 = vld [vmem:[%s5569_s11 + $0x90] sm:$0xff]  ;;  %v4281_v37 = vld [vmem:[%s5569_s11 + $0xa8] sm:$0xff]  ;;  %v4280_v38 = vld [vmem:[%s5569_s11 + $0xa0] sm:$0xff]  ;;  %p4766_p2 = pneg (%p7789_p13), %p4765_p1 }
  0xac   : >> { %1328 = vperm.xlu1 %4762, %v1286_v21   ;;  %1323 = vperm.xlu0 %4761, %v1285_v22   ;;  %v4283_v39 = vld [vmem:[%s5569_s11 + $0xb8] sm:$0xff]  ;;  %v4282_v40 = vld [vmem:[%s5569_s11 + $0xb0] sm:$0xff]  ;;  %v4285_v41 = vld [vmem:[%s5569_s11 + $0xc8] sm:$0xff] }
  0xad   : >> { %v4284_v42 = vld [vmem:[%s5569_s11 + $0xc0] sm:$0xff]  ;;  %v4287_v43 = vld [vmem:[%s5569_s11 + $0xd8] sm:$0xff]  ;;  %v4286_v44 = vld [vmem:[%s5569_s11 + $0xd0] sm:$0xff] }
  0xae   : >> { %v4289_v45 = vld [vmem:[%s5569_s11 + $0xe8] sm:$0xff]  ;;  %v4288_v46 = vld [vmem:[%s5569_s11 + $0xe0] sm:$0xff]  ;;  %v4291_v47 = vld [vmem:[%s5569_s11 + $0xf8] sm:$0xff] }
  0xaf   : >> { %v4290_v48 = vld [vmem:[%s5569_s11 + $0xf0] sm:$0xff]  ;;  %v4297_v49 = vld [vmem:[%s5569_s11 + $0x108] sm:$0xff]  ;;  %v4296_v50 = vld [vmem:[%s5569_s11 + $0x100] sm:$0xff] }
  0xb0   : >> { %1338 = vperm.xlu1 %4762, %v1288_v23   ;;  %1333 = vperm.xlu0 %4761, %v1287_v24   ;;  %v4299_v51 = vld [vmem:[%s5569_s11 + $0x118] sm:$0xff]  ;;  %v4298_v52 = vld [vmem:[%s5569_s11 + $0x110] sm:$0xff]  ;;  %v4301_v53 = vld [vmem:[%s5569_s11 + $0x128] sm:$0xff] }
  0xb1   : >> { %v4300_v54 = vld [vmem:[%s5569_s11 + $0x120] sm:$0xff]  ;;  %v4303_v55 = vld [vmem:[%s5569_s11 + $0x138] sm:$0xff]  ;;  %v4302_v56 = vld [vmem:[%s5569_s11 + $0x130] sm:$0xff] }
  0xb2   : >> { %v4305_v57 = vld [vmem:[%s5569_s11 + $0x148] sm:$0xff]  ;;  %v4304_v58 = vld [vmem:[%s5569_s11 + $0x140] sm:$0xff]  ;;  %v4307_v59 = vld [vmem:[%s5569_s11 + $0x158] sm:$0xff] }
  0xb3   : >> { %v4306_v60 = vld [vmem:[%s5569_s11 + $0x150] sm:$0xff]  ;;  %v4309_v61 = vld [vmem:[%s5569_s11 + $0x168] sm:$0xff]  ;;  %v4308_v62 = vld [vmem:[%s5569_s11 + $0x160] sm:$0xff] }
  0xb4   : >> { %1348 = vperm.xlu1 %4762, %v1290_v25   ;;  %1343 = vperm.xlu0 %4761, %v1289_v26   ;;  %v4311_v63 = vld [vmem:[%s5569_s11 + $0x178] sm:$0xff]  ;;  %v4310_v16 = vld [vmem:[%s5569_s11 + $0x170] sm:$0xff]  ;;  %v4317_v17 = vld [vmem:[%s5569_s11 + $0x188] sm:$0xff] }
  0xb5   : >> { %v4316_v18 = vld [vmem:[%s5569_s11 + $0x180] sm:$0xff]  ;;  %v4319_v19 = vld [vmem:[%s5569_s11 + $0x198] sm:$0xff]  ;;  %v4318_v20 = vld [vmem:[%s5569_s11 + $0x190] sm:$0xff] }
  0xb6   : >> { %v4321_v21 = vld [vmem:[%s5569_s11 + $0x1a8] sm:$0xff]  ;;  %v4320_v22 = vld [vmem:[%s5569_s11 + $0x1a0] sm:$0xff]  ;;  %v4323_v23 = vld [vmem:[%s5569_s11 + $0x1b8] sm:$0xff] }
  0xb7   : >> { %v4322_v24 = vld [vmem:[%s5569_s11 + $0x1b0] sm:$0xff]  ;;  %v4325_v25 = vld [vmem:[%s5569_s11 + $0x1c8] sm:$0xff]  ;;  %v4324_v26 = vld [vmem:[%s5569_s11 + $0x1c0] sm:$0xff] }
  0xb8   : >> { %1358 = vperm.xlu1 %4762, %v1292_v27   ;;  %1353 = vperm.xlu0 %4761, %v1291_v28   ;;  %v4327_v27 = vld [vmem:[%s5569_s11 + $0x1d8] sm:$0xff]  ;;  %v4326_v28 = vld [vmem:[%s5569_s11 + $0x1d0] sm:$0xff] }
  0xbc   : >> { %1368 = vperm.xlu1 %4762, %v1294_v29   ;;  %1363 = vperm.xlu0 %4761, %v1293_v30   ;;  %v4329_v29 = vld [vmem:[%s5569_s11 + $0x1e8] sm:$0xff]  ;;  %v4328_v30 = vld [vmem:[%s5569_s11 + $0x1e0] sm:$0xff] }
  0xc0   : >> { %1378 = vperm.xlu1 %4762, %v1296_v31   ;;  %1373 = vperm.xlu0 %4761, %v1295_v32   ;;  %v4331_v31 = vld [vmem:[%s5569_s11 + $0x1f8] sm:$0xff]  ;;  %v4330_v32 = vld [vmem:[%s5569_s11 + $0x1f0] sm:$0xff] }
  0xc4   : >> { %1481 = vperm.xlu1 %4762, %v4277_v33   ;;  %1476 = vperm.xlu0 %4761, %v4276_v34   ;;  %v4337_v33 = vld [vmem:[%s5569_s11 + $0x208] sm:$0xff]  ;;  %v4336_v34 = vld [vmem:[%s5569_s11 + $0x200] sm:$0xff] }
  0xc8   : >> { %1491 = vperm.xlu1 %4762, %v4279_v35   ;;  %1486 = vperm.xlu0 %4761, %v4278_v36  }
  0xcc   : >> { %1501 = vperm.xlu1 %4762, %v4281_v37   ;;  %1496 = vperm.xlu0 %4761, %v4280_v38   ;;  %v4339_v37 = vld [vmem:[%s5569_s11 + $0x218] sm:$0xff]  ;;  %v4338_v38 = vld [vmem:[%s5569_s11 + $0x210] sm:$0xff] }
  0xd0   : >> { %1511 = vperm.xlu1 %4762, %v4283_v39   ;;  %1506 = vperm.xlu0 %4761, %v4282_v40  }
  0xd4   : >> { %1521 = vperm.xlu1 %4762, %v4285_v41   ;;  %1516 = vperm.xlu0 %4761, %v4284_v42   ;;  %v4341_v41 = vld [vmem:[%s5569_s11 + $0x228] sm:$0xff]  ;;  %v4340_v42 = vld [vmem:[%s5569_s11 + $0x220] sm:$0xff] }
  0xd8   : >> { %1531 = vperm.xlu1 %4762, %v4287_v43   ;;  %1526 = vperm.xlu0 %4761, %v4286_v44  }
  0xdc   : >> { %1541 = vperm.xlu1 %4762, %v4289_v45   ;;  %1536 = vperm.xlu0 %4761, %v4288_v46   ;;  %v4343_v45 = vld [vmem:[%s5569_s11 + $0x238] sm:$0xff]  ;;  %v4342_v46 = vld [vmem:[%s5569_s11 + $0x230] sm:$0xff] }
  0xe0   : >> { %1551 = vperm.xlu1 %4762, %v4291_v47   ;;  %1546 = vperm.xlu0 %4761, %v4290_v48  }
  0xe4   : >> { %1654 = vperm.xlu1 %4762, %v4297_v49   ;;  %1649 = vperm.xlu0 %4761, %v4296_v50   ;;  %v4345_v49 = vld [vmem:[%s5569_s11 + $0x248] sm:$0xff]  ;;  %v4344_v50 = vld [vmem:[%s5569_s11 + $0x240] sm:$0xff] }
  0xe8   : >> { %1664 = vperm.xlu1 %4762, %v4299_v51   ;;  %1659 = vperm.xlu0 %4761, %v4298_v52  }
  0xec   : >> { %1674 = vperm.xlu1 %4762, %v4301_v53   ;;  %1669 = vperm.xlu0 %4761, %v4300_v54   ;;  %v4347_v53 = vld [vmem:[%s5569_s11 + $0x258] sm:$0xff]  ;;  %v4346_v54 = vld [vmem:[%s5569_s11 + $0x250] sm:$0xff] }
  0xf0   : >> { %1684 = vperm.xlu1 %4762, %v4303_v55   ;;  %1679 = vperm.xlu0 %4761, %v4302_v56  }
  0xf4   : >> { %1694 = vperm.xlu1 %4762, %v4305_v57   ;;  %1689 = vperm.xlu0 %4761, %v4304_v58   ;;  %v4349_v57 = vld [vmem:[%s5569_s11 + $0x268] sm:$0xff]  ;;  %v4348_v58 = vld [vmem:[%s5569_s11 + $0x260] sm:$0xff] }
  0xf8   : >> { %1704 = vperm.xlu1 %4762, %v4307_v59   ;;  %1699 = vperm.xlu0 %4761, %v4306_v60  }
  0xfc   : >> { %1714 = vperm.xlu1 %4762, %v4309_v61   ;;  %1709 = vperm.xlu0 %4761, %v4308_v62   ;;  %v4351_v61 = vld [vmem:[%s5569_s11 + $0x278] sm:$0xff]  ;;  %v4350_v62 = vld [vmem:[%s5569_s11 + $0x270] sm:$0xff] }
 0x100   : >> { %1724 = vperm.xlu1 %4762, %v4311_v63   ;;  %1719 = vperm.xlu0 %4761, %v4310_v16  }
 0x104   : >> { %1827 = vperm.xlu1 %4762, %v4317_v17   ;;  %1822 = vperm.xlu0 %4761, %v4316_v18   ;;  %v4357_v17 = vld [vmem:[%s5569_s11 + $0x288] sm:$0xff]  ;;  %v4356_v18 = vld [vmem:[%s5569_s11 + $0x280] sm:$0xff] }
 0x108   : >> { %1837 = vperm.xlu1 %4762, %v4319_v19   ;;  %1832 = vperm.xlu0 %4761, %v4318_v20  }
 0x10c   : >> { %1847 = vperm.xlu1 %4762, %v4321_v21   ;;  %1842 = vperm.xlu0 %4761, %v4320_v22   ;;  %v4359_v21 = vld [vmem:[%s5569_s11 + $0x298] sm:$0xff]  ;;  %v4358_v22 = vld [vmem:[%s5569_s11 + $0x290] sm:$0xff] }
 0x110   : >> { %1857 = vperm.xlu1 %4762, %v4323_v23   ;;  %1852 = vperm.xlu0 %4761, %v4322_v24  }
 0x114   : >> { %1867 = vperm.xlu1 %4762, %v4325_v25   ;;  %1862 = vperm.xlu0 %4761, %v4324_v26   ;;  %v4361_v25 = vld [vmem:[%s5569_s11 + $0x2a8] sm:$0xff]  ;;  %v4360_v26 = vld [vmem:[%s5569_s11 + $0x2a0] sm:$0xff] }
 0x118   : >> { %1877 = vperm.xlu1 %4762, %v4327_v27   ;;  %1872 = vperm.xlu0 %4761, %v4326_v28  }
 0x11c   : >> { %1887 = vperm.xlu1 %4762, %v4329_v29   ;;  %1882 = vperm.xlu0 %4761, %v4328_v30   ;;  %v4363_v29 = vld [vmem:[%s5569_s11 + $0x2b8] sm:$0xff]  ;;  %v4362_v30 = vld [vmem:[%s5569_s11 + $0x2b0] sm:$0xff] }
 0x120   : >> { %1897 = vperm.xlu1 %4762, %v4331_v31   ;;  %1892 = vperm.xlu0 %4761, %v4330_v32  }
 0x123   : >> { %v5724_v35 = vpop.permute.xlu1 %1313  ;;  %v5726_v36 = vpop.permute.xlu0 %1303 }
 0x124   : >> { %2000 = vperm.xlu1 %4762, %v4337_v33   ;;  %1995 = vperm.xlu0 %4761, %v4336_v34   ;;  %v4365_v33 = vld [vmem:[%s5569_s11 + $0x2c8] sm:$0xff]  ;;  %v4364_v34 = vld [vmem:[%s5569_s11 + $0x2c0] sm:$0xff] }
 0x127   : >> { %v5730_v39 = vpop.permute.xlu1 %1318  ;;  %v5732_v40 = vpop.permute.xlu0 %1308 }
 0x128   : >> { %2010 = vperm.xlu1 %4762, %v4339_v37   ;;  %2005 = vperm.xlu0 %4761, %v4338_v38  }
 0x12b   : >> { %v5736_v43 = vpop.permute.xlu1 %1328  ;;  %v5738_v44 = vpop.permute.xlu0 %1323 }
 0x12c   : >> { %2020 = vperm.xlu1 %4762, %v4341_v41   ;;  %2015 = vperm.xlu0 %4761, %v4340_v42   ;;  %v4367_v41 = vld [vmem:[%s5569_s11 + $0x2d8] sm:$0xff]  ;;  %v4366_v42 = vld [vmem:[%s5569_s11 + $0x2d0] sm:$0xff] }
 0x12f   : >> { %v5742_v47 = vpop.permute.xlu1 %1338  ;;  %v5744_v48 = vpop.permute.xlu0 %1333 }
 0x130   : >> { %2030 = vperm.xlu1 %4762, %v4343_v45   ;;  %2025 = vperm.xlu0 %4761, %v4342_v46  }
 0x133   : >> { %v5748_v51 = vpop.permute.xlu1 %1348  ;;  %v5750_v52 = vpop.permute.xlu0 %1343 }
 0x134   : >> { %2040 = vperm.xlu1 %4762, %v4345_v49   ;;  %2035 = vperm.xlu0 %4761, %v4344_v50   ;;  %v4369_v49 = vld [vmem:[%s5569_s11 + $0x2e8] sm:$0xff]  ;;  %v4368_v50 = vld [vmem:[%s5569_s11 + $0x2e0] sm:$0xff] }
 0x137   : >> { %v5754_v55 = vpop.permute.xlu1 %1358  ;;  %v5756_v56 = vpop.permute.xlu0 %1353 }
 0x138   : >> { %2050 = vperm.xlu1 %4762, %v4347_v53   ;;  %2045 = vperm.xlu0 %4761, %v4346_v54  }
 0x13b   : >> { %v5760_v59 = vpop.permute.xlu1 %1368  ;;  %v5762_v60 = vpop.permute.xlu0 %1363 }
 0x13c   : >> { %2060 = vperm.xlu1 %4762, %v4349_v57   ;;  %2055 = vperm.xlu0 %4761, %v4348_v58   ;;  %v4371_v57 = vld [vmem:[%s5569_s11 + $0x2f8] sm:$0xff]  ;;  %v4370_v58 = vld [vmem:[%s5569_s11 + $0x2f0] sm:$0xff] }
 0x13f   : >> { %v5766_v63 = vpop.permute.xlu1 %1378  ;;  %v5768_v16 = vpop.permute.xlu0 %1373 }
 0x140   : >> { %2070 = vperm.xlu1 %4762, %v4351_v61   ;;  %2065 = vperm.xlu0 %4761, %v4350_v62  }
 0x143   : >> { %v5772_v19 = vpop.permute.xlu1 %1481  ;;  %v5774_v20 = vpop.permute.xlu0 %1476 }
 0x144   : >> { %2173 = vperm.xlu1 %4762, %v4357_v17   ;;  %2168 = vperm.xlu0 %4761, %v4356_v18   ;;  %v4377_v17 = vld [vmem:[%s5569_s11 + $0x308] sm:$0xff]  ;;  %v4376_v18 = vld [vmem:[%s5569_s11 + $0x300] sm:$0xff] }
 0x147   : >> { %v5778_v23 = vpop.permute.xlu1 %1491  ;;  %v5780_v24 = vpop.permute.xlu0 %1486 }
 0x148   : >> { %2183 = vperm.xlu1 %4762, %v4359_v21   ;;  %2178 = vperm.xlu0 %4761, %v4358_v22  }
 0x14b   : >> { %v5784_v27 = vpop.permute.xlu1 %1501  ;;  %v5786_v28 = vpop.permute.xlu0 %1496 }
 0x14c   : >> { %2193 = vperm.xlu1 %4762, %v4361_v25   ;;  %2188 = vperm.xlu0 %4761, %v4360_v26   ;;  %v4379_v25 = vld [vmem:[%s5569_s11 + $0x318] sm:$0xff]  ;;  %v4378_v26 = vld [vmem:[%s5569_s11 + $0x310] sm:$0xff] }
 0x14f   : >> { %v5790_v31 = vpop.permute.xlu1 %1511  ;;  %v5792_v32 = vpop.permute.xlu0 %1506 }
 0x150   : >> { %2203 = vperm.xlu1 %4762, %v4363_v29   ;;  %2198 = vperm.xlu0 %4761, %v4362_v30  }
 0x153   : >> { %v5796_v37 = vpop.permute.xlu1 %1521  ;;  %v5798_v38 = vpop.permute.xlu0 %1516 }
 0x154   : >> { %2213 = vperm.xlu1 %4762, %v4365_v33   ;;  %2208 = vperm.xlu0 %4761, %v4364_v34   ;;  %v4381_v33 = vld [vmem:[%s5569_s11 + $0x328] sm:$0xff]  ;;  %v4380_v34 = vld [vmem:[%s5569_s11 + $0x320] sm:$0xff] }
 0x157   : >> { %v5802_v45 = vpop.permute.xlu1 %1531  ;;  %v5804_v46 = vpop.permute.xlu0 %1526 }
 0x158   : >> { %2223 = vperm.xlu1 %4762, %v4367_v41   ;;  %2218 = vperm.xlu0 %4761, %v4366_v42  }
 0x15b   : >> { %v5808_v53 = vpop.permute.xlu1 %1541  ;;  %v5810_v54 = vpop.permute.xlu0 %1536 }
 0x15c   : >> { %2233 = vperm.xlu1 %4762, %v4369_v49   ;;  %2228 = vperm.xlu0 %4761, %v4368_v50   ;;  %v4383_v49 = vld [vmem:[%s5569_s11 + $0x338] sm:$0xff]  ;;  %v4382_v50 = vld [vmem:[%s5569_s11 + $0x330] sm:$0xff] }
 0x15f   : >> { %v5814_v61 = vpop.permute.xlu1 %1551  ;;  %v5816_v62 = vpop.permute.xlu0 %1546 }
 0x160   : >> { %2243 = vperm.xlu1 %4762, %v4371_v57   ;;  %2238 = vperm.xlu0 %4761, %v4370_v58  }
 0x163   : >> { %v5820_v21 = vpop.permute.xlu1 %1654  ;;  %v5822_v22 = vpop.permute.xlu0 %1649 }
 0x164   : >> { %2346 = vperm.xlu1 %4762, %v4377_v17   ;;  %2341 = vperm.xlu0 %4761, %v4376_v18   ;;  %v4385_v17 = vld [vmem:[%s5569_s11 + $0x348] sm:$0xff]  ;;  %v4384_v18 = vld [vmem:[%s5569_s11 + $0x340] sm:$0xff] }
 0x167   : >> { %v5826_v29 = vpop.permute.xlu1 %1664  ;;  %v5828_v30 = vpop.permute.xlu0 %1659 }
 0x168   : >> { %2356 = vperm.xlu1 %4762, %v4379_v25   ;;  %2351 = vperm.xlu0 %4761, %v4378_v26  }
 0x16b   : >> { %v5832_v41 = vpop.permute.xlu1 %1674  ;;  %v5834_v42 = vpop.permute.xlu0 %1669 }
 0x16c   : >> { %2366 = vperm.xlu1 %4762, %v4381_v33   ;;  %2361 = vperm.xlu0 %4761, %v4380_v34   ;;  %v4387_v33 = vld [vmem:[%s5569_s11 + $0x358] sm:$0xff]  ;;  %v4386_v34 = vld [vmem:[%s5569_s11 + $0x350] sm:$0xff] }
 0x16f   : >> { %v5838_v57 = vpop.permute.xlu1 %1684  ;;  %v5840_v58 = vpop.permute.xlu0 %1679 }
 0x170   : >> { %2376 = vperm.xlu1 %4762, %v4383_v49   ;;  %2371 = vperm.xlu0 %4761, %v4382_v50   ;;  %v4389_v49 = vld [vmem:[%s5569_s11 + $0x368] sm:$0xff]  ;;  %v4388_v50 = vld [vmem:[%s5569_s11 + $0x360] sm:$0xff] }
 0x173   : >> { %v5844_v25 = vpop.permute.xlu1 %1694  ;;  %v5846_v26 = vpop.permute.xlu0 %1689 }
 0x174   : >> { %2386 = vperm.xlu1 %4762, %v4385_v17   ;;  %2381 = vperm.xlu0 %4761, %v4384_v18   ;;  %v4391_v17 = vld [vmem:[%s5569_s11 + $0x378] sm:$0xff]  ;;  %v4390_v18 = vld [vmem:[%s5569_s11 + $0x370] sm:$0xff] }
 0x177   : >> { %v5850_v1 = vpop.permute.xlu1 %1704  ;;  %v5852_v0 = vpop.permute.xlu0 %1699 }
 0x178   : >> { %2396 = vperm.xlu1 %4762, %v4387_v33   ;;  %2391 = vperm.xlu0 %4761, %v4386_v34   ;;  %v4397_v33 = vld [vmem:[%s5569_s11 + $0x388] sm:$0xff]  ;;  %v4396_v34 = vld [vmem:[%s5569_s11 + $0x380] sm:$0xff] }
 0x17b   : >> { %v5856_v3 = vpop.permute.xlu1 %1714  ;;  %v5858_v2 = vpop.permute.xlu0 %1709 }
 0x17c   : >> { %2406 = vperm.xlu1 %4762, %v4389_v49   ;;  %2401 = vperm.xlu0 %4761, %v4388_v50   ;;  %v4399_v49 = vld [vmem:[%s5569_s11 + $0x398] sm:$0xff]  ;;  %v4398_v50 = vld [vmem:[%s5569_s11 + $0x390] sm:$0xff] }
 0x17f   : >> { %v5862_v5 = vpop.permute.xlu1 %1724  ;;  %v5864_v4 = vpop.permute.xlu0 %1719 }
 0x180   : >> { %2416 = vperm.xlu1 %4762, %v4391_v17   ;;  %2411 = vperm.xlu0 %4761, %v4390_v18   ;;  %v4401_v17 = vld [vmem:[%s5569_s11 + $0x3a8] sm:$0xff]  ;;  %v4400_v18 = vld [vmem:[%s5569_s11 + $0x3a0] sm:$0xff] }
 0x183   : >> { %v5868_v7 = vpop.permute.xlu1 %1827  ;;  %v5870_v6 = vpop.permute.xlu0 %1822 }
 0x184   : >> { %7940 = vst [vmem:[#allocation22_spill] sm:$0xff] %v5870_v6  ;;  %2519 = vperm.xlu1 %4762, %v4397_v33   ;;  %2514 = vperm.xlu0 %4761, %v4396_v34   ;;  %v4403_v33 = vld [vmem:[%s5569_s11 + $0x3b8] sm:$0xff]  ;;  %v4402_v34 = vld [vmem:[%s5569_s11 + $0x3b0] sm:$0xff] }
 0x187   : >> { %v5874_v9 = vpop.permute.xlu1 %1837  ;;  %v5876_v8 = vpop.permute.xlu0 %1832 }
 0x188   : >> { %7941 = vst [vmem:[#allocation23_spill] sm:$0xff] %v5874_v9  ;;  %7942 = vst [vmem:[#allocation24_spill] sm:$0xff] %v5876_v8  ;;  %2529 = vperm.xlu1 %4762, %v4399_v49   ;;  %2524 = vperm.xlu0 %4761, %v4398_v50   ;;  %v4405_v49 = vld [vmem:[%s5569_s11 + $0x3c8] sm:$0xff]  ;;  %v4404_v50 = vld [vmem:[%s5569_s11 + $0x3c0] sm:$0xff] }
 0x18b   : >> { %v5880_v11 = vpop.permute.xlu1 %1847  ;;  %v5882_v10 = vpop.permute.xlu0 %1842 }
 0x18c   : >> { %7943 = vst [vmem:[#allocation25_spill] sm:$0xff] %v5880_v11  ;;  %7944 = vst [vmem:[#allocation26_spill] sm:$0xff] %v5882_v10  ;;  %2539 = vperm.xlu1 %4762, %v4401_v17   ;;  %2534 = vperm.xlu0 %4761, %v4400_v18   ;;  %v4407_v17 = vld [vmem:[%s5569_s11 + $0x3d8] sm:$0xff]  ;;  %v4406_v18 = vld [vmem:[%s5569_s11 + $0x3d0] sm:$0xff] }
 0x18d   : >> { %v4459_v11 = vld [vmem:[%s5569_s11 + $0x518] sm:$0xff] }
 0x18f   : >> { %v5886_v13 = vpop.permute.xlu1 %1857  ;;  %v5888_v12 = vpop.permute.xlu0 %1852 }
 0x190   : >> { %7945 = vst [vmem:[#allocation27_spill] sm:$0xff] %v5886_v13  ;;  %7946 = vst [vmem:[#allocation28_spill] sm:$0xff] %v5888_v12  ;;  %2549 = vperm.xlu1 %4762, %v4403_v33   ;;  %2544 = vperm.xlu0 %4761, %v4402_v34   ;;  %v4409_v33 = vld [vmem:[%s5569_s11 + $0x3e8] sm:$0xff]  ;;  %v4408_v34 = vld [vmem:[%s5569_s11 + $0x3e0] sm:$0xff] }
 0x193   : >> { %v5892_v15 = vpop.permute.xlu1 %1867  ;;  %v5894_v14 = vpop.permute.xlu0 %1862 }
 0x194   : >> { %7947 = vst [vmem:[#allocation29_spill] sm:$0xff] %v5892_v15  ;;  %7948 = vst [vmem:[#allocation30_spill] sm:$0xff] %v5894_v14  ;;  %2559 = vperm.xlu1 %4762, %v4405_v49   ;;  %2554 = vperm.xlu0 %4761, %v4404_v50   ;;  %v4411_v49 = vld [vmem:[%s5569_s11 + $0x3f8] sm:$0xff]  ;;  %v4410_v50 = vld [vmem:[%s5569_s11 + $0x3f0] sm:$0xff] }
 0x197   : >> { %v5898_v10 = vpop.permute.xlu1 %1877  ;;  %v5900_v13 = vpop.permute.xlu0 %1872 }
 0x198   : >> { %7949 = vst [vmem:[#allocation31_spill] sm:$0xff] %v5898_v10  ;;  %7950 = vst [vmem:[#allocation32_spill] sm:$0xff] %v5900_v13  ;;  %2569 = vperm.xlu1 %4762, %v4407_v17   ;;  %2564 = vperm.xlu0 %4761, %v4406_v18   ;;  %v4417_v17 = vld [vmem:[%s5569_s11 + $0x408] sm:$0xff]  ;;  %v4416_v18 = vld [vmem:[%s5569_s11 + $0x400] sm:$0xff] }
 0x19b   : >> { %v5904_v12 = vpop.permute.xlu1 %1887  ;;  %v5906_v15 = vpop.permute.xlu0 %1882 }
 0x19c   : >> { %7951 = vst [vmem:[#allocation33_spill] sm:$0xff] %v5904_v12  ;;  %7952 = vst [vmem:[#allocation34_spill] sm:$0xff] %v5906_v15  ;;  %2579 = vperm.xlu1 %4762, %v4409_v33   ;;  %2574 = vperm.xlu0 %4761, %v4408_v34   ;;  %v4419_v33 = vld [vmem:[%s5569_s11 + $0x418] sm:$0xff]  ;;  %v4418_v34 = vld [vmem:[%s5569_s11 + $0x410] sm:$0xff] }
 0x19f   : >> { %v5910_v14 = vpop.permute.xlu1 %1897  ;;  %v5912_v10 = vpop.permute.xlu0 %1892 }
 0x1a0   : >> { %7953 = vst [vmem:[#allocation35_spill] sm:$0xff] %v5910_v14  ;;  %7954 = vst [vmem:[#allocation36_spill] sm:$0xff] %v5912_v10  ;;  %2589 = vperm.xlu1 %4762, %v4411_v49   ;;  %2584 = vperm.xlu0 %4761, %v4410_v50   ;;  %v4421_v49 = vld [vmem:[%s5569_s11 + $0x428] sm:$0xff]  ;;  %v4420_v50 = vld [vmem:[%s5569_s11 + $0x420] sm:$0xff] }
 0x1a3   : >> { %v5916_v13 = vpop.permute.xlu1 %2000  ;;  %v5918_v12 = vpop.permute.xlu0 %1995 }
 0x1a4   : >> { %7955 = vst [vmem:[#allocation37_spill] sm:$0xff] %v5916_v13  ;;  %7956 = vst [vmem:[#allocation38_spill] sm:$0xff] %v5918_v12  ;;  %2692 = vperm.xlu1 %4762, %v4417_v17   ;;  %2687 = vperm.xlu0 %4761, %v4416_v18   ;;  %v4423_v17 = vld [vmem:[%s5569_s11 + $0x438] sm:$0xff]  ;;  %v4422_v18 = vld [vmem:[%s5569_s11 + $0x430] sm:$0xff] }
 0x1a7   : >> { %v5922_v15 = vpop.permute.xlu1 %2010  ;;  %v5924_v14 = vpop.permute.xlu0 %2005 }
 0x1a8   : >> { %7957 = vst [vmem:[#allocation39_spill] sm:$0xff] %v5922_v15  ;;  %7958 = vst [vmem:[#allocation40_spill] sm:$0xff] %v5924_v14  ;;  %2702 = vperm.xlu1 %4762, %v4419_v33   ;;  %2697 = vperm.xlu0 %4761, %v4418_v34   ;;  %v4425_v33 = vld [vmem:[%s5569_s11 + $0x448] sm:$0xff]  ;;  %v4424_v34 = vld [vmem:[%s5569_s11 + $0x440] sm:$0xff] }
 0x1ab   : >> { %v5928_v10 = vpop.permute.xlu1 %2020  ;;  %v5930_v13 = vpop.permute.xlu0 %2015 }
 0x1ac   : >> { %7959 = vst [vmem:[#allocation41_spill] sm:$0xff] %v5928_v10  ;;  %7960 = vst [vmem:[#allocation42_spill] sm:$0xff] %v5930_v13  ;;  %2712 = vperm.xlu1 %4762, %v4421_v49   ;;  %2707 = vperm.xlu0 %4761, %v4420_v50   ;;  %v4427_v49 = vld [vmem:[%s5569_s11 + $0x458] sm:$0xff]  ;;  %v4426_v50 = vld [vmem:[%s5569_s11 + $0x450] sm:$0xff] }
 0x1af   : >> { %v5934_v12 = vpop.permute.xlu1 %2030  ;;  %v5936_v15 = vpop.permute.xlu0 %2025 }
 0x1b0   : >> { %7961 = vst [vmem:[#allocation43_spill] sm:$0xff] %v5934_v12  ;;  %7962 = vst [vmem:[#allocation44_spill] sm:$0xff] %v5936_v15  ;;  %2722 = vperm.xlu1 %4762, %v4423_v17   ;;  %2717 = vperm.xlu0 %4761, %v4422_v18   ;;  %v4429_v17 = vld [vmem:[%s5569_s11 + $0x468] sm:$0xff]  ;;  %v4428_v18 = vld [vmem:[%s5569_s11 + $0x460] sm:$0xff] }
 0x1b3   : >> { %v5940_v14 = vpop.permute.xlu1 %2040  ;;  %v5942_v10 = vpop.permute.xlu0 %2035 }
 0x1b4   : >> { %7963 = vst [vmem:[#allocation45_spill] sm:$0xff] %v5940_v14  ;;  %7964 = vst [vmem:[#allocation46_spill] sm:$0xff] %v5942_v10  ;;  %2732 = vperm.xlu1 %4762, %v4425_v33   ;;  %2727 = vperm.xlu0 %4761, %v4424_v34   ;;  %v4431_v33 = vld [vmem:[%s5569_s11 + $0x478] sm:$0xff]  ;;  %v4430_v34 = vld [vmem:[%s5569_s11 + $0x470] sm:$0xff] }
 0x1b7   : >> { %v5946_v13 = vpop.permute.xlu1 %2050  ;;  %v5948_v12 = vpop.permute.xlu0 %2045 }
 0x1b8   : >> { %7965 = vst [vmem:[#allocation47_spill] sm:$0xff] %v5946_v13  ;;  %7966 = vst [vmem:[#allocation48_spill] sm:$0xff] %v5948_v12  ;;  %2742 = vperm.xlu1 %4762, %v4427_v49   ;;  %2737 = vperm.xlu0 %4761, %v4426_v50   ;;  %v4437_v49 = vld [vmem:[%s5569_s11 + $0x488] sm:$0xff]  ;;  %v4436_v50 = vld [vmem:[%s5569_s11 + $0x480] sm:$0xff] }
 0x1bb   : >> { %v5952_v15 = vpop.permute.xlu1 %2060  ;;  %v5954_v14 = vpop.permute.xlu0 %2055 }
 0x1bc   : >> { %7967 = vst [vmem:[#allocation49_spill] sm:$0xff] %v5952_v15  ;;  %7968 = vst [vmem:[#allocation50_spill] sm:$0xff] %v5954_v14  ;;  %2752 = vperm.xlu1 %4762, %v4429_v17   ;;  %2747 = vperm.xlu0 %4761, %v4428_v18   ;;  %v4439_v17 = vld [vmem:[%s5569_s11 + $0x498] sm:$0xff]  ;;  %v4438_v18 = vld [vmem:[%s5569_s11 + $0x490] sm:$0xff] }
 0x1bf   : >> { %v5958_v10 = vpop.permute.xlu1 %2070  ;;  %v5960_v13 = vpop.permute.xlu0 %2065 }
 0x1c0   : >> { %7969 = vst [vmem:[#allocation51_spill] sm:$0xff] %v5958_v10  ;;  %7970 = vst [vmem:[#allocation52_spill] sm:$0xff] %v5960_v13  ;;  %2762 = vperm.xlu1 %4762, %v4431_v33   ;;  %2757 = vperm.xlu0 %4761, %v4430_v34   ;;  %v4441_v33 = vld [vmem:[%s5569_s11 + $0x4a8] sm:$0xff]  ;;  %v4440_v34 = vld [vmem:[%s5569_s11 + $0x4a0] sm:$0xff] }
 0x1c3   : >> { %v5964_v12 = vpop.permute.xlu1 %2173  ;;  %v5966_v15 = vpop.permute.xlu0 %2168 }
 0x1c4   : >> { %7971 = vst [vmem:[#allocation53_spill] sm:$0xff] %v5964_v12  ;;  %7972 = vst [vmem:[#allocation54_spill] sm:$0xff] %v5966_v15  ;;  %2865 = vperm.xlu1 %4762, %v4437_v49   ;;  %2860 = vperm.xlu0 %4761, %v4436_v50   ;;  %v4443_v49 = vld [vmem:[%s5569_s11 + $0x4b8] sm:$0xff]  ;;  %v4442_v50 = vld [vmem:[%s5569_s11 + $0x4b0] sm:$0xff] }
 0x1c7   : >> { %v5970_v14 = vpop.permute.xlu1 %2183  ;;  %v5972_v10 = vpop.permute.xlu0 %2178 }
 0x1c8   : >> { %7973 = vst [vmem:[#allocation55_spill] sm:$0xff] %v5970_v14  ;;  %7974 = vst [vmem:[#allocation56_spill] sm:$0xff] %v5972_v10  ;;  %2875 = vperm.xlu1 %4762, %v4439_v17   ;;  %2870 = vperm.xlu0 %4761, %v4438_v18   ;;  %v4445_v17 = vld [vmem:[%s5569_s11 + $0x4c8] sm:$0xff]  ;;  %v4444_v18 = vld [vmem:[%s5569_s11 + $0x4c0] sm:$0xff] }
 0x1cb   : >> { %v5976_v13 = vpop.permute.xlu1 %2193  ;;  %v5978_v12 = vpop.permute.xlu0 %2188 }
 0x1cc   : >> { %7975 = vst [vmem:[#allocation57_spill] sm:$0xff] %v5976_v13  ;;  %7976 = vst [vmem:[#allocation58_spill] sm:$0xff] %v5978_v12  ;;  %2885 = vperm.xlu1 %4762, %v4441_v33   ;;  %2880 = vperm.xlu0 %4761, %v4440_v34   ;;  %v4447_v33 = vld [vmem:[%s5569_s11 + $0x4d8] sm:$0xff]  ;;  %v4446_v34 = vld [vmem:[%s5569_s11 + $0x4d0] sm:$0xff] }
 0x1cf   : >> { %v5982_v14 = vpop.permute.xlu1 %2203  ;;  %v5984_v15 = vpop.permute.xlu0 %2198 }
 0x1d0   : >> { %7977 = vst [vmem:[#allocation59_spill] sm:$0xff] %v5982_v14  ;;  %7978 = vst [vmem:[#allocation60_spill] sm:$0xff] %v5984_v15  ;;  %2895 = vperm.xlu1 %4762, %v4443_v49   ;;  %2890 = vperm.xlu0 %4761, %v4442_v50   ;;  %v4449_v49 = vld [vmem:[%s5569_s11 + $0x4e8] sm:$0xff]  ;;  %v4448_v50 = vld [vmem:[%s5569_s11 + $0x4e0] sm:$0xff] }
 0x1d3   : >> { %v5988_v13 = vpop.permute.xlu1 %2213  ;;  %v5990_v10 = vpop.permute.xlu0 %2208 }
 0x1d4   : >> { %7979 = vst [vmem:[#allocation61_spill] sm:$0xff] %v5988_v13  ;;  %7980 = vst [vmem:[#allocation62_spill] sm:$0xff] %v5990_v10  ;;  %2905 = vperm.xlu1 %4762, %v4445_v17   ;;  %2900 = vperm.xlu0 %4761, %v4444_v18   ;;  %v6009_v18 = vld [vmem:[%s6002_s23] ss:$0 sm:$0xff] }
 0x1d7   : >> { %v5995_v14 = vpop.permute.xlu1 %2223  ;;  %v5997_v15 = vpop.permute.xlu0 %2218 }
 0x1d8   : >> { %7981 = vst [vmem:[#allocation63_spill] sm:$0xff] %v5995_v14  ;;  %7982 = vst [vmem:[#allocation64_spill] sm:$0xff] %v5997_v15  ;;  %2915 = vperm.xlu1 %4762, %v4447_v33   ;;  %2910 = vperm.xlu0 %4761, %v4446_v34   ;;  %v4451_v33 = vld [vmem:[%s5569_s11 + $0x4f8] sm:$0xff]  ;;  %v4450_v15 = vld [vmem:[%s5569_s11 + $0x4f0] sm:$0xff]  ;;  %v1387_v14 = vsub.f32 %v5724_v35, %v6009_v18  ;;  %v1385_v34 = vsub.f32 %v5726_v36, %v6009_v18 }
 0x1d9   : >> { %v4457_v35 = vld [vmem:[%s5569_s11 + $0x508] sm:$0xff]  ;;  %v1392_v36 = vsub.f32 %v5742_v47, %v6009_v18  ;;  %v1393_v47 = vsub.f32 %v5750_v52, %v6009_v18 }
 0x1db   : >> { %v6006_v17 = vpop.permute.xlu1 %2233  ;;  %v6011_v10 = vpop.permute.xlu0 %2228 }
 0x1dc   : >> { %7983 = vst [vmem:[#allocation65_spill] sm:$0xff] %v6006_v17  ;;  %7984 = vst [vmem:[#allocation66_spill] sm:$0xff] %v6011_v10  ;;  %2925 = vperm.xlu1 %4762, %v4449_v49   ;;  %2920 = vperm.xlu0 %4761, %v4448_v50   ;;  %v1388_v17 = vsub.f32 %v5730_v39, %v6009_v18  ;;  %v1386_v49 = vsub.f32 %v5732_v40, %v6009_v18  ;;  %v4456_v39 = vld [vmem:[%s5569_s11 + $0x500] sm:$0xff]  ;;  %v1403_v10 = vand.u32 2147483647, %v1387_v14 }
 0x1dd   : >> { %v1390_v50 = vsub.f32 %v5736_v43, %v6009_v18  ;;  %v1401_v40 = vand.u32 2147483647, %v1385_v34  ;;  %v1408_v34 = vand.u32 2147483647, %v1392_v36 }
 0x1de   : >> { %v1404_v43 = vand.u32 2147483647, %v1388_v17  ;;  %v1396_v17 = vsub.f32 %v5754_v55, %v6009_v18 }
 0x1df   : >> { %v6017_v13 = vpop.permute.xlu1 %2243  ;;  %v6023_v12 = vpop.permute.xlu0 %2238 }
 0x1e0   : >> { %7985 = vst [vmem:[#allocation67_spill] sm:$0xff] %v6017_v13  ;;  %7986 = vst [vmem:[#allocation68_spill] sm:$0xff] %v6023_v12  ;;  %2935 = vperm.xlu1 %4762, %v4451_v33   ;;  %2930 = vperm.xlu0 %4761, %v4450_v15   ;;  %v1389_v13 = vsub.f32 %v5738_v44, %v6009_v18  ;;  %v1391_v33 = vsub.f32 %v5744_v48, %v6009_v18  ;;  %v6042_v15 = vld [vmem:[%s7919_s2] ss:$0 sm:$0xff]  ;;  %v1402_v48 = vand.u32 2147483647, %v1386_v49 }
 0x1e1   : >> { %v1394_v44 = vsub.f32 %v5748_v51, %v6009_v18  ;;  %v4458_v51 = vld [vmem:[%s5569_s11 + $0x510] sm:$0xff]  ;;  %v1423_v52 = vmul.f32 %v6042_v15, %v1403_v10  ;;  %v1421_v6 = vmul.f32 %v6042_v15, %v1401_v40  ;;  %v1424_v49 = vmul.f32 %v6042_v15, %v1404_v43  ;;  %v4461_v40 = vld [vmem:[%s5569_s11 + $0x528] sm:$0xff] }
 0x1e2   : >> { %v1405_v8 = vand.u32 2147483647, %v1389_v13  ;;  %v1407_v9 = vand.u32 2147483647, %v1391_v33  ;;  %v1409_v13 = vand.u32 2147483647, %v1393_v47  ;;  %v1422_v55 = vmul.f32 %v6042_v15, %v1402_v48 }
 0x1e3   : >> { %v6037_v12 = vpop.permute.xlu1 %2346  ;;  %v6048_v14 = vpop.permute.xlu0 %2341  ;;  %v1395_v10 = vsub.f32 %v5756_v56, %v6009_v18  ;;  %v1398_v33 = vsub.f32 %v5760_v59, %v6009_v18  ;;  %v1412_v47 = vand.u32 2147483647, %v1396_v17  ;;  %v4460_v48 = vld [vmem:[%s5569_s11 + $0x520] sm:$0xff]  ;;  %v1400_v59 = vsub.f32 %v5766_v63, %v6009_v18 }
 0x1e4   : >> { %7987 = vst [vmem:[#allocation69_spill] sm:$0xff] %v6037_v12  ;;  %7988 = vst [vmem:[#allocation70_spill] sm:$0xff] %v6048_v14  ;;  %3038 = vperm.xlu1 %4762, %v4457_v35   ;;  %v1406_v12 = vand.u32 2147483647, %v1390_v50  ;;  %3033 = vperm.xlu0 %4761, %v4456_v39   ;;  %v6061_v35 = vld [vmem:[%s1275_s5] ss:$0 sm:$0xff]  ;;  %v1425_v43 = vmul.f32 %v6042_v15, %v1405_v8  ;;  %v1427_v56 = vmul.f32 %v6042_v15, %v1407_v9 }
 0x1e5   : >> { %v1410_v50 = vand.u32 2147483647, %v1394_v44  ;;  %v1428_v44 = vmul.f32 %v6042_v15, %v1408_v34  ;;  %v6090_v34 = vadd.f32 %v6061_v35, %v1421_v6  ;;  %v1429_v9 = vmul.f32 %v6042_v15, %v1409_v13  ;;  %s4964_s5 = smov (%p7789_p13), [#allocation3]  }
 0x1e6   : >> { %v1426_v39 = vmul.f32 %v6042_v15, %v1406_v12  ;;  %v6080_v12 = vadd.f32 %v6061_v35, %v1423_v52  ;;  %v6098_v52 = vld [vmem:[%s6002_s23 + $0x1] ss:$0 sm:$0xff]  ;;  %v6103_v63 = vadd.f32 %v6061_v35, %v1422_v55  ;;  %v1411_v6 = vand.u32 2147483647, %v1395_v10  ;;  %s4767_s6 = sshll.u32 (%p7789_p13), %s4964_s5, 4  ;;  %s4768_s6 = int_to_ptr.vmem [resolvable:$false] %s4767_s6 }
 0x1e7   : >> { %v6059_v14 = vpop.permute.xlu1 %2356  ;;  %v6065_v36 = vpop.permute.xlu0 %2351  ;;  %v1430_v17 = vmul.f32 %v6042_v15, %v1410_v50  ;;  %v6113_v50 = vadd.f32 %v6061_v35, %v1428_v44  ;;  %v1432_v13 = vmul.f32 %v6042_v15, %v1412_v47  ;;  %v6118_v55 = vadd.f32 %v6061_v35, %v1427_v56  ;;  %p4770_p3 = scmp.lt.s32.totalorder (%p7789_p13), %s7873_s28, %s4768_s6 }
 0x1e8   : >> { %7989 = vst [vmem:[#allocation71_spill] sm:$0xff] %v6059_v14  ;;  %7990 = vst [vmem:[#allocation72_spill] sm:$0xff] %v6065_v36  ;;  %3048 = vperm.xlu1 %4762, %v4459_v11   ;;  %3043 = vperm.xlu0 %4761, %v4458_v51   ;;  %v1397_v11 = vsub.f32 %v5762_v60, %v6009_v18  ;;  %v1399_v51 = vsub.f32 %v5768_v16, %v6009_v18  ;;  %v1414_v18 = vand.u32 2147483647, %v1398_v33 }
 0x1e9   : >> { %v6093_v60 = vadd.f32 %v6061_v35, %v1424_v49  ;;  %v6106_v16 = vadd.f32 %v6061_v35, %v1426_v39  ;;  %v4463_v49 = vld [vmem:[%s5569_s11 + $0x538] sm:$0xff]  ;;  %v1416_v39 = vand.u32 2147483647, %v1400_v59  ;;  %v1559_v10 = vsub.f32 %v5772_v19, %v6098_v52 }
 0x1ea   : >> { %v1415_v14 = vand.u32 2147483647, %v1399_v51  ;;  %v6128_v44 = vadd.f32 %v6061_v35, %v1429_v9  ;;  %v1558_v47 = vsub.f32 %v5774_v20, %v6098_v52  ;;  %v1431_v19 = vmul.f32 %v6042_v15, %v1411_v6 }
 0x1eb   : >> { %v6087_v8 = vpop.permute.xlu1 %2366  ;;  %v6100_v36 = vpop.permute.xlu0 %2361  ;;  %v1434_v56 = vmul.f32 %v6042_v15, %v1414_v18  ;;  %v1560_v59 = vsub.f32 %v5780_v24, %v6098_v52  ;;  %v1563_v51 = vsub.f32 %v5784_v27, %v6098_v52  ;;  %v6144_v20 = vadd.f32 %v6061_v35, %v1432_v13  ;;  %v4464_v18 = vld [vmem:[%s5569_s11 + $0x540] sm:$0xff] }
 0x1ec   : >> { %7991 = vst [vmem:[#allocation73_spill] sm:$0xff] %v6087_v8  ;;  %7992 = vst [vmem:[#allocation74_spill] sm:$0xff] %v6100_v36  ;;  %3058 = vperm.xlu1 %4762, %v4461_v40   ;;  %3053 = vperm.xlu0 %4761, %v4460_v48   ;;  %v6110_v8 = vadd.f32 %v6061_v35, %v1425_v43  ;;  %v1413_v36 = vand.u32 2147483647, %v1397_v11  ;;  %v4462_v40 = vld [vmem:[%s5569_s11 + $0x530] sm:$0xff]  ;;  %v6125_v43 = vadd.f32 %v6061_v35, %v1430_v17  ;;  %v4465_v17 = vld [vmem:[%s5569_s11 + $0x548] sm:$0xff] }
 0x1ed   : >> { %v1561_v11 = vsub.f32 %v5778_v23, %v6098_v52  ;;  %v1562_v9 = vsub.f32 %v5786_v28, %v6098_v52  ;;  %v1565_v6 = vsub.f32 %v5790_v31, %v6098_v52  ;;  %v1435_v24 = vmul.f32 %v6042_v15, %v1415_v14 }
 0x1ee   : >> { %v1433_v23 = vmul.f32 %v6042_v15, %v1413_v36  ;;  %v1575_v27 = vand.u32 2147483647, %v1559_v10  ;;  %v6161_v36 = vld [vmem:[%s7919_s2 + $0x1] ss:$0 sm:$0xff]  ;;  %v1574_v28 = vand.u32 2147483647, %v1558_v47  ;;  %v6173_v10 = vadd.f32 %v6061_v35, %v1434_v56 }
 0x1ef   : >> { %v6122_v33 = vpop.permute.xlu1 %2376  ;;  %v6134_v48 = vpop.permute.xlu0 %2371  ;;  %v1577_v31 = vand.u32 2147483647, %v1561_v11  ;;  %v4467_v47 = vld [vmem:[%s5569_s11 + $0x558] sm:$0xff] }
 0x1f0   : >> { %7993 = vst [vmem:[#allocation75_spill] sm:$0xff] %v6122_v33  ;;  %7994 = vst [vmem:[#allocation76_spill] sm:$0xff] %v6134_v48  ;;  %3068 = vperm.xlu1 %4762, %v4463_v49   ;;  %3063 = vperm.xlu0 %4761, %v4462_v40   ;;  %v1436_v49 = vmul.f32 %v6042_v15, %v1416_v39  ;;  %v1564_v40 = vsub.f32 %v5792_v32, %v6098_v52  ;;  %v1579_v48 = vand.u32 2147483647, %v1563_v51 }
 0x1f1   : >> { %v1567_v39 = vsub.f32 %v5796_v37, %v6098_v52  ;;  %v1566_v15 = vsub.f32 %v5798_v38, %v6098_v52  ;;  %v6170_v32 = vadd.f32 %v6061_v35, %v1431_v19  ;;  %v6177_v11 = vadd.f32 %v6061_v35, %v1433_v23 }
 0x1f2   : >> { %v1578_v37 = vand.u32 2147483647, %v1562_v9  ;;  %v1581_v33 = vand.u32 2147483647, %v1565_v6  ;;  %v1569_v38 = vsub.f32 %v5802_v45, %v6098_v52  ;;  %v6186_v19 = vadd.f32 %v6061_v35, %v1435_v24 }
 0x1f3   : >> { %v6156_v13 = vpop.permute.xlu1 %2386  ;;  %v6167_v14 = vpop.permute.xlu0 %2381  ;;  %v1595_v56 = vmul.f32 %v6161_v36, %v1575_v27  ;;  %v1594_v23 = vmul.f32 %v6161_v36, %v1574_v28  ;;  %v1597_v9 = vmul.f32 %v6161_v36, %v1577_v31  ;;  %v1583_v6 = vand.u32 2147483647, %v1567_v39 }
 0x1f4   : >> { %7995 = vst [vmem:[#allocation77_spill] sm:$0xff] %v6156_v13  ;;  %7996 = vst [vmem:[#allocation78_spill] sm:$0xff] %v6167_v14  ;;  %3078 = vperm.xlu1 %4762, %v4465_v17   ;;  %v1576_v13 = vand.u32 2147483647, %v1560_v59  ;;  %3073 = vperm.xlu0 %4761, %v4464_v18   ;;  %v4466_v14 = vld [vmem:[%s5569_s11 + $0x550] sm:$0xff]  ;;  %v6183_v17 = vadd.f32 %v6061_v35, %v1436_v49  ;;  %v1599_v35 = vmul.f32 %v6161_v36, %v1579_v48 }
 0x1f5   : >> { %v1580_v59 = vand.u32 2147483647, %v1564_v40  ;;  %v1582_v45 = vand.u32 2147483647, %v1566_v15  ;;  %v1568_v24 = vsub.f32 %v5804_v46, %v6098_v52  ;;  %v1571_v27 = vsub.f32 %v5808_v53, %v6098_v52  ;;  %v4469_v40 = vld [vmem:[%s5569_s11 + $0x568] sm:$0xff] }
 0x1f6   : >> { %v1596_v49 = vmul.f32 %v6161_v36, %v1576_v13  ;;  %v1598_v28 = vmul.f32 %v6161_v36, %v1578_v37  ;;  %v1601_v31 = vmul.f32 %v6161_v36, %v1581_v33  ;;  %v1585_v39 = vand.u32 2147483647, %v1569_v38  ;;  %v4468_v13 = vld [vmem:[%s5569_s11 + $0x560] sm:$0xff] }
 0x1f7   : >> { %v6189_v51 = vpop.permute.xlu1 %2396  ;;  %v6193_v18 = vpop.permute.xlu0 %2391  ;;  %v1570_v15 = vsub.f32 %v5810_v54, %v6098_v52  ;;  %v6208_v48 = vadd.f32 %v1595_v56, %v6103_v63  ;;  %v1600_v46 = vmul.f32 %v6161_v36, %v1580_v59  ;;  %v1573_v53 = vsub.f32 %v5814_v61, %v6098_v52  ;;  %v6226_v38 = vld [vmem:[%s6002_s23 + $0x2] ss:$0 sm:$0xff] }
 0x1f8   : >> { %3088 = vperm.xlu1 %4762, %v4467_v47   ;;  %3083 = vperm.xlu0 %4761, %v4466_v14   ;;  %v1572_v14 = vsub.f32 %v5816_v62, %v6098_v52  ;;  %v6218_v33 = vadd.f32 %v1594_v23, %v6090_v34  ;;  %v6221_v54 = vadd.f32 %v1597_v9, %v6093_v60  ;;  %v1584_v34 = vand.u32 2147483647, %v1568_v24  ;;  %v4471_v60 = vld [vmem:[%s5569_s11 + $0x578] sm:$0xff] }
 0x1f9   : >> { %v1603_v63 = vmul.f32 %v6161_v36, %v1583_v6  ;;  %v1602_v37 = vmul.f32 %v6161_v36, %v1582_v45  ;;  %v6231_v61 = vadd.f32 %v1596_v49, %v6080_v12  ;;  %v6234_v62 = vadd.f32 %v1599_v35, %v6106_v16  ;;  %v4470_v45 = vld [vmem:[%s5569_s11 + $0x570] sm:$0xff] }
 0x1fa   : >> { %v1587_v52 = vand.u32 2147483647, %v1571_v27  ;;  %v6238_v59 = vadd.f32 %v1598_v28, %v6110_v8  ;;  %v6241_v23 = vadd.f32 %v1601_v31, %v6113_v50  ;;  %v1605_v9 = vmul.f32 %v6161_v36, %v1585_v39  ;;  %v4477_v31 = vld [vmem:[%s5569_s11 + $0x588] sm:$0xff] }
 0x1fb   : >> { %v6215_v47 = vpop.permute.xlu1 %2406  ;;  %v6228_v56 = vpop.permute.xlu0 %2401  ;;  %v1586_v6 = vand.u32 2147483647, %v1570_v15  ;;  %v6246_v12 = vadd.f32 %v1600_v46, %v6118_v55  ;;  %v1589_v16 = vand.u32 2147483647, %v1573_v53  ;;  %v1588_v49 = vand.u32 2147483647, %v1572_v14 }
 0x1fc   : >> { %3098 = vperm.xlu1 %4762, %v4469_v40   ;;  %3093 = vperm.xlu0 %4761, %v4468_v13   ;;  %v1732_v35 = vsub.f32 %v5820_v21, %v6226_v38  ;;  %v6253_v8 = vadd.f32 %v1603_v63, %v6125_v43  ;;  %v6256_v50 = vadd.f32 %v1602_v37, %v6128_v44  ;;  %v4476_v13 = vld [vmem:[%s5569_s11 + $0x580] sm:$0xff] }
 0x1fd   : >> { %v1731_v27 = vsub.f32 %v5822_v22, %v6226_v38  ;;  %v1734_v55 = vsub.f32 %v5826_v29, %v6226_v38  ;;  %v1604_v21 = vmul.f32 %v6161_v36, %v1584_v34  ;;  %v1607_v28 = vmul.f32 %v6161_v36, %v1587_v52  ;;  %v6289_v14 = vld [vmem:[%s7919_s2 + $0x2] ss:$0 sm:$0xff] }
 0x1fe   : >> { %v1733_v43 = vsub.f32 %v5828_v30, %v6226_v38  ;;  %v1736_v44 = vsub.f32 %v5832_v41, %v6226_v38  ;;  %v6272_v22 = vadd.f32 %v1605_v9, %v6144_v20  ;;  %v1606_v29 = vmul.f32 %v6161_v36, %v1586_v6  ;;  %v4479_v9 = vld [vmem:[%s5569_s11 + $0x598] sm:$0xff] }
 0x1ff   : >> { %v6250_v24 = vpop.permute.xlu1 %2416  ;;  %v6262_v40 = vpop.permute.xlu0 %2411  ;;  %v1735_v39 = vsub.f32 %v5834_v42, %v6226_v38  ;;  %v1738_v15 = vsub.f32 %v5838_v57, %v6226_v38  ;;  %v1609_v46 = vmul.f32 %v6161_v36, %v1589_v16  ;;  %v1608_v30 = vmul.f32 %v6161_v36, %v1588_v49  ;;  %v4478_v16 = vld [vmem:[%s5569_s11 + $0x590] sm:$0xff] }
 0x200   : >> { %3108 = vperm.xlu1 %4762, %v4471_v60   ;;  %3103 = vperm.xlu0 %4761, %v4470_v45   ;;  %v1748_v41 = vand.u32 2147483647, %v1732_v35  ;;  %v1737_v53 = vsub.f32 %v5840_v58, %v6226_v38  ;;  %v1747_v42 = vand.u32 2147483647, %v1731_v27  ;;  %v1750_v57 = vand.u32 2147483647, %v1734_v55 }
 0x201   : >> { %v1740_v63 = vsub.f32 %v5844_v25, %v6226_v38  ;;  %v1739_v36 = vsub.f32 %v5846_v26, %v6226_v38  ;;  %v6298_v58 = vadd.f32 %v1604_v21, %v6170_v32  ;;  %v6301_v34 = vadd.f32 %v1607_v28, %v6173_v10 }
 0x202   : >> { %v1749_v52 = vand.u32 2147483647, %v1733_v43  ;;  %v1752_v60 = vand.u32 2147483647, %v1736_v44  ;;  %v6305_v6 = vadd.f32 %v1606_v29, %v6177_v11  ;;  %v1751_v25 = vand.u32 2147483647, %v1735_v39 }
 0x203   : >> { %v6284_v20 = vpop.permute.xlu1 %2519  ;;  %v6295_v37 = vpop.permute.xlu0 %2514  ;;  %v1754_v45 = vand.u32 2147483647, %v1738_v15  ;;  %v1742_v26 = vsub.f32 %v5850_v1, %v6226_v38  ;;  %v6311_v49 = vadd.f32 %v1609_v46, %v6183_v17  ;;  %v6314_v32 = vadd.f32 %v1608_v30, %v6186_v19  ;;  %v4480_v46 = vld [vmem:[%s5569_s11 + $0x5a0] sm:$0xff] }
 0x204   : >> { %3211 = vperm.xlu1 %4762, %v4477_v31   ;;  %3206 = vperm.xlu0 %4761, %v4476_v13   ;;  %v1768_v10 = vmul.f32 %v6289_v14, %v1748_v41  ;;  %v1753_v35 = vand.u32 2147483647, %v1737_v53  ;;  %v1767_v11 = vmul.f32 %v6289_v14, %v1747_v42  ;;  %v1770_v55 = vmul.f32 %v6289_v14, %v1750_v57  ;;  %v4481_v31 = vld [vmem:[%s5569_s11 + $0x5a8] sm:$0xff] }
 0x205   : >> { %v1756_v21 = vand.u32 2147483647, %v1740_v63  ;;  %v1755_v1 = vand.u32 2147483647, %v1739_v36  ;;  %v1769_v17 = vmul.f32 %v6289_v14, %v1749_v52  ;;  %v1772_v19 = vmul.f32 %v6289_v14, %v1752_v60  ;;  %v6354_v63 = vld [vmem:[%s6002_s23 + $0x3] ss:$0 sm:$0xff] }
 0x206   : >> { %v1741_v43 = vsub.f32 %v5852_v0, %v6226_v38  ;;  %v1744_v44 = vsub.f32 %v5856_v3, %v6226_v38  ;;  %v1771_v29 = vmul.f32 %v6289_v14, %v1751_v25  ;;  %v1774_v39 = vmul.f32 %v6289_v14, %v1754_v45  ;;  %v4482_v45 = vld [vmem:[%s5569_s11 + $0x5b0] sm:$0xff] }
 0x207   : >> { %v6317_v27 = vpop.permute.xlu1 %2529  ;;  %v6321_v28 = vpop.permute.xlu0 %2524  ;;  %v1758_v15 = vand.u32 2147483647, %v1742_v26  ;;  %v1743_v13 = vsub.f32 %v5858_v2, %v6226_v38  ;;  %v6336_v30 = vadd.f32 %v1768_v10, %v6208_v48  ;;  %v1773_v0 = vmul.f32 %v6289_v14, %v1753_v35  ;;  %v7997_v35 = vld [vmem:[#allocation22_spill] sm:$0xff] }
 0x208   : >> { %3221 = vperm.xlu1 %4762, %v4479_v9   ;;  %3216 = vperm.xlu0 %4761, %v4478_v16   ;;  %v1746_v3 = vsub.f32 %v5862_v5, %v6226_v38  ;;  %v1745_v41 = vsub.f32 %v5864_v4, %v6226_v38  ;;  %v6346_v42 = vadd.f32 %v1767_v11, %v6218_v33  ;;  %v1757_v33 = vand.u32 2147483647, %v1741_v43  ;;  %v4485_v43 = vld [vmem:[%s5569_s11 + $0x5c8] sm:$0xff] }
 0x209   : >> { %v6349_v2 = vadd.f32 %v1770_v55, %v6221_v54  ;;  %v1776_v48 = vmul.f32 %v6289_v14, %v1756_v21  ;;  %v1775_v57 = vmul.f32 %v6289_v14, %v1755_v1  ;;  %v6359_v4 = vadd.f32 %v1769_v17, %v6231_v61  ;;  %v4483_v54 = vld [vmem:[%s5569_s11 + $0x5b8] sm:$0xff] }
 0x20a   : >> { %v6362_v5 = vadd.f32 %v1772_v19, %v6234_v62  ;;  %v1760_v38 = vand.u32 2147483647, %v1744_v44  ;;  %v6366_v52 = vadd.f32 %v1771_v29, %v6238_v59  ;;  %v6369_v60 = vadd.f32 %v1774_v39, %v6241_v23  ;;  %v8000_v19 = vld [vmem:[#allocation25_spill] sm:$0xff]  ;;  %v8001_v29 = vld [vmem:[#allocation26_spill] sm:$0xff] }
 0x20b   : >> { %v6343_v53 = vpop.permute.xlu1 %2539  ;;  %v6356_v36 = vpop.permute.xlu0 %2534  ;;  %v1778_v9 = vmul.f32 %v6289_v14, %v1758_v15  ;;  %v1759_v25 = vand.u32 2147483647, %v1743_v13  ;;  %v6374_v61 = vadd.f32 %v1773_v0, %v6246_v12  ;;  %v1762_v62 = vand.u32 2147483647, %v1746_v3  ;;  %v7998_v12 = vld [vmem:[#allocation23_spill] sm:$0xff] }
 0x20c   : >> { %3231 = vperm.xlu1 %4762, %v4481_v31   ;;  %3226 = vperm.xlu0 %4761, %v4480_v46   ;;  %v1761_v26 = vand.u32 2147483647, %v1745_v41  ;;  %v1905_v16 = vsub.f32 %v5868_v7, %v6354_v63  ;;  %v6381_v59 = vadd.f32 %v1776_v48, %v6253_v8  ;;  %v6384_v23 = vadd.f32 %v1775_v57, %v6256_v50  ;;  %v7999_v8 = vld [vmem:[#allocation24_spill] sm:$0xff]  ;;  %v8002_v15 = vld [vmem:[#allocation27_spill] sm:$0xff]  ;;  %v4484_v46 = vld [vmem:[%s5569_s11 + $0x5c0] sm:$0xff] }
 0x20d   : >> { %v1904_v11 = vsub.f32 %v7997_v35, %v6354_v63  ;;  %v1907_v55 = vsub.f32 %v7998_v12, %v6354_v63  ;;  %v1777_v7 = vmul.f32 %v6289_v14, %v1757_v33  ;;  %v1780_v1 = vmul.f32 %v6289_v14, %v1760_v38  ;;  %v8003_v48 = vld [vmem:[#allocation28_spill] sm:$0xff]  ;;  %v6417_v33 = vld [vmem:[%s7919_s2 + $0x3] ss:$0 sm:$0xff] }
 0x20e   : >> { %v1906_v17 = vsub.f32 %v7999_v8, %v6354_v63  ;;  %v1909_v50 = vsub.f32 %v8000_v19, %v6354_v63  ;;  %v6400_v44 = vadd.f32 %v1778_v9, %v6272_v22  ;;  %v1779_v31 = vmul.f32 %v6289_v14, %v1759_v25  ;;  %v8004_v9 = vld [vmem:[#allocation29_spill] sm:$0xff] }
 0x20f   : >> { %v6378_v10 = vpop.permute.xlu1 %2549  ;;  %v6390_v21 = vpop.permute.xlu0 %2544  ;;  %v1908_v39 = vsub.f32 %v8001_v29, %v6354_v63  ;;  %v1911_v13 = vsub.f32 %v8002_v15, %v6354_v63  ;;  %v1782_v0 = vmul.f32 %v6289_v14, %v1762_v62  ;;  %v1781_v3 = vmul.f32 %v6289_v14, %v1761_v26  ;;  %v8005_v14 = vld [vmem:[#allocation30_spill] sm:$0xff]  ;;  %v8006_v29 = vld [vmem:[#allocation31_spill] sm:$0xff] }
 0x210   : >> { %3241 = vperm.xlu1 %4762, %v4483_v54   ;;  %3236 = vperm.xlu0 %4761, %v4482_v45   ;;  %v1921_v41 = vand.u32 2147483647, %v1905_v16  ;;  %v1910_v57 = vsub.f32 %v8003_v48, %v6354_v63  ;;  %v1920_v38 = vand.u32 2147483647, %v1904_v11  ;;  %v1923_v54 = vand.u32 2147483647, %v1907_v55 }
 0x211   : >> { %v1913_v25 = vsub.f32 %v8004_v9, %v6354_v63  ;;  %v1912_v45 = vsub.f32 %v8005_v14, %v6354_v63  ;;  %v6426_v26 = vadd.f32 %v1777_v7, %v6298_v58  ;;  %v6429_v16 = vadd.f32 %v1780_v1, %v6301_v34  ;;  %v4487_v11 = vld [vmem:[%s5569_s11 + $0x5d8] sm:$0xff]  ;;  %v4486_v48 = vld [vmem:[%s5569_s11 + $0x5d0] sm:$0xff] }
 0x212   : >> { %v1922_v35 = vand.u32 2147483647, %v1906_v17  ;;  %v1925_v12 = vand.u32 2147483647, %v1909_v50  ;;  %v6433_v55 = vadd.f32 %v1779_v31, %v6305_v6  ;;  %v1924_v8 = vand.u32 2147483647, %v1908_v39 }
 0x213   : >> { %v6412_v22 = vpop.permute.xlu1 %2559  ;;  %v6423_v62 = vpop.permute.xlu0 %2554  ;;  %v1927_v19 = vand.u32 2147483647, %v1911_v13  ;;  %v1915_v15 = vsub.f32 %v8006_v29, %v6354_v63  ;;  %v6442_v58 = vadd.f32 %v1781_v3, %v6314_v32  ;;  %v1926_v34 = vand.u32 2147483647, %v1910_v57  ;;  %v8007_v7 = vld [vmem:[#allocation32_spill] sm:$0xff]  ;;  %v4489_v57 = vld [vmem:[%s5569_s11 + $0x5e8] sm:$0xff] }
 0x214   : >> { %3251 = vperm.xlu1 %4762, %v4485_v43   ;;  %3246 = vperm.xlu0 %4761, %v4484_v46   ;;  %v6439_v43 = vadd.f32 %v1782_v0, %v6311_v49  ;;  %v1914_v1 = vsub.f32 %v8007_v7, %v6354_v63  ;;  %v1941_v6 = vmul.f32 %v6417_v33, %v1921_v41  ;;  %v1929_v31 = vand.u32 2147483647, %v1913_v25  ;;  %v8008_v0 = vld [vmem:[#allocation33_spill] sm:$0xff]  ;;  %v8009_v25 = vld [vmem:[#allocation34_spill] sm:$0xff]  ;;  %v8011_v29 = vld [vmem:[#allocation36_spill] sm:$0xff] }
 0x215   : >> { %v1940_v50 = vmul.f32 %v6417_v33, %v1920_v38  ;;  %v1928_v39 = vand.u32 2147483647, %v1912_v45  ;;  %v1943_v49 = vmul.f32 %v6417_v33, %v1923_v54  ;;  %v1942_v32 = vmul.f32 %v6417_v33, %v1922_v35  ;;  %v4488_v45 = vld [vmem:[%s5569_s11 + $0x5e0] sm:$0xff] }
 0x216   : >> { %v1945_v46 = vmul.f32 %v6417_v33, %v1925_v12  ;;  %v1917_v3 = vsub.f32 %v8008_v0, %v6354_v63  ;;  %v1944_v41 = vmul.f32 %v6417_v33, %v1924_v8  ;;  %v1947_v38 = vmul.f32 %v6417_v33, %v1927_v19  ;;  %v8010_v12 = vld [vmem:[#allocation35_spill] sm:$0xff] }
 0x217   : >> { %v6446_v17 = vpop.permute.xlu1 %2569  ;;  %v6450_v13 = vpop.permute.xlu0 %2564  ;;  %v1931_v9 = vand.u32 2147483647, %v1915_v15  ;;  %v1916_v14 = vsub.f32 %v8009_v25, %v6354_v63  ;;  %v1946_v54 = vmul.f32 %v6417_v33, %v1926_v34  ;;  %v1930_v35 = vand.u32 2147483647, %v1914_v1 }
 0x218   : >> { %3261 = vperm.xlu1 %4762, %v4487_v11   ;;  %3256 = vperm.xlu0 %4761, %v4486_v48   ;;  %v1919_v11 = vsub.f32 %v8010_v12, %v6354_v63  ;;  %v1918_v48 = vsub.f32 %v8011_v29, %v6354_v63  ;;  %v6471_v8 = vadd.f32 %v1941_v6, %v6336_v30  ;;  %v1933_v6 = vand.u32 2147483647, %v1917_v3 }
 0x219   : >> { %v6474_v19 = vadd.f32 %v1940_v50, %v6346_v42  ;;  %v1949_v15 = vmul.f32 %v6417_v33, %v1929_v31  ;;  %v1948_v34 = vmul.f32 %v6417_v33, %v1928_v39  ;;  %v6481_v0 = vadd.f32 %v1943_v49, %v6349_v2  ;;  %v6490_v42 = vld [vmem:[%s6002_s23 + $0x4] ss:$0 sm:$0xff]  ;;  %v4491_v50 = vld [vmem:[%s5569_s11 + $0x5f8] sm:$0xff] }
 0x21a   : >> { %v6484_v63 = vadd.f32 %v1942_v32, %v6359_v4  ;;  %v6487_v30 = vadd.f32 %v1945_v46, %v6362_v5  ;;  %v6494_v31 = vadd.f32 %v1944_v41, %v6366_v52  ;;  %v6497_v39 = vadd.f32 %v1947_v38, %v6369_v60  ;;  %v8015_v41 = vld [vmem:[#allocation37_spill] sm:$0xff] }
 0x21b   : >> { %v6468_v7 = vpop.permute.xlu1 %2579  ;;  %v6478_v1 = vpop.permute.xlu0 %2574  ;;  %v1951_v2 = vmul.f32 %v6417_v33, %v1931_v9  ;;  %v1932_v49 = vand.u32 2147483647, %v1916_v14  ;;  %v6502_v4 = vadd.f32 %v1946_v54, %v6374_v61  ;;  %v1950_v5 = vmul.f32 %v6417_v33, %v1930_v35  ;;  %v8016_v61 = vld [vmem:[#allocation38_spill] sm:$0xff] }
 0x21c   : >> { %8012 = vst [vmem:[#allocation22_spill] sm:$0xff] %v6468_v7  ;;  %8013 = vst [vmem:[#allocation23_spill] sm:$0xff] %v6478_v1  ;;  %3271 = vperm.xlu1 %4762, %v4489_v57   ;;  %3266 = vperm.xlu0 %4761, %v4488_v45   ;;  %v4490_v57 = vld [vmem:[%s5569_s11 + $0x5f0] sm:$0xff]  ;;  %v1935_v32 = vand.u32 2147483647, %v1919_v11  ;;  %v6508_v52 = vadd.f32 %v1949_v15, %v6381_v59  ;;  %v6511_v60 = vadd.f32 %v1948_v34, %v6384_v23  ;;  %v8018_v45 = vld [vmem:[#allocation39_spill] sm:$0xff] }
 0x21d   : >> { %v1934_v46 = vand.u32 2147483647, %v1918_v48  ;;  %v2078_v38 = vsub.f32 %v8015_v41, %v6490_v42  ;;  %v2077_v9 = vsub.f32 %v8016_v61, %v6490_v42  ;;  %v1953_v14 = vmul.f32 %v6417_v33, %v1933_v6  ;;  %v8019_v59 = vld [vmem:[#allocation40_spill] sm:$0xff]  ;;  %v8020_v23 = vld [vmem:[#allocation41_spill] sm:$0xff]  ;;  %v4497_v11 = vld [vmem:[%s5569_s11 + $0x608] sm:$0xff] }
 0x21e   : >> { %v2080_v54 = vsub.f32 %v8018_v45, %v6490_v42  ;;  %v2079_v35 = vsub.f32 %v8019_v59, %v6490_v42  ;;  %v2082_v12 = vsub.f32 %v8020_v23, %v6490_v42  ;;  %v6528_v29 = vadd.f32 %v1951_v2, %v6400_v44  ;;  %v8021_v15 = vld [vmem:[#allocation42_spill] sm:$0xff]  ;;  %v8022_v6 = vld [vmem:[#allocation43_spill] sm:$0xff]  ;;  %v8023_v2 = vld [vmem:[#allocation44_spill] sm:$0xff] }
 0x21f   : >> { %v6505_v3 = vpop.permute.xlu1 %2589  ;;  %v6517_v25 = vpop.permute.xlu0 %2584  ;;  %v1952_v48 = vmul.f32 %v6417_v33, %v1932_v49  ;;  %v2081_v34 = vsub.f32 %v8021_v15, %v6490_v42  ;;  %v4496_v41 = vld [vmem:[%s5569_s11 + $0x600] sm:$0xff]  ;;  %v6537_v61 = vadd.f32 %v1950_v5, %v6426_v26  ;;  %v1955_v45 = vmul.f32 %v6417_v33, %v1935_v32  ;;  %v8025_v26 = vld [vmem:[#allocation45_spill] sm:$0xff] }
 0x220   : >> { %8014 = vst [vmem:[#allocation24_spill] sm:$0xff] %v6505_v3  ;;  %8017 = vst [vmem:[#allocation25_spill] sm:$0xff] %v6517_v25  ;;  %3281 = vperm.xlu1 %4762, %v4491_v50   ;;  %3276 = vperm.xlu0 %4761, %v4490_v57   ;;  %v2084_v50 = vsub.f32 %v8022_v6, %v6490_v42  ;;  %v1954_v57 = vmul.f32 %v6417_v33, %v1934_v46  ;;  %v6544_v44 = vld [vmem:[%s7919_s2 + $0x4] ss:$0 sm:$0xff]  ;;  %v2094_v23 = vand.u32 2147483647, %v2078_v38 }
 0x221   : >> { %v2083_v49 = vsub.f32 %v8023_v2, %v6490_v42  ;;  %v2093_v15 = vand.u32 2147483647, %v2077_v9  ;;  %v2086_v5 = vsub.f32 %v8025_v26, %v6490_v42  ;;  %v8026_v32 = vld [vmem:[#allocation46_spill] sm:$0xff]  ;;  %v4499_v46 = vld [vmem:[%s5569_s11 + $0x618] sm:$0xff]  ;;  %v6558_v25 = vadd.f32 %v1953_v14, %v6429_v16  ;;  %v8028_v26 = vld [vmem:[#allocation47_spill] sm:$0xff] }
 0x222   : >> { %v2085_v6 = vsub.f32 %v8026_v32, %v6490_v42  ;;  %v2096_v3 = vand.u32 2147483647, %v2080_v54  ;;  %v2095_v2 = vand.u32 2147483647, %v2079_v35  ;;  %v2098_v1 = vand.u32 2147483647, %v2082_v12 }
 0x223   : >> { %v6548_v59 = vpop.permute.xlu1 %2692  ;;  %v6554_v33 = vpop.permute.xlu0 %2687  ;;  %v6561_v38 = vadd.f32 %v1952_v48, %v6433_v55  ;;  %v2097_v9 = vand.u32 2147483647, %v2081_v34  ;;  %v2088_v7 = vsub.f32 %v8028_v26, %v6490_v42  ;;  %v4498_v32 = vld [vmem:[%s5569_s11 + $0x610] sm:$0xff]  ;;  %v6570_v16 = vadd.f32 %v1954_v57, %v6442_v58 }
 0x224   : >> { %8024 = vst [vmem:[#allocation26_spill] sm:$0xff] %v6548_v59  ;;  %8027 = vst [vmem:[#allocation27_spill] sm:$0xff] %v6554_v33  ;;  %3384 = vperm.xlu1 %4762, %v4497_v11   ;;  %3379 = vperm.xlu0 %4761, %v4496_v41   ;;  %v2100_v59 = vand.u32 2147483647, %v2084_v50  ;;  %v6567_v33 = vadd.f32 %v1955_v45, %v6439_v43  ;;  %v2099_v14 = vand.u32 2147483647, %v2083_v49 }
 0x225   : >> { %v8029_v54 = vld [vmem:[#allocation48_spill] sm:$0xff]  ;;  %v2114_v55 = vmul.f32 %v6544_v44, %v2094_v23  ;;  %v2113_v11 = vmul.f32 %v6544_v44, %v2093_v15  ;;  %v2102_v48 = vand.u32 2147483647, %v2086_v5  ;;  %v2101_v34 = vand.u32 2147483647, %v2085_v6  ;;  %v8032_v45 = vld [vmem:[#allocation49_spill] sm:$0xff] }
 0x226   : >> { %v2087_v35 = vsub.f32 %v8029_v54, %v6490_v42  ;;  %v2116_v43 = vmul.f32 %v6544_v44, %v2096_v3  ;;  %v2115_v58 = vmul.f32 %v6544_v44, %v2095_v2  ;;  %v2118_v41 = vmul.f32 %v6544_v44, %v2098_v1  ;;  %v4501_v49 = vld [vmem:[%s5569_s11 + $0x628] sm:$0xff]  ;;  %v8033_v6 = vld [vmem:[#allocation50_spill] sm:$0xff] }
 0x227   : >> { %v6574_v12 = vpop.permute.xlu1 %2702  ;;  %v6578_v50 = vpop.permute.xlu0 %2697  ;;  %v2090_v57 = vsub.f32 %v8032_v45, %v6490_v42  ;;  %v2117_v23 = vmul.f32 %v6544_v44, %v2097_v9  ;;  %v2120_v15 = vmul.f32 %v6544_v44, %v2100_v59  ;;  %v2104_v5 = vand.u32 2147483647, %v2088_v7  ;;  %v8034_v1 = vld [vmem:[#allocation51_spill] sm:$0xff] }
 0x228   : >> { %8030 = vst [vmem:[#allocation28_spill] sm:$0xff] %v6574_v12  ;;  %8031 = vst [vmem:[#allocation29_spill] sm:$0xff] %v6578_v50  ;;  %3394 = vperm.xlu1 %4762, %v4499_v46   ;;  %3389 = vperm.xlu0 %4761, %v4498_v32   ;;  %v2089_v26 = vsub.f32 %v8033_v6, %v6490_v42  ;;  %v4500_v46 = vld [vmem:[%s5569_s11 + $0x620] sm:$0xff]  ;;  %v2119_v3 = vmul.f32 %v6544_v44, %v2099_v14  ;;  %v2103_v2 = vand.u32 2147483647, %v2087_v35  ;;  %v8035_v32 = vld [vmem:[#allocation52_spill] sm:$0xff] }
 0x229   : >> { %v2092_v54 = vsub.f32 %v8034_v1, %v6490_v42  ;;  %v2091_v45 = vsub.f32 %v8035_v32, %v6490_v42  ;;  %v6599_v59 = vadd.f32 %v2114_v55, %v6471_v8  ;;  %v6602_v7 = vadd.f32 %v2113_v11, %v6474_v19  ;;  %v6618_v19 = vld [vmem:[%s6002_s23 + $0x5] ss:$0 sm:$0xff]  ;;  %v4503_v11 = vld [vmem:[%s5569_s11 + $0x638] sm:$0xff]  ;;  %v4505_v32 = vld [vmem:[%s5569_s11 + $0x648] sm:$0xff] }
 0x22a   : >> { %v2122_v9 = vmul.f32 %v6544_v44, %v2102_v48  ;;  %v2121_v14 = vmul.f32 %v6544_v44, %v2101_v34  ;;  %v6609_v6 = vadd.f32 %v2116_v43, %v6481_v0  ;;  %v6612_v42 = vadd.f32 %v2115_v58, %v6484_v63 }
 0x22b   : >> { %v6596_v50 = vpop.permute.xlu1 %2712  ;;  %v6606_v35 = vpop.permute.xlu0 %2707  ;;  %v6615_v8 = vadd.f32 %v2118_v41, %v6487_v30  ;;  %v2106_v55 = vand.u32 2147483647, %v2090_v57  ;;  %v6622_v48 = vadd.f32 %v2117_v23, %v6494_v31  ;;  %v6625_v34 = vadd.f32 %v2120_v15, %v6497_v39  ;;  %v8039_v23 = vld [vmem:[#allocation53_spill] sm:$0xff] }
 0x22c   : >> { %8036 = vst [vmem:[#allocation30_spill] sm:$0xff] %v6596_v50  ;;  %8037 = vst [vmem:[#allocation31_spill] sm:$0xff] %v6606_v35  ;;  %3404 = vperm.xlu1 %4762, %v4501_v49   ;;  %3399 = vperm.xlu0 %4761, %v4500_v46   ;;  %v2124_v0 = vmul.f32 %v6544_v44, %v2104_v5  ;;  %v2105_v43 = vand.u32 2147483647, %v2089_v26  ;;  %v4502_v49 = vld [vmem:[%s5569_s11 + $0x630] sm:$0xff]  ;;  %v6630_v63 = vadd.f32 %v2119_v3, %v6502_v4  ;;  %v8040_v4 = vld [vmem:[#allocation54_spill] sm:$0xff] }
 0x22d   : >> { %v2123_v30 = vmul.f32 %v6544_v44, %v2103_v2  ;;  %v2108_v58 = vand.u32 2147483647, %v2092_v54  ;;  %v2107_v41 = vand.u32 2147483647, %v2091_v45  ;;  %v6636_v31 = vadd.f32 %v2122_v9, %v6508_v52  ;;  %v8042_v3 = vld [vmem:[#allocation55_spill] sm:$0xff]  ;;  %v8043_v52 = vld [vmem:[#allocation56_spill] sm:$0xff] }
 0x22e   : >> { %v6639_v39 = vadd.f32 %v2121_v14, %v6511_v60  ;;  %v2251_v15 = vsub.f32 %v8039_v23, %v6618_v19  ;;  %v2250_v5 = vsub.f32 %v8040_v4, %v6618_v19  ;;  %v2126_v46 = vmul.f32 %v6544_v44, %v2106_v55  ;;  %v8044_v60 = vld [vmem:[#allocation57_spill] sm:$0xff]  ;;  %v8045_v14 = vld [vmem:[#allocation58_spill] sm:$0xff] }
 0x22f   : >> { %v6633_v57 = vpop.permute.xlu1 %2722  ;;  %v6645_v26 = vpop.permute.xlu0 %2717  ;;  %v2253_v2 = vsub.f32 %v8042_v3, %v6618_v19  ;;  %v2252_v1 = vsub.f32 %v8043_v52, %v6618_v19  ;;  %v2255_v54 = vsub.f32 %v8044_v60, %v6618_v19  ;;  %v6656_v45 = vadd.f32 %v2124_v0, %v6528_v29  ;;  %v4504_v4 = vld [vmem:[%s5569_s11 + $0x640] sm:$0xff]  ;;  %v8047_v0 = vld [vmem:[#allocation60_spill] sm:$0xff] }
 0x230   : >> { %8038 = vst [vmem:[#allocation32_spill] sm:$0xff] %v6633_v57  ;;  %8041 = vst [vmem:[#allocation33_spill] sm:$0xff] %v6645_v26  ;;  %3414 = vperm.xlu1 %4762, %v4503_v11   ;;  %3409 = vperm.xlu0 %4761, %v4502_v49   ;;  %v2125_v9 = vmul.f32 %v6544_v44, %v2105_v43  ;;  %v2254_v55 = vsub.f32 %v8045_v14, %v6618_v19  ;;  %v8046_v11 = vld [vmem:[#allocation59_spill] sm:$0xff]  ;;  %v6672_v29 = vld [vmem:[%s7919_s2 + $0x5] ss:$0 sm:$0xff] }
 0x231   : >> { %v2257_v23 = vsub.f32 %v8046_v11, %v6618_v19  ;;  %v6665_v3 = vadd.f32 %v2123_v30, %v6537_v61  ;;  %v2128_v52 = vmul.f32 %v6544_v44, %v2108_v58  ;;  %v2127_v49 = vmul.f32 %v6544_v44, %v2107_v41  ;;  %v8049_v61 = vld [vmem:[#allocation61_spill] sm:$0xff]  ;;  %v8050_v58 = vld [vmem:[#allocation62_spill] sm:$0xff] }
 0x232   : >> { %v2256_v43 = vsub.f32 %v8047_v0, %v6618_v19  ;;  %v2267_v14 = vand.u32 2147483647, %v2251_v15  ;;  %v2266_v11 = vand.u32 2147483647, %v2250_v5  ;;  %v2259_v30 = vsub.f32 %v8049_v61, %v6618_v19  ;;  %v4507_v41 = vld [vmem:[%s5569_s11 + $0x658] sm:$0xff]  ;;  %v8052_v61 = vld [vmem:[#allocation63_spill] sm:$0xff] }
 0x233   : >> { %v6676_v60 = vpop.permute.xlu1 %2732  ;;  %v2258_v26 = vsub.f32 %v8050_v58, %v6618_v19  ;;  %v6682_v44 = vpop.permute.xlu0 %2727  ;;  %v6686_v57 = vadd.f32 %v2126_v46, %v6558_v25  ;;  %v2269_v35 = vand.u32 2147483647, %v2253_v2  ;;  %v2268_v0 = vand.u32 2147483647, %v2252_v1  ;;  %v4506_v58 = vld [vmem:[%s5569_s11 + $0x650] sm:$0xff] }
 0x234   : >> { %8048 = vst [vmem:[#allocation34_spill] sm:$0xff] %v6676_v60  ;;  %8051 = vst [vmem:[#allocation35_spill] sm:$0xff] %v6682_v44  ;;  %3424 = vperm.xlu1 %4762, %v4505_v32   ;;  %v2271_v50 = vand.u32 2147483647, %v2255_v54  ;;  %3419 = vperm.xlu0 %4761, %v4504_v4   ;;  %v6689_v15 = vadd.f32 %v2125_v9, %v6561_v38  ;;  %v2270_v5 = vand.u32 2147483647, %v2254_v55 }
 0x235   : >> { %v2273_v60 = vand.u32 2147483647, %v2257_v23  ;;  %v2261_v12 = vsub.f32 %v8052_v61, %v6618_v19  ;;  %v6695_v44 = vadd.f32 %v2128_v52, %v6567_v33  ;;  %v6698_v25 = vadd.f32 %v2127_v49, %v6570_v16  ;;  %v8053_v2 = vld [vmem:[#allocation64_spill] sm:$0xff]  ;;  %v8055_v52 = vld [vmem:[#allocation65_spill] sm:$0xff] }
 0x236   : >> { %v2272_v46 = vand.u32 2147483647, %v2256_v43  ;;  %v2260_v1 = vsub.f32 %v8053_v2, %v6618_v19  ;;  %v2287_v38 = vmul.f32 %v6672_v29, %v2267_v14  ;;  %v2286_v32 = vmul.f32 %v6672_v29, %v2266_v11  ;;  %v4509_v43 = vld [vmem:[%s5569_s11 + $0x668] sm:$0xff] }
 0x237   : >> { %v6702_v54 = vpop.permute.xlu1 %2742  ;;  %v2275_v9 = vand.u32 2147483647, %v2259_v30  ;;  %v2274_v55 = vand.u32 2147483647, %v2258_v26  ;;  %v6706_v23 = vpop.permute.xlu0 %2737  ;;  %v2289_v33 = vmul.f32 %v6672_v29, %v2269_v35  ;;  %v2288_v16 = vmul.f32 %v6672_v29, %v2268_v0  ;;  %v8056_v26 = vld [vmem:[#allocation66_spill] sm:$0xff] }
 0x238   : >> { %8054 = vst [vmem:[#allocation36_spill] sm:$0xff] %v6706_v23  ;;  %3434 = vperm.xlu1 %4762, %v4507_v41   ;;  %v2291_v4 = vmul.f32 %v6672_v29, %v2271_v50  ;;  %v2263_v49 = vsub.f32 %v8055_v52, %v6618_v19  ;;  %3429 = vperm.xlu0 %4761, %v4506_v58   ;;  %v2277_v30 = vand.u32 2147483647, %v2261_v12  ;;  %v4508_v41 = vld [vmem:[%s5569_s11 + $0x660] sm:$0xff]  ;;  %v2276_v0 = vand.u32 2147483647, %v2260_v1 }
 0x239   : >> { %v2290_v14 = vmul.f32 %v6672_v29, %v2270_v5  ;;  %v2293_v11 = vmul.f32 %v6672_v29, %v2273_v60  ;;  %v2262_v61 = vsub.f32 %v8056_v26, %v6618_v19  ;;  %v2292_v35 = vmul.f32 %v6672_v29, %v2272_v46  ;;  %v8057_v50 = vld [vmem:[#allocation67_spill] sm:$0xff]  ;;  %v8058_v58 = vld [vmem:[#allocation68_spill] sm:$0xff] }
 0x23a   : >> { %v2265_v2 = vsub.f32 %v8057_v50, %v6618_v19  ;;  %v2264_v52 = vsub.f32 %v8058_v58, %v6618_v19  ;;  %v6727_v60 = vadd.f32 %v2287_v38, %v6599_v59  ;;  %v6730_v12 = vadd.f32 %v2286_v32, %v6602_v7  ;;  %v6746_v7 = vld [vmem:[%s6002_s23 + $0x6] ss:$0 sm:$0xff]  ;;  %v4511_v32 = vld [vmem:[%s5569_s11 + $0x678] sm:$0xff]  ;;  %v4517_v58 = vld [vmem:[%s5569_s11 + $0x688] sm:$0xff] }
 0x23b   : >> { %v6724_v23 = vpop.permute.xlu1 %2752  ;;  %v2295_v5 = vmul.f32 %v6672_v29, %v2275_v9  ;;  %v2294_v46 = vmul.f32 %v6672_v29, %v2274_v55  ;;  %v6734_v1 = vpop.permute.xlu0 %2747  ;;  %v6737_v26 = vadd.f32 %v2289_v33, %v6609_v6  ;;  %v6740_v19 = vadd.f32 %v2288_v16, %v6612_v42 }
 0x23c   : >> { %8059 = vst [vmem:[#allocation37_spill] sm:$0xff] %v6724_v23  ;;  %8060 = vst [vmem:[#allocation38_spill] sm:$0xff] %v6734_v1  ;;  %3444 = vperm.xlu1 %4762, %v4509_v43   ;;  %v6743_v59 = vadd.f32 %v2291_v4, %v6615_v8  ;;  %v2279_v38 = vand.u32 2147483647, %v2263_v49  ;;  %3439 = vperm.xlu0 %4761, %v4508_v41   ;;  %v6750_v9 = vadd.f32 %v2290_v14, %v6622_v48  ;;  %v4510_v43 = vld [vmem:[%s5569_s11 + $0x670] sm:$0xff]  ;;  %v8062_v14 = vld [vmem:[#allocation69_spill] sm:$0xff] }
 0x23d   : >> { %v6753_v55 = vadd.f32 %v2293_v11, %v6625_v34  ;;  %v2297_v6 = vmul.f32 %v6672_v29, %v2277_v30  ;;  %v2278_v33 = vand.u32 2147483647, %v2262_v61  ;;  %v6758_v42 = vadd.f32 %v2292_v35, %v6630_v63  ;;  %v8063_v63 = vld [vmem:[#allocation70_spill] sm:$0xff]  ;;  %v8065_v35 = vld [vmem:[#allocation71_spill] sm:$0xff] }
 0x23e   : >> { %v2296_v8 = vmul.f32 %v6672_v29, %v2276_v0  ;;  %v2281_v16 = vand.u32 2147483647, %v2265_v2  ;;  %v2280_v4 = vand.u32 2147483647, %v2264_v52  ;;  %v6764_v48 = vadd.f32 %v2295_v5, %v6636_v31  ;;  %v8066_v31 = vld [vmem:[#allocation72_spill] sm:$0xff] }
 0x23f   : >> { %v6761_v49 = vpop.permute.xlu1 %2762  ;;  %v6767_v34 = vadd.f32 %v2294_v46, %v6639_v39  ;;  %v2424_v11 = vsub.f32 %v8062_v14, %v6746_v7  ;;  %v2423_v30 = vsub.f32 %v8063_v63, %v6746_v7  ;;  %v6773_v61 = vpop.permute.xlu0 %2757  ;;  %v2299_v41 = vmul.f32 %v6672_v29, %v2279_v38  ;;  %v8067_v39 = vld [vmem:[#allocation73_spill] sm:$0xff]  ;;  %v8068_v46 = vld [vmem:[#allocation74_spill] sm:$0xff] }
 0x240   : >> { %8061 = vst [vmem:[#allocation39_spill] sm:$0xff] %v6761_v49  ;;  %8064 = vst [vmem:[#allocation40_spill] sm:$0xff] %v6773_v61  ;;  %3454 = vperm.xlu1 %4762, %v4511_v32   ;;  %v2426_v0 = vsub.f32 %v8065_v35, %v6746_v7  ;;  %v2425_v50 = vsub.f32 %v8066_v31, %v6746_v7  ;;  %v2428_v2 = vsub.f32 %v8067_v39, %v6746_v7  ;;  %v8069_v32 = vld [vmem:[#allocation75_spill] sm:$0xff]  ;;  %v4516_v63 = vld [vmem:[%s5569_s11 + $0x680] sm:$0xff] }
 0x241   : >> { %3449 = vperm.xlu0 %4761, %v4510_v43   ;;  %v6784_v52 = vadd.f32 %v2297_v6, %v6656_v45  ;;  %v2298_v5 = vmul.f32 %v6672_v29, %v2278_v33  ;;  %v2427_v38 = vsub.f32 %v8068_v46, %v6746_v7  ;;  %v2430_v14 = vsub.f32 %v8069_v32, %v6746_v7  ;;  %v6800_v45 = vld [vmem:[%s7919_s2 + $0x6] ss:$0 sm:$0xff]  ;;  %v8070_v6 = vld [vmem:[#allocation76_spill] sm:$0xff] }
 0x242   : >> { %v6793_v35 = vadd.f32 %v2296_v8, %v6665_v3  ;;  %v2301_v31 = vmul.f32 %v6672_v29, %v2281_v16  ;;  %v2300_v43 = vmul.f32 %v6672_v29, %v2280_v4  ;;  %v2429_v33 = vsub.f32 %v8070_v6, %v6746_v7  ;;  %v8072_v3 = vld [vmem:[#allocation77_spill] sm:$0xff]  ;;  %v8073_v16 = vld [vmem:[#allocation78_spill] sm:$0xff] }
 0x243   : >> { %v6804_v39 = vpop.permute.xlu1 %2865  ;;  %v2440_v46 = vand.u32 2147483647, %v2424_v11  ;;  %v2439_v32 = vand.u32 2147483647, %v2423_v30  ;;  %v2432_v8 = vsub.f32 %v8072_v3, %v6746_v7  ;;  %v2431_v61 = vsub.f32 %v8073_v16, %v6746_v7  ;;  %v6810_v29 = vpop.permute.xlu0 %2860  ;;  %v4519_v4 = vld [vmem:[%s5569_s11 + $0x698] sm:$0xff]  ;;  %v4518_v16 = vld [vmem:[%s5569_s11 + $0x690] sm:$0xff] }
 0x244   : >> { %8071 = vst [vmem:[#allocation41_spill] sm:$0xff] %v6804_v39  ;;  %8074 = vst [vmem:[#allocation42_spill] sm:$0xff] %v6810_v29  ;;  %3557 = vperm.xlu1 %4762, %v4517_v58   ;;  %v6814_v49 = vadd.f32 %v2299_v41, %v6686_v57  ;;  %v2442_v1 = vand.u32 2147483647, %v2426_v0  ;;  %v2441_v6 = vand.u32 2147483647, %v2425_v50  ;;  %v6817_v11 = vadd.f32 %v2298_v5, %v6689_v15 }
 0x245   : >> { %v2444_v23 = vand.u32 2147483647, %v2428_v2  ;;  %3552 = vperm.xlu0 %4761, %v4516_v63   ;;  %v2443_v30 = vand.u32 2147483647, %v2427_v38  ;;  %v2446_v39 = vand.u32 2147483647, %v2430_v14  ;;  %v2434_v3 = vsub.f32 %v6189_v51, %v6746_v7 }
 0x246   : >> { %v6823_v29 = vadd.f32 %v2301_v31, %v6695_v44  ;;  %v6826_v57 = vadd.f32 %v2300_v43, %v6698_v25  ;;  %v2445_v41 = vand.u32 2147483647, %v2429_v33  ;;  %v2433_v0 = vsub.f32 %v6193_v18, %v6746_v7  ;;  %v4521_v14 = vld [vmem:[%s5569_s11 + $0x6a8] sm:$0xff]  ;;  %v4520_v33 = vld [vmem:[%s5569_s11 + $0x6a0] sm:$0xff] }
 0x247   : >> { %v6830_v50 = vpop.permute.xlu1 %2875  ;;  %v2460_v15 = vmul.f32 %v6800_v45, %v2440_v46  ;;  %v2459_v2 = vmul.f32 %v6800_v45, %v2439_v32  ;;  %v2448_v51 = vand.u32 2147483647, %v2432_v8  ;;  %v2447_v58 = vand.u32 2147483647, %v2431_v61  ;;  %v6834_v5 = vpop.permute.xlu0 %2870 }
 0x248   : >> { %3567 = vperm.xlu1 %4762, %v4519_v4   ;;  %v2462_v44 = vmul.f32 %v6800_v45, %v2442_v1  ;;  %v2461_v25 = vmul.f32 %v6800_v45, %v2441_v6  ;;  %v2464_v38 = vmul.f32 %v6800_v45, %v2444_v23  ;;  %v2436_v18 = vsub.f32 %v6215_v47, %v6746_v7 }
 0x249   : >> { %3562 = vperm.xlu0 %4761, %v4518_v16   ;;  %v2463_v63 = vmul.f32 %v6800_v45, %v2443_v30  ;;  %v2466_v31 = vmul.f32 %v6800_v45, %v2446_v39  ;;  %v2450_v43 = vand.u32 2147483647, %v2434_v3  ;;  %v2435_v61 = vsub.f32 %v6228_v56, %v6746_v7  ;;  %v4523_v30 = vld [vmem:[%s5569_s11 + $0x6b8] sm:$0xff] }
 0x24a   : >> { %v2465_v1 = vmul.f32 %v6800_v45, %v2445_v41  ;;  %v2449_v46 = vand.u32 2147483647, %v2433_v0  ;;  %v2438_v23 = vsub.f32 %v6250_v24, %v6746_v7  ;;  %v2437_v47 = vsub.f32 %v6262_v40, %v6746_v7  ;;  %v4522_v0 = vld [vmem:[%s5569_s11 + $0x6b0] sm:$0xff] }
 0x24b   : >> { %v6852_v32 = vpop.permute.xlu1 %2885  ;;  %v6855_v39 = vadd.f32 %v2460_v15, %v6727_v60  ;;  %v6858_v8 = vadd.f32 %v2459_v2, %v6730_v12  ;;  %v2468_v56 = vmul.f32 %v6800_v45, %v2448_v51  ;;  %v2467_v4 = vmul.f32 %v6800_v45, %v2447_v58  ;;  %v6862_v6 = vpop.permute.xlu0 %2880  ;;  %v6874_v12 = vld [vmem:[%s6002_s23 + $0x7] ss:$0 sm:$0xff] }
 0x24c   : >> { %3577 = vperm.xlu1 %4762, %v4521_v14   ;;  %v6865_v24 = vadd.f32 %v2462_v44, %v6737_v26  ;;  %v6868_v40 = vadd.f32 %v2461_v25, %v6740_v19  ;;  %v6871_v60 = vadd.f32 %v2464_v38, %v6743_v59  ;;  %v2452_v7 = vand.u32 2147483647, %v2436_v18  ;;  %v4525_v18 = vld [vmem:[%s5569_s11 + $0x6c8] sm:$0xff] }
 0x24d   : >> { %3572 = vperm.xlu0 %4761, %v4520_v33   ;;  %v6878_v3 = vadd.f32 %v2463_v63, %v6750_v9  ;;  %v6881_v16 = vadd.f32 %v2466_v31, %v6753_v55  ;;  %v2470_v26 = vmul.f32 %v6800_v45, %v2450_v43  ;;  %v2451_v41 = vand.u32 2147483647, %v2435_v61  ;;  %v4524_v63 = vld [vmem:[%s5569_s11 + $0x6c0] sm:$0xff] }
 0x24e   : >> { %v6886_v19 = vadd.f32 %v2465_v1, %v6758_v42  ;;  %v2469_v59 = vmul.f32 %v6800_v45, %v2449_v46  ;;  %v2454_v15 = vand.u32 2147483647, %v2438_v23  ;;  %v2453_v2 = vand.u32 2147483647, %v2437_v47  ;;  %v4527_v1 = vld [vmem:[%s5569_s11 + $0x6d8] sm:$0xff] }
 0x24f   : >> { %v6889_v51 = vpop.permute.xlu1 %2895  ;;  %v6892_v9 = vadd.f32 %v2468_v56, %v6764_v48  ;;  %v6895_v55 = vadd.f32 %v2467_v4, %v6767_v34  ;;  %v2597_v58 = vsub.f32 %v6284_v20, %v6874_v12  ;;  %v2596_v42 = vsub.f32 %v6295_v37, %v6874_v12  ;;  %v6901_v44 = vpop.permute.xlu0 %2890 }
 0x250   : >> { %3587 = vperm.xlu1 %4762, %v4523_v30   ;;  %v2472_v25 = vmul.f32 %v6800_v45, %v2452_v7  ;;  %v2599_v38 = vsub.f32 %v6317_v27, %v6874_v12  ;;  %v2598_v48 = vsub.f32 %v6321_v28, %v6874_v12  ;;  %v2601_v34 = vsub.f32 %v6343_v53, %v6874_v12 }
 0x251   : >> { %3582 = vperm.xlu0 %4761, %v4522_v0   ;;  %v6912_v20 = vadd.f32 %v2470_v26, %v6784_v52  ;;  %v2471_v37 = vmul.f32 %v6800_v45, %v2451_v41  ;;  %v2600_v14 = vsub.f32 %v6356_v36, %v6874_v12  ;;  %v2603_v27 = vsub.f32 %v6378_v10, %v6874_v12  ;;  %v6928_v52 = vld [vmem:[%s7919_s2 + $0x7] ss:$0 sm:$0xff] }
 0x252   : >> { %v6921_v28 = vadd.f32 %v2469_v59, %v6793_v35  ;;  %v2474_v53 = vmul.f32 %v6800_v45, %v2454_v15  ;;  %v2473_v31 = vmul.f32 %v6800_v45, %v2453_v2  ;;  %v2602_v43 = vsub.f32 %v6390_v21, %v6874_v12 }
 0x253   : >> { %v6932_v36 = vpop.permute.xlu1 %2905  ;;  %v2613_v61 = vand.u32 2147483647, %v2597_v58  ;;  %v2612_v10 = vand.u32 2147483647, %v2596_v42  ;;  %v2605_v35 = vsub.f32 %v6412_v22, %v6874_v12  ;;  %v2604_v33 = vsub.f32 %v6423_v62, %v6874_v12  ;;  %v6938_v45 = vpop.permute.xlu0 %2900  ;;  %v4526_v62 = vld [vmem:[%s5569_s11 + $0x6d0] sm:$0xff] }
 0x254   : >> { %3597 = vperm.xlu1 %4762, %v4525_v18   ;;  %v6942_v46 = vadd.f32 %v2472_v25, %v6814_v49  ;;  %v2615_v23 = vand.u32 2147483647, %v2599_v38  ;;  %v2614_v21 = vand.u32 2147483647, %v2598_v48  ;;  %v2617_v47 = vand.u32 2147483647, %v2601_v34 }
 0x255   : >> { %3592 = vperm.xlu0 %4761, %v4524_v63   ;;  %v6945_v56 = vadd.f32 %v2471_v37, %v6817_v11  ;;  %v2616_v4 = vand.u32 2147483647, %v2600_v14  ;;  %v2619_v7 = vand.u32 2147483647, %v2603_v27  ;;  %v2607_v22 = vsub.f32 %v6446_v17, %v6874_v12  ;;  %v4529_v25 = vld [vmem:[%s5569_s11 + $0x6e8] sm:$0xff]  ;;  %v4528_v14 = vld [vmem:[%s5569_s11 + $0x6e0] sm:$0xff] }
 0x256   : >> { %v6951_v30 = vadd.f32 %v2474_v53, %v6823_v29  ;;  %v6954_v49 = vadd.f32 %v2473_v31, %v6826_v57  ;;  %v2618_v26 = vand.u32 2147483647, %v2602_v43  ;;  %v2606_v41 = vsub.f32 %v6450_v13, %v6874_v12  ;;  %v8075_v13 = vld [vmem:[#allocation22_spill] sm:$0xff]  ;;  %v8076_v18 = vld [vmem:[#allocation23_spill] sm:$0xff]  ;;  %v8077_v53 = vld [vmem:[#allocation24_spill] sm:$0xff] }
 0x257   : >> { %v6958_v0 = vpop.permute.xlu1 %2915  ;;  %v2633_v11 = vmul.f32 %v6928_v52, %v2613_v61  ;;  %v2632_v59 = vmul.f32 %v6928_v52, %v2612_v10  ;;  %v2621_v17 = vand.u32 2147483647, %v2605_v35  ;;  %v2620_v15 = vand.u32 2147483647, %v2604_v33  ;;  %v6962_v2 = vpop.permute.xlu0 %2910  ;;  %v8078_v43 = vld [vmem:[#allocation25_spill] sm:$0xff] }
 0x258   : >> { %3607 = vperm.xlu1 %4762, %v4527_v1   ;;  %v2635_v29 = vmul.f32 %v6928_v52, %v2615_v23  ;;  %v2634_v57 = vmul.f32 %v6928_v52, %v2614_v21  ;;  %v2637_v58 = vmul.f32 %v6928_v52, %v2617_v47  ;;  %v2609_v42 = vsub.f32 %v8075_v13, %v6874_v12 }
 0x259   : >> { %3602 = vperm.xlu0 %4761, %v4526_v62   ;;  %v2636_v38 = vmul.f32 %v6928_v52, %v2616_v4  ;;  %v2639_v48 = vmul.f32 %v6928_v52, %v2619_v7  ;;  %v2623_v34 = vand.u32 2147483647, %v2607_v22  ;;  %v2608_v37 = vsub.f32 %v8076_v18, %v6874_v12  ;;  %v4531_v7 = vld [vmem:[%s5569_s11 + $0x6f8] sm:$0xff] }
 0x25a   : >> { %v2638_v27 = vmul.f32 %v6928_v52, %v2618_v26  ;;  %v2622_v63 = vand.u32 2147483647, %v2606_v41  ;;  %v2611_v31 = vsub.f32 %v8077_v53, %v6874_v12  ;;  %v2610_v61 = vsub.f32 %v8078_v43, %v6874_v12  ;;  %v4530_v41 = vld [vmem:[%s5569_s11 + $0x6f0] sm:$0xff] }
 0x25b   : >> { %v6980_v10 = vpop.permute.xlu1 %2925  ;;  %v6983_v35 = vadd.f32 %v2633_v11, %v6855_v39  ;;  %v6986_v33 = vadd.f32 %v2632_v59, %v6858_v8  ;;  %v2641_v1 = vmul.f32 %v6928_v52, %v2621_v17  ;;  %v2640_v23 = vmul.f32 %v6928_v52, %v2620_v15  ;;  %v6990_v21 = vpop.permute.xlu0 %2920  ;;  %v7002_v8 = vld [vmem:[%s6002_s23 + $0x8] ss:$0 sm:$0xff]  ;;  %v8079_v15 = vld [vmem:[#allocation26_spill] sm:$0xff] }
 0x25c   : >> { %3617 = vperm.xlu1 %4762, %v4529_v25   ;;  %v6993_v47 = vadd.f32 %v2635_v29, %v6865_v24  ;;  %v6996_v12 = vadd.f32 %v2634_v57, %v6868_v40  ;;  %v6999_v39 = vadd.f32 %v2637_v58, %v6871_v60  ;;  %v2625_v4 = vand.u32 2147483647, %v2609_v42  ;;  %v8081_v42 = vld [vmem:[#allocation28_spill] sm:$0xff] }
 0x25d   : >> { %3612 = vperm.xlu0 %4761, %v4528_v14   ;;  %v7006_v22 = vadd.f32 %v2636_v38, %v6878_v3  ;;  %v7009_v62 = vadd.f32 %v2639_v48, %v6881_v16  ;;  %v2643_v24 = vmul.f32 %v6928_v52, %v2623_v34  ;;  %v2624_v26 = vand.u32 2147483647, %v2608_v37  ;;  %v4537_v34 = vld [vmem:[%s5569_s11 + $0x708] sm:$0xff] }
 0x25e   : >> { %v7014_v40 = vadd.f32 %v2638_v27, %v6886_v19  ;;  %v2642_v60 = vmul.f32 %v6928_v52, %v2622_v63  ;;  %v2627_v11 = vand.u32 2147483647, %v2611_v31  ;;  %v2626_v59 = vand.u32 2147483647, %v2610_v61  ;;  %v8080_v19 = vld [vmem:[#allocation27_spill] sm:$0xff]  ;;  %v8085_v63 = vld [vmem:[#allocation32_spill] sm:$0xff] }
 0x25f   : >> { %v7017_v17 = vpop.permute.xlu1 %2935  ;;  %v7020_v3 = vadd.f32 %v2641_v1, %v6892_v9  ;;  %v7023_v16 = vadd.f32 %v2640_v23, %v6895_v55  ;;  %v2770_v29 = vsub.f32 %v8079_v15, %v7002_v8  ;;  %v2769_v57 = vsub.f32 %v8080_v19, %v7002_v8  ;;  %v7029_v58 = vpop.permute.xlu0 %2930  ;;  %v8082_v9 = vld [vmem:[#allocation29_spill] sm:$0xff]  ;;  %v8083_v55 = vld [vmem:[#allocation30_spill] sm:$0xff]  ;;  %v8084_v14 = vld [vmem:[#allocation31_spill] sm:$0xff] }
 0x260   : >> { %3627 = vperm.xlu1 %4762, %v4531_v7   ;;  %v2645_v13 = vmul.f32 %v6928_v52, %v2625_v4  ;;  %v2772_v25 = vsub.f32 %v8081_v42, %v7002_v8  ;;  %v2771_v38 = vsub.f32 %v8082_v9, %v7002_v8  ;;  %v2774_v48 = vsub.f32 %v8083_v55, %v7002_v8  ;;  %v4536_v31 = vld [vmem:[%s5569_s11 + $0x700] sm:$0xff]  ;;  %v8086_v23 = vld [vmem:[#allocation33_spill] sm:$0xff] }
 0x261   : >> { %3622 = vperm.xlu0 %4761, %v4530_v41   ;;  %v7040_v18 = vadd.f32 %v2643_v24, %v6912_v20  ;;  %v2644_v37 = vmul.f32 %v6928_v52, %v2624_v26  ;;  %v2773_v27 = vsub.f32 %v8084_v14, %v7002_v8  ;;  %v2776_v53 = vsub.f32 %v8085_v63, %v7002_v8  ;;  %v7056_v20 = vld [vmem:[%s7919_s2 + $0x8] ss:$0 sm:$0xff]  ;;  %v4538_v63 = vld [vmem:[%s5569_s11 + $0x710] sm:$0xff] }
 0x262   : >> { %v7049_v43 = vadd.f32 %v2642_v60, %v6921_v28  ;;  %v2647_v61 = vmul.f32 %v6928_v52, %v2627_v11  ;;  %v2646_v1 = vmul.f32 %v6928_v52, %v2626_v59  ;;  %v2775_v4 = vsub.f32 %v8086_v23, %v7002_v8  ;;  %v8087_v28 = vld [vmem:[#allocation34_spill] sm:$0xff]  ;;  %v8088_v60 = vld [vmem:[#allocation35_spill] sm:$0xff]  ;;  %v4539_v59 = vld [vmem:[%s5569_s11 + $0x718] sm:$0xff] }
 0x263   : >> { %v7060_v7 = vpop.permute.xlu1 %3038  ;;  %v2786_v24 = vand.u32 2147483647, %v2770_v29  ;;  %v2785_v26 = vand.u32 2147483647, %v2769_v57  ;;  %v2778_v41 = vsub.f32 %v8087_v28, %v7002_v8  ;;  %v2777_v11 = vsub.f32 %v8088_v60, %v7002_v8  ;;  %v7066_v52 = vpop.permute.xlu0 %3033  ;;  %v8091_v28 = vld [vmem:[#allocation38_spill] sm:$0xff] }
 0x264   : >> { %3730 = vperm.xlu1 %4762, %v4537_v34   ;;  %v7070_v15 = vadd.f32 %v2645_v13, %v6942_v46  ;;  %v2788_v19 = vand.u32 2147483647, %v2772_v25  ;;  %v2787_v42 = vand.u32 2147483647, %v2771_v38  ;;  %v2790_v9 = vand.u32 2147483647, %v2774_v48 }
 0x265   : >> { %3725 = vperm.xlu0 %4761, %v4536_v31   ;;  %v7073_v29 = vadd.f32 %v2644_v37, %v6945_v56  ;;  %v2789_v57 = vand.u32 2147483647, %v2773_v27  ;;  %v2792_v55 = vand.u32 2147483647, %v2776_v53  ;;  %v2780_v14 = vsub.f32 %v6702_v54, %v7002_v8  ;;  %v8089_v25 = vld [vmem:[#allocation36_spill] sm:$0xff]  ;;  %v8090_v31 = vld [vmem:[#allocation37_spill] sm:$0xff] }
 0x266   : >> { %v7079_v23 = vadd.f32 %v2647_v61, %v6951_v30  ;;  %v7082_v46 = vadd.f32 %v2646_v1, %v6954_v49  ;;  %v2791_v13 = vand.u32 2147483647, %v2775_v4  ;;  %v2779_v38 = vsub.f32 %v8089_v25, %v7002_v8  ;;  %v4541_v1 = vld [vmem:[%s5569_s11 + $0x728] sm:$0xff]  ;;  %v4540_v60 = vld [vmem:[%s5569_s11 + $0x720] sm:$0xff] }
 0x267   : >> { %v7086_v48 = vpop.permute.xlu1 %3048  ;;  %v2806_v56 = vmul.f32 %v7056_v20, %v2786_v24  ;;  %v2805_v34 = vmul.f32 %v7056_v20, %v2785_v26  ;;  %v2794_v54 = vand.u32 2147483647, %v2778_v41  ;;  %v2793_v37 = vand.u32 2147483647, %v2777_v11  ;;  %v7090_v27 = vpop.permute.xlu0 %3043 }
 0x268   : >> { %3740 = vperm.xlu1 %4762, %v4539_v59   ;;  %v2808_v30 = vmul.f32 %v7056_v20, %v2788_v19  ;;  %v2807_v49 = vmul.f32 %v7056_v20, %v2787_v42  ;;  %v2810_v53 = vmul.f32 %v7056_v20, %v2790_v9  ;;  %v2782_v61 = vsub.f32 %v8090_v31, %v7002_v8  ;;  %v8092_v19 = vld [vmem:[#allocation39_spill] sm:$0xff]  ;;  %v8093_v9 = vld [vmem:[#allocation40_spill] sm:$0xff] }
 0x269   : >> { %3735 = vperm.xlu0 %4761, %v4538_v63   ;;  %v2809_v4 = vmul.f32 %v7056_v20, %v2789_v57  ;;  %v2812_v24 = vmul.f32 %v7056_v20, %v2792_v55  ;;  %v2796_v26 = vand.u32 2147483647, %v2780_v14  ;;  %v2781_v41 = vsub.f32 %v8091_v28, %v7002_v8 }
 0x26a   : >> { %v2811_v11 = vmul.f32 %v7056_v20, %v2791_v13  ;;  %v2795_v59 = vand.u32 2147483647, %v2779_v38  ;;  %v2784_v42 = vsub.f32 %v8092_v19, %v7002_v8  ;;  %v2783_v63 = vsub.f32 %v8093_v9, %v7002_v8  ;;  %v4544_v9 = vld [vmem:[%s5569_s11 + $0x740] sm:$0xff] }
 0x26b   : >> { %v7108_v25 = vpop.permute.xlu1 %3058  ;;  %v7111_v57 = vadd.f32 %v2806_v56, %v6983_v35  ;;  %v7114_v55 = vadd.f32 %v2805_v34, %v6986_v33  ;;  %v2814_v14 = vmul.f32 %v7056_v20, %v2794_v54  ;;  %v2813_v13 = vmul.f32 %v7056_v20, %v2793_v37  ;;  %v7118_v38 = vpop.permute.xlu0 %3053  ;;  %v7130_v33 = vld [vmem:[%s6002_s23 + $0x9] ss:$0 sm:$0xff]  ;;  %v4543_v34 = vld [vmem:[%s5569_s11 + $0x738] sm:$0xff] }
 0x26c   : >> { %3750 = vperm.xlu1 %4762, %v4541_v1   ;;  %v7121_v31 = vadd.f32 %v2808_v30, %v6993_v47  ;;  %v7124_v8 = vadd.f32 %v2807_v49, %v6996_v12  ;;  %v7127_v35 = vadd.f32 %v2810_v53, %v6999_v39  ;;  %v2798_v56 = vand.u32 2147483647, %v2782_v61  ;;  %v4542_v1 = vld [vmem:[%s5569_s11 + $0x730] sm:$0xff] }
 0x26d   : >> { %3745 = vperm.xlu0 %4761, %v4540_v60   ;;  %v7134_v54 = vadd.f32 %v2809_v4, %v7006_v22  ;;  %v7137_v37 = vadd.f32 %v2812_v24, %v7009_v62  ;;  %v2816_v47 = vmul.f32 %v7056_v20, %v2796_v26  ;;  %v2797_v30 = vand.u32 2147483647, %v2781_v41  ;;  %v8094_v4 = vld [vmem:[#allocation41_spill] sm:$0xff] }
 0x26e   : >> { %v7142_v12 = vadd.f32 %v2811_v11, %v7014_v40  ;;  %v2815_v39 = vmul.f32 %v7056_v20, %v2795_v59  ;;  %v2800_v49 = vand.u32 2147483647, %v2784_v42  ;;  %v2799_v53 = vand.u32 2147483647, %v2783_v63  ;;  %v8095_v40 = vld [vmem:[#allocation42_spill] sm:$0xff]  ;;  %v4545_v11 = vld [vmem:[%s5569_s11 + $0x748] sm:$0xff] }
 0x26f   : >> { %v7145_v61 = vpop.permute.xlu1 %3068  ;;  %v7148_v22 = vadd.f32 %v2814_v14, %v7020_v3  ;;  %v7151_v62 = vadd.f32 %v2813_v13, %v7023_v16  ;;  %v2943_v24 = vsub.f32 %v8094_v4, %v7130_v33  ;;  %v2942_v26 = vsub.f32 %v8095_v40, %v7130_v33  ;;  %v7157_v28 = vpop.permute.xlu0 %3063 }
 0x270   : >> { %3760 = vperm.xlu1 %4762, %v4543_v34   ;;  %v2818_v41 = vmul.f32 %v7056_v20, %v2798_v56  ;;  %v2945_v60 = vsub.f32 %v6830_v50, %v7130_v33  ;;  %v2944_v3 = vsub.f32 %v6834_v5, %v7130_v33  ;;  %v2947_v16 = vsub.f32 %v6852_v32, %v7130_v33  ;;  %v4547_v34 = vld [vmem:[%s5569_s11 + $0x758] sm:$0xff] }
 0x271   : >> { %3755 = vperm.xlu0 %4761, %v4542_v1   ;;  %v7168_v59 = vadd.f32 %v2816_v47, %v7040_v18  ;;  %v2817_v19 = vmul.f32 %v7056_v20, %v2797_v30  ;;  %v2946_v42 = vsub.f32 %v6862_v6, %v7130_v33  ;;  %v2949_v50 = vsub.f32 %v6889_v51, %v7130_v33  ;;  %v7184_v18 = vld [vmem:[%s7919_s2 + $0x9] ss:$0 sm:$0xff] }
 0x272   : >> { %v7177_v5 = vadd.f32 %v2815_v39, %v7049_v43  ;;  %v2820_v32 = vmul.f32 %v7056_v20, %v2800_v49  ;;  %v2819_v63 = vmul.f32 %v7056_v20, %v2799_v53  ;;  %v2948_v14 = vsub.f32 %v6901_v44, %v7130_v33  ;;  %v4546_v53 = vld [vmem:[%s5569_s11 + $0x750] sm:$0xff] }
 0x273   : >> { %v7188_v6 = vpop.permute.xlu1 %3078  ;;  %v2959_v13 = vand.u32 2147483647, %v2943_v24  ;;  %v2958_v51 = vand.u32 2147483647, %v2942_v26  ;;  %v2951_v43 = vsub.f32 %v6932_v36, %v7130_v33  ;;  %v2950_v56 = vsub.f32 %v6938_v45, %v7130_v33  ;;  %v7194_v20 = vpop.permute.xlu0 %3073 }
 0x274   : >> { %3770 = vperm.xlu1 %4762, %v4545_v11   ;;  %v7198_v47 = vadd.f32 %v2818_v41, %v7070_v15  ;;  %v2961_v30 = vand.u32 2147483647, %v2945_v60  ;;  %v2960_v44 = vand.u32 2147483647, %v2944_v3  ;;  %v2963_v1 = vand.u32 2147483647, %v2947_v16 }
 0x275   : >> { %3765 = vperm.xlu0 %4761, %v4544_v9   ;;  %v7201_v39 = vadd.f32 %v2817_v19, %v7073_v29  ;;  %v2962_v49 = vand.u32 2147483647, %v2946_v42  ;;  %v2965_v36 = vand.u32 2147483647, %v2949_v50  ;;  %v2957_v45 = vsub.f32 %v7017_v17, %v7130_v33  ;;  %v7219_v3 = vld [vmem:[%s6002_s23 + $0xa] ss:$0 sm:$0xff] }
 0x276   : >> { %v7207_v4 = vadd.f32 %v2820_v32, %v7079_v23  ;;  %v7210_v15 = vadd.f32 %v2819_v63, %v7082_v46  ;;  %v2964_v24 = vand.u32 2147483647, %v2948_v14  ;;  %v2956_v40 = vsub.f32 %v7029_v58, %v7130_v33  ;;  %v4549_v19 = vld [vmem:[%s5569_s11 + $0x768] sm:$0xff]  ;;  %v4548_v63 = vld [vmem:[%s5569_s11 + $0x760] sm:$0xff] }
 0x277   : >> { %v7214_v26 = vpop.permute.xlu1 %3088  ;;  %v2979_v29 = vmul.f32 %v7184_v18, %v2959_v13  ;;  %v2978_v41 = vmul.f32 %v7184_v18, %v2958_v51  ;;  %v2967_v17 = vand.u32 2147483647, %v2951_v43  ;;  %v2966_v60 = vand.u32 2147483647, %v2950_v56  ;;  %v7221_v23 = vpop.permute.xlu0 %3083 }
 0x278   : >> { %3780 = vperm.xlu1 %4762, %v4547_v34   ;;  %v2981_v46 = vmul.f32 %v7184_v18, %v2961_v30  ;;  %v2980_v16 = vmul.f32 %v7184_v18, %v2960_v44  ;;  %v2983_v58 = vmul.f32 %v7184_v18, %v2963_v1  ;;  %v2953_v11 = vsub.f32 %v6958_v0, %v7130_v33 }
 0x279   : >> { %3775 = vperm.xlu0 %4761, %v4546_v53   ;;  %v2982_v42 = vmul.f32 %v7184_v18, %v2962_v49  ;;  %v2985_v50 = vmul.f32 %v7184_v18, %v2965_v36  ;;  %v2952_v9 = vsub.f32 %v6962_v2, %v7130_v33  ;;  %v2973_v32 = vand.u32 2147483647, %v2957_v45 }
 0x27a   : >> { %v2984_v14 = vmul.f32 %v7184_v18, %v2964_v24  ;;  %v2972_v13 = vand.u32 2147483647, %v2956_v40  ;;  %v3116_v51 = vsub.f32 %v7060_v7, %v7219_v3  ;;  %v3115_v0 = vsub.f32 %v7066_v52, %v7219_v3 }
 0x27b   : >> { %v7239_v43 = vpop.permute.xlu1 %3098  ;;  %v7242_v56 = vadd.f32 %v2979_v29, %v7111_v57  ;;  %v7245_v2 = vadd.f32 %v2978_v41, %v7114_v55  ;;  %v2987_v34 = vmul.f32 %v7184_v18, %v2967_v17  ;;  %v2986_v30 = vmul.f32 %v7184_v18, %v2966_v60  ;;  %v7249_v44 = vpop.permute.xlu0 %3093  ;;  %v4551_v55 = vld [vmem:[%s5569_s11 + $0x778] sm:$0xff]  ;;  %v7282_v41 = vld [vmem:[%s7919_s2 + $0xa] ss:$0 sm:$0xff] }
 0x27c   : >> { %3790 = vperm.xlu1 %4762, %v4549_v19   ;;  %v7252_v7 = vadd.f32 %v2981_v46, %v7121_v31  ;;  %v7255_v52 = vadd.f32 %v2980_v16, %v7124_v8  ;;  %v7258_v57 = vadd.f32 %v2983_v58, %v7127_v35  ;;  %v2969_v1 = vand.u32 2147483647, %v2953_v11  ;;  %v4550_v31 = vld [vmem:[%s5569_s11 + $0x770] sm:$0xff]  ;;  %v7296_v58 = vld [vmem:[%s6002_s23 + $0xb] ss:$0 sm:$0xff] }
 0x27d   : >> { %3785 = vperm.xlu0 %4761, %v4548_v63   ;;  %v7262_v49 = vadd.f32 %v2982_v42, %v7134_v54  ;;  %v7265_v36 = vadd.f32 %v2985_v50, %v7137_v37  ;;  %v2968_v45 = vand.u32 2147483647, %v2952_v9  ;;  %v2993_v53 = vmul.f32 %v7184_v18, %v2973_v32  ;;  %v4557_v11 = vld [vmem:[%s5569_s11 + $0x788] sm:$0xff]  ;;  %v4556_v9 = vld [vmem:[%s5569_s11 + $0x780] sm:$0xff] }
 0x27e   : >> { %v7270_v24 = vadd.f32 %v2984_v14, %v7142_v12  ;;  %v2992_v8 = vmul.f32 %v7184_v18, %v2972_v13  ;;  %v3132_v35 = vand.u32 2147483647, %v3116_v51  ;;  %v3131_v40 = vand.u32 2147483647, %v3115_v0 }
 0x27f   : >> { %v3109_v29 = vpop.permute.xlu1 %3108  ;;  %v7274_v54 = vadd.f32 %v2987_v34, %v7148_v22  ;;  %v7277_v37 = vadd.f32 %v2986_v30, %v7151_v62  ;;  %v3118_v12 = vsub.f32 %v7086_v48, %v7219_v3  ;;  %v3104_v60 = vpop.permute.xlu0 %3103  ;;  %v7288_v46 = vmul.f32 %v7184_v18, %v2969_v1 }
 0x280   : >> { %v3130_v17 = vsub.f32 %v3109_v29, %v7219_v3  ;;  %3800 = vperm.xlu1 %4762, %v4551_v55   ;;  %v2955_v22 = vsub.f32 %v6980_v10, %v7130_v33  ;;  %v3117_v62 = vsub.f32 %v7090_v27, %v7219_v3  ;;  %v3129_v16 = vsub.f32 %v3104_v60, %v7219_v3 }
 0x281   : >> { %3795 = vperm.xlu0 %4761, %v4550_v31   ;;  %v7300_v48 = vmul.f32 %v7184_v18, %v2968_v45  ;;  %v2954_v19 = vsub.f32 %v6990_v21, %v7130_v33  ;;  %v3009_v42 = vadd.f32 %v2993_v53, %v7207_v4  ;;  %v3008_v32 = vadd.f32 %v2992_v8, %v7210_v15  ;;  %v7319_v45 = vld [vmem:[%s7919_s2 + $0xb] ss:$0 sm:$0xff]  ;;  %v4559_v53 = vld [vmem:[%s5569_s11 + $0x798] sm:$0xff] }
 0x282   : >> { %v3146_v50 = vand.u32 2147483647, %v3130_v17  ;;  %v3152_v27 = vmul.f32 %v7282_v41, %v3132_v35  ;;  %v3151_v63 = vmul.f32 %v7282_v41, %v3131_v40  ;;  %v3145_v14 = vand.u32 2147483647, %v3129_v16  ;;  %v4558_v40 = vld [vmem:[%s5569_s11 + $0x790] sm:$0xff] }
 0x283   : >> { %v3212_v13 = vpop.permute.xlu1 %3211  ;;  %v3134_v51 = vand.u32 2147483647, %v3118_v12  ;;  %v3120_v0 = vsub.f32 %v7108_v25, %v7219_v3  ;;  %v3207_v30 = vpop.permute.xlu0 %3206  ;;  %v3133_v1 = vand.u32 2147483647, %v3117_v62  ;;  %v3119_v15 = vsub.f32 %v7118_v38, %v7219_v3 }
 0x284   : >> { %v3166_v34 = vmul.f32 %v7282_v41, %v3146_v50  ;;  %v3289_v4 = vsub.f32 %v3212_v13, %v7296_v58  ;;  %3903 = vperm.xlu1 %4762, %v4557_v11   ;;  %v3165_v55 = vmul.f32 %v7282_v41, %v3145_v14  ;;  %v3288_v25 = vsub.f32 %v3207_v30, %v7296_v58 }
 0x285   : >> { %3898 = vperm.xlu0 %4761, %v4556_v9   ;;  %v3122_v31 = vsub.f32 %v7145_v61, %v7219_v3  ;;  %v3121_v8 = vsub.f32 %v7157_v28, %v7219_v3  ;;  %v3168_v29 = vadd.f32 %v3152_v27, %v7242_v56  ;;  %v3167_v12 = vadd.f32 %v3151_v63, %v7245_v2  ;;  %v4560_v27 = vld [vmem:[%s5569_s11 + $0x7a0] sm:$0xff] }
 0x286   : >> { %v7327_v35 = vadd.f32 %v3166_v34, %v3009_v42  ;;  %v3305_v38 = vand.u32 2147483647, %v3289_v4  ;;  %v7332_v17 = vadd.f32 %v3165_v55, %v3008_v32  ;;  %v3304_v60 = vand.u32 2147483647, %v3288_v25  ;;  %v4561_v32 = vld [vmem:[%s5569_s11 + $0x7a8] sm:$0xff] }
 0x287   : >> { %v3222_v62 = vpop.permute.xlu1 %3221  ;;  %v3154_v16 = vmul.f32 %v7282_v41, %v3134_v51  ;;  %v3136_v61 = vand.u32 2147483647, %v3120_v0  ;;  %v3217_v42 = vpop.permute.xlu0 %3216  ;;  %v3153_v50 = vmul.f32 %v7282_v41, %v3133_v1  ;;  %v3135_v56 = vand.u32 2147483647, %v3119_v15 }
 0x288   : >> { %v3325_v11 = vmul.f32 %v7319_v45, %v3305_v38  ;;  %v3291_v28 = vsub.f32 %v3222_v62, %v7296_v58  ;;  %3913 = vperm.xlu1 %4762, %v4559_v53   ;;  %v3324_v9 = vmul.f32 %v7319_v45, %v3304_v60  ;;  %v3290_v2 = vsub.f32 %v3217_v42, %v7296_v58  ;;  %v4562_v62 = vld [vmem:[%s5569_s11 + $0x7b0] sm:$0xff] }
 0x289   : >> { %3908 = vperm.xlu0 %4761, %v4558_v40   ;;  %v3138_v63 = vand.u32 2147483647, %v3122_v31  ;;  %v3137_v14 = vand.u32 2147483647, %v3121_v8  ;;  %v3124_v0 = vsub.f32 %v7188_v6, %v7219_v3  ;;  %v3123_v34 = vsub.f32 %v7194_v20, %v7219_v3  ;;  %v4563_v40 = vld [vmem:[%s5569_s11 + $0x7b8] sm:$0xff] }
 0x28a   : >> { %v7342_v13 = vadd.f32 %v3325_v11, %v3168_v29  ;;  %v3307_v51 = vand.u32 2147483647, %v3291_v28  ;;  %v7348_v4 = vadd.f32 %v3324_v9, %v3167_v12  ;;  %v3306_v30 = vand.u32 2147483647, %v3290_v2 }
 0x28b   : >> { %v3232_v1 = vpop.permute.xlu1 %3231  ;;  %v3170_v15 = vadd.f32 %v3154_v16, %v7252_v7  ;;  %v3156_v55 = vmul.f32 %v7282_v41, %v3136_v61  ;;  %v3227_v31 = vpop.permute.xlu0 %3226  ;;  %v3169_v6 = vadd.f32 %v3153_v50, %v7255_v52  ;;  %v3155_v8 = vmul.f32 %v7282_v41, %v3135_v56 }
 0x28c   : >> { %v3327_v25 = vmul.f32 %v7319_v45, %v3307_v51  ;;  %v3293_v53 = vsub.f32 %v3232_v1, %v7296_v58  ;;  %3923 = vperm.xlu1 %4762, %v4561_v32   ;;  %v3326_v20 = vmul.f32 %v7319_v45, %v3306_v30  ;;  %v3292_v38 = vsub.f32 %v3227_v31, %v7296_v58  ;;  %v4564_v30 = vld [vmem:[%s5569_s11 + $0x7c0] sm:$0xff] }
 0x28d   : >> { %3918 = vperm.xlu0 %4761, %v4560_v27   ;;  %v3158_v7 = vmul.f32 %v7282_v41, %v3138_v63  ;;  %v3157_v29 = vmul.f32 %v7282_v41, %v3137_v14  ;;  %v3140_v16 = vand.u32 2147483647, %v3124_v0  ;;  %v3139_v61 = vand.u32 2147483647, %v3123_v34 }
 0x28e   : >> { %v7361_v12 = vadd.f32 %v3327_v25, %v3170_v15  ;;  %v3309_v60 = vand.u32 2147483647, %v3293_v53  ;;  %v7364_v52 = vadd.f32 %v3326_v20, %v3169_v6  ;;  %v3308_v11 = vand.u32 2147483647, %v3292_v38 }
 0x28f   : >> { %v3242_v28 = vpop.permute.xlu1 %3241  ;;  %v3172_v42 = vadd.f32 %v3156_v55, %v7258_v57  ;;  %v3126_v50 = vsub.f32 %v7214_v26, %v7219_v3  ;;  %v3237_v2 = vpop.permute.xlu0 %3236  ;;  %v3171_v32 = vadd.f32 %v3155_v8, %v7262_v49  ;;  %v3125_v27 = vsub.f32 %v7221_v23, %v7219_v3  ;;  %v4565_v57 = vld [vmem:[%s5569_s11 + $0x7c8] sm:$0xff] }
 0x290   : >> { %v3329_v56 = vmul.f32 %v7319_v45, %v3309_v60  ;;  %v3295_v9 = vsub.f32 %v3242_v28, %v7296_v58  ;;  %3933 = vperm.xlu1 %4762, %v4563_v40   ;;  %v3328_v63 = vmul.f32 %v7319_v45, %v3308_v11  ;;  %v3294_v14 = vsub.f32 %v3237_v2, %v7296_v58  ;;  %v4567_v40 = vld [vmem:[%s5569_s11 + $0x7d8] sm:$0xff] }
 0x291   : >> { %3928 = vperm.xlu0 %4761, %v4562_v62   ;;  %v3174_v51 = vadd.f32 %v3158_v7, %v7265_v36  ;;  %v3173_v26 = vadd.f32 %v3157_v29, %v7270_v24  ;;  %v3160_v1 = vmul.f32 %v7282_v41, %v3140_v16  ;;  %v3159_v49 = vmul.f32 %v7282_v41, %v3139_v61  ;;  %v4566_v7 = vld [vmem:[%s5569_s11 + $0x7d0] sm:$0xff] }
 0x292   : >> { %v7379_v0 = vadd.f32 %v3329_v56, %v3172_v42  ;;  %v3311_v34 = vand.u32 2147483647, %v3295_v9  ;;  %v7384_v23 = vadd.f32 %v3328_v63, %v3171_v32  ;;  %v3310_v15 = vand.u32 2147483647, %v3294_v14 }
 0x293   : >> { %v3252_v55 = vpop.permute.xlu1 %3251  ;;  %v3142_v25 = vand.u32 2147483647, %v3126_v50  ;;  %v3128_v36 = vsub.f32 %v7239_v43, %v7219_v3  ;;  %v3247_v31 = vpop.permute.xlu0 %3246  ;;  %v3141_v6 = vand.u32 2147483647, %v3125_v27  ;;  %v3127_v8 = vsub.f32 %v7249_v44, %v7219_v3  ;;  %v4569_v50 = vld [vmem:[%s5569_s11 + $0x7e8] sm:$0xff]  ;;  %v4568_v27 = vld [vmem:[%s5569_s11 + $0x7e0] sm:$0xff] }
 0x294   : >> { %v3331_v24 = vmul.f32 %v7319_v45, %v3311_v34  ;;  %v3297_v53 = vsub.f32 %v3252_v55, %v7296_v58  ;;  %3943 = vperm.xlu1 %4762, %v4565_v57   ;;  %v3330_v20 = vmul.f32 %v7319_v45, %v3310_v15  ;;  %v3296_v38 = vsub.f32 %v3247_v31, %v7296_v58  ;;  %v4571_v15 = vld [vmem:[%s5569_s11 + $0x7f8] sm:$0xff] }
 0x295   : >> { %3938 = vperm.xlu0 %4761, %v4564_v30   ;;  %v2971_v43 = vand.u32 2147483647, %v2955_v22  ;;  %v2970_v29 = vand.u32 2147483647, %v2954_v19  ;;  %v3176_v3 = vadd.f32 %v3160_v1, %v7274_v54  ;;  %v3175_v44 = vadd.f32 %v3159_v49, %v7277_v37 }
 0x296   : >> { %v7402_v60 = vadd.f32 %v3331_v24, %v3174_v51  ;;  %v3313_v62 = vand.u32 2147483647, %v3297_v53  ;;  %v7406_v16 = vadd.f32 %v3330_v20, %v3173_v26  ;;  %v3312_v61 = vand.u32 2147483647, %v3296_v38  ;;  %v4570_v24 = vld [vmem:[%s5569_s11 + $0x7f0] sm:$0xff]  ;;  %s4582_s11 = sshll.u32 (%p7789_p13), %s4262_s19, 11 }
 0x297   : >> { %v3262_v11 = vpop.permute.xlu1 %3261  ;;  %v3162_v28 = vmul.f32 %v7282_v41, %v3142_v25  ;;  %v3144_v10 = vand.u32 2147483647, %v3128_v36  ;;  %v3257_v33 = vpop.permute.xlu0 %3256  ;;  %v3161_v19 = vmul.f32 %v7282_v41, %v3141_v6  ;;  %v3143_v54 = vand.u32 2147483647, %v3127_v8  ;;  %s7870_s27 = scalar_lea.hbm (%p7789_p13), %s7921_s4, %s4582_s11  ;;  %s4769_s19 = scalar_lea.vmem (%p7789_p13), %s4768_s6, 4096 }
 0x298   : >> { %v3333_v22 = vmul.f32 %v7319_v45, %v3313_v62  ;;  %v3299_v21 = vsub.f32 %v3262_v11, %v7296_v58  ;;  %3953 = vperm.xlu1 %4762, %v4567_v40   ;;  %v3332_v42 = vmul.f32 %v7319_v45, %v3312_v61  ;;  %v3298_v37 = vsub.f32 %v3257_v33, %v7296_v58  ;;  %p4771_p4 = scmp.lt.s32.totalorder (%p7789_p13), %s4769_s19, %s4763_s30 }
 0x299   : >> { %3948 = vperm.xlu0 %4761, %v4566_v7   ;;  %v3005_v56 = vadd.f32 %v7288_v46, %v7168_v59  ;;  %v2991_v9 = vmul.f32 %v7184_v18, %v2971_v43  ;;  %v3004_v63 = vadd.f32 %v7300_v48, %v7177_v5  ;;  %v2990_v14 = vmul.f32 %v7184_v18, %v2970_v29  ;;  %v7445_v29 = vld [vmem:[%s6002_s23 + $0xc] ss:$0 sm:$0xff] }
 0x29a   : >> { %v7418_v2 = vadd.f32 %v3333_v22, %v3176_v3  ;;  %v3315_v32 = vand.u32 2147483647, %v3299_v21  ;;  %v7424_v57 = vadd.f32 %v3332_v42, %v3175_v44  ;;  %v3314_v51 = vand.u32 2147483647, %v3298_v37  ;;  %p4772_p5 = por (%p7789_p13), %p4771_p4, %p4770_p3 }
 0x29b   : >> { %v3272_v26 = vpop.permute.xlu1 %3271  ;;  %v3178_v34 = vadd.f32 %v3162_v28, %v3005_v56  ;;  %v3164_v59 = vmul.f32 %v7282_v41, %v3144_v10  ;;  %v3267_v1 = vpop.permute.xlu0 %3266  ;;  %v3177_v49 = vadd.f32 %v3161_v19, %v3004_v63  ;;  %v3163_v5 = vmul.f32 %v7282_v41, %v3143_v54 }
 0x29c   : >> { %v3335_v46 = vmul.f32 %v7319_v45, %v3315_v32  ;;  %v3301_v30 = vsub.f32 %v3272_v26, %v7296_v58  ;;  %3963 = vperm.xlu1 %4762, %v4569_v50   ;;  %v3334_v48 = vmul.f32 %v7319_v45, %v3314_v51  ;;  %v3300_v18 = vsub.f32 %v3267_v1, %v7296_v58  ;;  %p4773_p7 = pnand (%p7789_p13), %p4772_p5, %p4766_p2 }
 0x29d   : >> { %3958 = vperm.xlu0 %4761, %v4568_v27   ;;  %v3007_v55 = vadd.f32 %v2991_v9, %v7198_v47  ;;  %v3006_v53 = vadd.f32 %v2990_v14, %v7201_v39 }
 0x29e   : >> { %v7434_v25 = vadd.f32 %v3335_v46, %v3178_v34  ;;  %v3317_v36 = vand.u32 2147483647, %v3301_v30  ;;  %v7438_v31 = vadd.f32 %v3334_v48, %v3177_v49  ;;  %v3316_v6 = vand.u32 2147483647, %v3300_v18 }
 0x29f   : >> { %v3282_v8 = vpop.permute.xlu1 %3281  ;;  %v3180_v41 = vadd.f32 %v3164_v59, %v3007_v55  ;;  %v3277_v40 = vpop.permute.xlu0 %3276  ;;  %v3179_v7 = vadd.f32 %v3163_v5, %v3006_v53 }
 0x2a0   : >> { %v3337_v20 = vmul.f32 %v7319_v45, %v3317_v36  ;;  %v3303_v38 = vsub.f32 %v3282_v8, %v7296_v58  ;;  %3973 = vperm.xlu1 %4762, %v4571_v15   ;;  %v3336_v47 = vmul.f32 %v7319_v45, %v3316_v6  ;;  %v3302_v43 = vsub.f32 %v3277_v40, %v7296_v58  ;;  %v7457_v58 = vld [vmem:[%s7919_s2 + $0xc] ss:$0 sm:$0xff] }
 0x2a1   : >> { %3968 = vperm.xlu0 %4761, %v4570_v24  }
 0x2a2   : >> { %v7447_v39 = vadd.f32 %v3337_v20, %v3180_v41  ;;  %v3319_v62 = vand.u32 2147483647, %v3303_v38  ;;  %v7449_v3 = vadd.f32 %v3336_v47, %v3179_v7  ;;  %v3318_v44 = vand.u32 2147483647, %v3302_v43 }
 0x2a3   : >> { %v3385_v61 = vpop.permute.xlu1 %3384  ;;  %v3380_v10 = vpop.permute.xlu0 %3379 }
 0x2a4   : >> { %v3339_v11 = vmul.f32 %v7319_v45, %v3319_v62  ;;  %v3462_v28 = vsub.f32 %v3385_v61, %v7445_v29  ;;  %v3338_v22 = vmul.f32 %v7319_v45, %v3318_v44  ;;  %v3461_v21 = vsub.f32 %v3380_v10, %v7445_v29 }
 0x2a6   : >> { %v7461_v33 = vadd.f32 %v3339_v11, %v7327_v35  ;;  %v3478_v19 = vand.u32 2147483647, %v3462_v28  ;;  %v7464_v54 = vadd.f32 %v3338_v22, %v7332_v17  ;;  %v3477_v42 = vand.u32 2147483647, %v3461_v21 }
 0x2a7   : >> { %v3395_v37 = vpop.permute.xlu1 %3394  ;;  %v3390_v56 = vpop.permute.xlu0 %3389 }
 0x2a8   : >> { %v3498_v50 = vmul.f32 %v7457_v58, %v3478_v19  ;;  %v3464_v45 = vsub.f32 %v3395_v37, %v7445_v29  ;;  %v3497_v9 = vmul.f32 %v7457_v58, %v3477_v42  ;;  %v3463_v32 = vsub.f32 %v3390_v56, %v7445_v29 }
 0x2aa   : >> { %v7471_v27 = vadd.f32 %v3498_v50, %v7342_v13  ;;  %v3480_v35 = vand.u32 2147483647, %v3464_v45  ;;  %v7474_v63 = vadd.f32 %v3497_v9, %v7348_v4  ;;  %v3479_v17 = vand.u32 2147483647, %v3463_v32 }
 0x2ab   : >> { %v3405_v14 = vpop.permute.xlu1 %3404  ;;  %v3400_v34 = vpop.permute.xlu0 %3399 }
 0x2ac   : >> { %v3500_v51 = vmul.f32 %v7457_v58, %v3480_v35  ;;  %v3466_v26 = vsub.f32 %v3405_v14, %v7445_v29  ;;  %v3499_v59 = vmul.f32 %v7457_v58, %v3479_v17  ;;  %v3465_v46 = vsub.f32 %v3400_v34, %v7445_v29 }
 0x2ae   : >> { %v7481_v30 = vadd.f32 %v3500_v51, %v7361_v12  ;;  %v3482_v13 = vand.u32 2147483647, %v3466_v26  ;;  %v7484_v1 = vadd.f32 %v3499_v59, %v7364_v52  ;;  %v3481_v4 = vand.u32 2147483647, %v3465_v46  ;;  %v7531_v26 = vld [vmem:[%s6002_s23 + $0xd] ss:$0 sm:$0xff] }
 0x2af   : >> { %v3415_v49 = vpop.permute.xlu1 %3414  ;;  %v3410_v18 = vpop.permute.xlu0 %3409 }
 0x2b0   : >> { %v3502_v5 = vmul.f32 %v7457_v58, %v3482_v13  ;;  %v3468_v48 = vsub.f32 %v3415_v49, %v7445_v29  ;;  %v3501_v15 = vmul.f32 %v7457_v58, %v3481_v4  ;;  %v3467_v55 = vsub.f32 %v3410_v18, %v7445_v29 }
 0x2b2   : >> { %v7491_v36 = vadd.f32 %v3502_v5, %v7379_v0  ;;  %v3484_v12 = vand.u32 2147483647, %v3468_v48  ;;  %v7494_v24 = vadd.f32 %v3501_v15, %v7384_v23  ;;  %v3483_v52 = vand.u32 2147483647, %v3467_v55 }
 0x2b3   : >> { %v3425_v53 = vpop.permute.xlu1 %3424  ;;  %v3420_v41 = vpop.permute.xlu0 %3419 }
 0x2b4   : >> { %v3504_v6 = vmul.f32 %v7457_v58, %v3484_v12  ;;  %v3470_v8 = vsub.f32 %v3425_v53, %v7445_v29  ;;  %v3503_v20 = vmul.f32 %v7457_v58, %v3483_v52  ;;  %v3469_v38 = vsub.f32 %v3420_v41, %v7445_v29 }
 0x2b6   : >> { %v7501_v40 = vadd.f32 %v3504_v6, %v7402_v60  ;;  %v3486_v0 = vand.u32 2147483647, %v3470_v8  ;;  %v7504_v7 = vadd.f32 %v3503_v20, %v7406_v16  ;;  %v3485_v23 = vand.u32 2147483647, %v3469_v38 }
 0x2b7   : >> { %v3435_v47 = vpop.permute.xlu1 %3434  ;;  %v3430_v44 = vpop.permute.xlu0 %3429 }
 0x2b8   : >> { %v3506_v43 = vmul.f32 %v7457_v58, %v3486_v0  ;;  %v3472_v62 = vsub.f32 %v3435_v47, %v7445_v29  ;;  %v3505_v61 = vmul.f32 %v7457_v58, %v3485_v23  ;;  %v3471_v11 = vsub.f32 %v3430_v44, %v7445_v29 }
 0x2ba   : >> { %v7511_v28 = vadd.f32 %v3506_v43, %v7418_v2  ;;  %v3488_v60 = vand.u32 2147483647, %v3472_v62  ;;  %v7514_v10 = vadd.f32 %v3505_v61, %v7424_v57  ;;  %v3487_v16 = vand.u32 2147483647, %v3471_v11 }
 0x2bb   : >> { %v3445_v22 = vpop.permute.xlu1 %3444  ;;  %v3440_v42 = vpop.permute.xlu0 %3439 }
 0x2bc   : >> { %v3508_v21 = vmul.f32 %v7457_v58, %v3488_v60  ;;  %v3474_v19 = vsub.f32 %v3445_v22, %v7445_v29  ;;  %v3507_v37 = vmul.f32 %v7457_v58, %v3487_v16  ;;  %v3473_v50 = vsub.f32 %v3440_v42, %v7445_v29 }
 0x2be   : >> { %v7521_v45 = vadd.f32 %v3508_v21, %v7434_v25  ;;  %v3490_v2 = vand.u32 2147483647, %v3474_v19  ;;  %v7524_v56 = vadd.f32 %v3507_v37, %v7438_v31  ;;  %v3489_v57 = vand.u32 2147483647, %v3473_v50 }
 0x2bf   : >> { %v3455_v9 = vpop.permute.xlu1 %3454 }
 0x2c0   : >> { %v3510_v32 = vmul.f32 %v7457_v58, %v3490_v2  ;;  %v3476_v35 = vsub.f32 %v3455_v9, %v7445_v29  ;;  %v3450_v17 = vpop.permute.xlu0 %3449  ;;  %v3509_v14 = vmul.f32 %v7457_v58, %v3489_v57 }
 0x2c1   : >> { %v3475_v51 = vsub.f32 %v3450_v17, %v7445_v29  ;;  %v7545_v29 = vld [vmem:[%s7919_s2 + $0xd] ss:$0 sm:$0xff] }
 0x2c2   : >> { %v7534_v25 = vadd.f32 %v3510_v32, %v7447_v39  ;;  %v3492_v34 = vand.u32 2147483647, %v3476_v35  ;;  %v7537_v31 = vadd.f32 %v3509_v14, %v7449_v3 }
 0x2c3   : >> { %v3491_v59 = vand.u32 2147483647, %v3475_v51  ;;  %v3558_v46 = vpop.permute.xlu1 %3557 }
 0x2c4   : >> { %v3512_v13 = vmul.f32 %v7457_v58, %v3492_v34  ;;  %v3635_v4 = vsub.f32 %v3558_v46, %v7531_v26  ;;  %v3553_v49 = vpop.permute.xlu0 %3552 }
 0x2c5   : >> { %v3511_v5 = vmul.f32 %v7457_v58, %v3491_v59  ;;  %v3634_v39 = vsub.f32 %v3553_v49, %v7531_v26 }
 0x2c6   : >> { %v7549_v48 = vadd.f32 %v3512_v13, %v7461_v33  ;;  %v3651_v3 = vand.u32 2147483647, %v3635_v4 }
 0x2c7   : >> { %v7552_v18 = vadd.f32 %v3511_v5, %v7464_v54  ;;  %v3650_v15 = vand.u32 2147483647, %v3634_v39  ;;  %v3568_v55 = vpop.permute.xlu1 %3567 }
 0x2c8   : >> { %v3671_v12 = vmul.f32 %v7545_v29, %v3651_v3  ;;  %v3637_v58 = vsub.f32 %v3568_v55, %v7531_v26  ;;  %v3563_v52 = vpop.permute.xlu0 %3562 }
 0x2c9   : >> { %v3670_v53 = vmul.f32 %v7545_v29, %v3650_v15  ;;  %v3636_v6 = vsub.f32 %v3563_v52, %v7531_v26 }
 0x2ca   : >> { %v7559_v8 = vadd.f32 %v3671_v12, %v7471_v27  ;;  %v3653_v33 = vand.u32 2147483647, %v3637_v58 }
 0x2cb   : >> { %v7562_v41 = vadd.f32 %v3670_v53, %v7474_v63  ;;  %v3652_v54 = vand.u32 2147483647, %v3636_v6  ;;  %v3578_v20 = vpop.permute.xlu1 %3577 }
 0x2cc   : >> { %v3673_v38 = vmul.f32 %v7545_v29, %v3653_v33  ;;  %v3639_v0 = vsub.f32 %v3578_v20, %v7531_v26  ;;  %v3573_v23 = vpop.permute.xlu0 %3572 }
 0x2cd   : >> { %v3672_v47 = vmul.f32 %v7545_v29, %v3652_v54  ;;  %v3638_v43 = vsub.f32 %v3573_v23, %v7531_v26 }
 0x2ce   : >> { %v7569_v62 = vadd.f32 %v3673_v38, %v7481_v30  ;;  %v3655_v27 = vand.u32 2147483647, %v3639_v0 }
 0x2cf   : >> { %v7572_v44 = vadd.f32 %v3672_v47, %v7484_v1  ;;  %v3654_v63 = vand.u32 2147483647, %v3638_v43  ;;  %v3588_v61 = vpop.permute.xlu1 %3587 }
 0x2d0   : >> { %v3675_v11 = vmul.f32 %v7545_v29, %v3655_v27  ;;  %v3641_v60 = vsub.f32 %v3588_v61, %v7531_v26  ;;  %v3583_v16 = vpop.permute.xlu0 %3582 }
 0x2d1   : >> { %v3674_v22 = vmul.f32 %v7545_v29, %v3654_v63  ;;  %v3640_v21 = vsub.f32 %v3583_v16, %v7531_v26 }
 0x2d2   : >> { %v7579_v19 = vadd.f32 %v3675_v11, %v7491_v36  ;;  %v3657_v30 = vand.u32 2147483647, %v3641_v60  ;;  %v7627_v60 = vld [vmem:[%s6002_s23 + $0xe] ss:$0 sm:$0xff] }
 0x2d3   : >> { %v7582_v42 = vadd.f32 %v3674_v22, %v7494_v24  ;;  %v3656_v1 = vand.u32 2147483647, %v3640_v21  ;;  %v3598_v37 = vpop.permute.xlu1 %3597 }
 0x2d4   : >> { %v3677_v50 = vmul.f32 %v7545_v29, %v3657_v30  ;;  %v3643_v2 = vsub.f32 %v3598_v37, %v7531_v26  ;;  %v3593_v57 = vpop.permute.xlu0 %3592 }
 0x2d5   : >> { %v3676_v9 = vmul.f32 %v7545_v29, %v3656_v1  ;;  %v3642_v32 = vsub.f32 %v3593_v57, %v7531_v26 }
 0x2d6   : >> { %v7589_v35 = vadd.f32 %v3677_v50, %v7501_v40  ;;  %v3659_v36 = vand.u32 2147483647, %v3643_v2 }
 0x2d7   : >> { %v7592_v17 = vadd.f32 %v3676_v9, %v7504_v7  ;;  %v3658_v24 = vand.u32 2147483647, %v3642_v32  ;;  %v3608_v14 = vpop.permute.xlu1 %3607  ;;  %v7646_v9 = vld [vmem:[%s7919_s2 + $0xe] ss:$0 sm:$0xff] }
 0x2d8   : >> { %v3679_v51 = vmul.f32 %v7545_v29, %v3659_v36  ;;  %v3645_v34 = vsub.f32 %v3608_v14, %v7531_v26  ;;  %v3603_v59 = vpop.permute.xlu0 %3602 }
 0x2d9   : >> { %v3678_v46 = vmul.f32 %v7545_v29, %v3658_v24  ;;  %v3644_v13 = vsub.f32 %v3603_v59, %v7531_v26 }
 0x2da   : >> { %v7599_v4 = vadd.f32 %v3679_v51, %v7511_v28  ;;  %v3661_v40 = vand.u32 2147483647, %v3645_v34 }
 0x2db   : >> { %v7602_v49 = vadd.f32 %v3678_v46, %v7514_v10  ;;  %v3660_v7 = vand.u32 2147483647, %v3644_v13  ;;  %v3618_v5 = vpop.permute.xlu1 %3617  ;;  %v7655_v46 = vld [vmem:[%s6002_s23 + $0xf] ss:$0 sm:$0xff] }
 0x2dc   : >> { %v3681_v39 = vmul.f32 %v7545_v29, %v3661_v40  ;;  %v3647_v3 = vsub.f32 %v3618_v5, %v7531_v26  ;;  %v3613_v15 = vpop.permute.xlu0 %3612 }
 0x2dd   : >> { %v3680_v55 = vmul.f32 %v7545_v29, %v3660_v7  ;;  %v3646_v12 = vsub.f32 %v3613_v15, %v7531_v26 }
 0x2de   : >> { %v7609_v58 = vadd.f32 %v3681_v39, %v7521_v45  ;;  %v3663_v28 = vand.u32 2147483647, %v3647_v3 }
 0x2df   : >> { %v7612_v52 = vadd.f32 %v3680_v55, %v7524_v56  ;;  %v3662_v10 = vand.u32 2147483647, %v3646_v12  ;;  %v3628_v53 = vpop.permute.xlu1 %3627 }
 0x2e0   : >> { %v3683_v6 = vmul.f32 %v7545_v29, %v3663_v28  ;;  %v3623_v33 = vpop.permute.xlu0 %3622  ;;  %v3649_v51 = vsub.f32 %v3628_v53, %v7531_v26 }
 0x2e1   : >> { %v3682_v54 = vmul.f32 %v7545_v29, %v3662_v10  ;;  %v3648_v34 = vsub.f32 %v3623_v33, %v7531_v26 }
 0x2e2   : >> { %v7617_v20 = vadd.f32 %v3683_v6, %v7534_v25  ;;  %v7663_v26 = vand.u32 2147483647, %v3649_v51  ;;  %v7671_v6 = vld [vmem:[%s7919_s2 + $0xf] ss:$0 sm:$0xff] }
 0x2e3   : >> { %v7620_v38 = vadd.f32 %v3682_v54, %v7537_v31  ;;  %v3731_v45 = vpop.permute.xlu1 %3730  ;;  %v7665_v10 = vand.u32 2147483647, %v3648_v34 }
 0x2e4   : >> { %v3726_v0 = vpop.permute.xlu0 %3725  ;;  %v3808_v31 = vsub.f32 %v3731_v45, %v7627_v60 }
 0x2e5   : >> { %v3807_v22 = vsub.f32 %v3726_v0, %v7627_v60 }
 0x2e6   : >> { %v3824_v50 = vand.u32 2147483647, %v3808_v31 }
 0x2e7   : >> { %v3741_v23 = vpop.permute.xlu1 %3740  ;;  %v3823_v32 = vand.u32 2147483647, %v3807_v22 }
 0x2e8   : >> { %v3736_v47 = vpop.permute.xlu0 %3735  ;;  %v3810_v30 = vsub.f32 %v3741_v23, %v7627_v60  ;;  %v3844_v13 = vmul.f32 %v7646_v9, %v3824_v50 }
 0x2e9   : >> { %v3809_v37 = vsub.f32 %v3736_v47, %v7627_v60  ;;  %v3843_v5 = vmul.f32 %v7646_v9, %v3823_v32 }
 0x2ea   : >> { %v3826_v24 = vand.u32 2147483647, %v3810_v30  ;;  %v3860_v54 = vadd.f32 %v3844_v13, %v7559_v8 }
 0x2eb   : >> { %v3751_v56 = vpop.permute.xlu1 %3750  ;;  %v3825_v59 = vand.u32 2147483647, %v3809_v37  ;;  %v3859_v47 = vadd.f32 %v3843_v5, %v7562_v41 }
 0x2ec   : >> { %v3746_v43 = vpop.permute.xlu0 %3745  ;;  %v3812_v2 = vsub.f32 %v3751_v56, %v7627_v60  ;;  %v3846_v55 = vmul.f32 %v7646_v9, %v3826_v24 }
 0x2ed   : >> { %v3811_v57 = vsub.f32 %v3746_v43, %v7627_v60  ;;  %v3845_v53 = vmul.f32 %v7646_v9, %v3825_v59 }
 0x2ee   : >> { %v3828_v40 = vand.u32 2147483647, %v3812_v2  ;;  %v3862_v31 = vadd.f32 %v3846_v55, %v7569_v62 }
 0x2ef   : >> { %v3761_v27 = vpop.permute.xlu1 %3760  ;;  %v3827_v7 = vand.u32 2147483647, %v3811_v57  ;;  %v3861_v50 = vadd.f32 %v3845_v53, %v7572_v44 }
 0x2f0   : >> { %v3756_v63 = vpop.permute.xlu0 %3755  ;;  %v3814_v39 = vsub.f32 %v3761_v27, %v7627_v60  ;;  %v3848_v45 = vmul.f32 %v7646_v9, %v3828_v40 }
 0x2f1   : >> { %v3813_v3 = vsub.f32 %v3756_v63, %v7627_v60  ;;  %v3847_v0 = vmul.f32 %v7646_v9, %v3827_v7  ;;  %v8096_v7 = vld [vmem:[#allocation20_spill] sm:$0xff] }
 0x2f2   : >> { %v3830_v56 = vand.u32 2147483647, %v3814_v39  ;;  %v3864_v32 = vadd.f32 %v3848_v45, %v7579_v19 }
 0x2f3   : >> { %v7622_v61 = vpop.permute.xlu1 %3770  ;;  %v3829_v43 = vand.u32 2147483647, %v3813_v3  ;;  %v3863_v62 = vadd.f32 %v3847_v0, %v7582_v42  ;;  %v8098_v42 = vld [vmem:[#allocation21_spill] sm:$0xff] }
 0x2f4   : >> { %v7624_v11 = vpop.permute.xlu0 %3765  ;;  %v3816_v22 = vsub.f32 %v7622_v61, %v7627_v60  ;;  %v3850_v51 = vmul.f32 %v7646_v9, %v3830_v56 }
 0x2f5   : >> { %v3815_v2 = vsub.f32 %v7624_v11, %v7627_v60  ;;  %v3849_v34 = vmul.f32 %v7646_v9, %v3829_v43 }
 0x2f6   : >> { %v3832_v40 = vand.u32 2147483647, %v3816_v22  ;;  %v3866_v0 = vadd.f32 %v3850_v51, %v7589_v35 }
 0x2f7   : >> { %v7629_v16 = vpop.permute.xlu1 %3780 }
 0x2f8   : >> { %v7631_v25 = vpop.permute.xlu0 %3775  ;;  %v3818_v53 = vsub.f32 %v7629_v16, %v7627_v60 }
 0x2fb   : >> { %v7635_v21 = vpop.permute.xlu1 %3790 }
 0x2fc   : >> { %v7638_v1 = vpop.permute.xlu0 %3785 }
 0x2ff   : >> { %v7648_v36 = vpop.permute.xlu1 %3800 }
 0x300   : >> { %v7650_v14 = vpop.permute.xlu0 %3795 }
 0x303   : >> { %v3904_v15 = vpop.permute.xlu1 %3903 }
 0x304   : >> { %v3981_v12 = vsub.f32 %v3904_v15, %v7655_v46  ;;  %v3899_v28 = vpop.permute.xlu0 %3898  ;;  %v3831_v15 = vand.u32 2147483647, %v3815_v2 }
 0x305   : >> { %v3980_v33 = vsub.f32 %v3899_v28, %v7655_v46 }
 0x306   : >> { %v3997_v23 = vand.u32 2147483647, %v3981_v12 }
 0x307   : >> { %v3996_v27 = vand.u32 2147483647, %v3980_v33  ;;  %v3914_v63 = vpop.permute.xlu1 %3913  ;;  %v3817_v33 = vsub.f32 %v7631_v25, %v7627_v60  ;;  %v3851_v25 = vmul.f32 %v7646_v9, %v3831_v15 }
 0x308   : >> { %v4017_v30 = vmul.f32 %v7671_v6, %v3997_v23  ;;  %v3983_v8 = vsub.f32 %v3914_v63, %v7655_v46  ;;  %v3909_v37 = vpop.permute.xlu0 %3908  ;;  %v3865_v23 = vadd.f32 %v3849_v34, %v7592_v17  ;;  %v8099_v63 = vld [vmem:[#allocation18_spill] sm:$0xff] }
 0x309   : >> { %v4016_v41 = vmul.f32 %v7671_v6, %v3996_v27  ;;  %v3982_v57 = vsub.f32 %v3909_v37, %v7655_v46  ;;  %v3852_v27 = vmul.f32 %v7646_v9, %v3832_v40  ;;  %v3833_v2 = vand.u32 2147483647, %v3817_v33 }
 0x30a   : >> { %v4033_v24 = vadd.f32 %v4017_v30, %v3860_v54  ;;  %v3999_v61 = vand.u32 2147483647, %v3983_v8 }
 0x30b   : >> { %v4032_v59 = vadd.f32 %v4016_v41, %v3859_v47  ;;  %v3998_v13 = vand.u32 2147483647, %v3982_v57  ;;  %v3924_v44 = vpop.permute.xlu1 %3923 }
 0x30c   : >> { %v7693_v11 = vmin.f32 %v8096_v7, %v4033_v24   ;;  %v4019_v5 = vmul.f32 %v7671_v6, %v3999_v61  ;;  %v3985_v3 = vsub.f32 %v3924_v44, %v7655_v46  ;;  %v3919_v19 = vpop.permute.xlu0 %3918  ;;  %v3820_v24 = vsub.f32 %v7635_v21, %v7627_v60 }
 0x30d   : >> { %v7698_v55 = vmin.f32 %v8098_v42, %v4032_v59   ;;  %v4018_v12 = vmul.f32 %v7671_v6, %v3998_v13  ;;  %v3984_v28 = vsub.f32 %v3919_v19, %v7655_v46  ;;  %v3819_v61 = vsub.f32 %v7638_v1, %v7627_v60 }
 0x30e   : >> { %v8097_v39 = vmov %v7693_v11  ;;  %v4035_v54 = vadd.f32 %v4019_v5, %v3862_v31  ;;  %v4001_v45 = vand.u32 2147483647, %v3985_v3  ;;  %v8101_v31 = vld [vmem:[#allocation19_spill] sm:$0xff]  ;;  %v3868_v44 = vadd.f32 %v3852_v27, %v7599_v4  ;;  %v8104_v3 = vld [vmem:[#allocation17_spill] sm:$0xff] }
 0x30f   : >> { %v4034_v47 = vadd.f32 %v4018_v12, %v3861_v50  ;;  %v4000_v56 = vand.u32 2147483647, %v3984_v28  ;;  %v3934_v43 = vpop.permute.xlu1 %3933  ;;  %v3834_v50 = vand.u32 2147483647, %v3818_v53  ;;  %v3867_v5 = vadd.f32 %v3851_v25, %v7602_v49  ;;  %4064 = vst [vmem:[%s5571_s12] sm:$0xff] (%p7789_p13), %v7698_v55  ;;  %4065 = vst [vmem:[%s5571_s12 + $0x8] sm:$0xff] (%p7789_p13), %v8097_v39 }
 0x310   : >> { %v7710_v12 = vmin.f32 %v8099_v63, %v4035_v54   ;;  %v4021_v30 = vmul.f32 %v7671_v6, %v4001_v45  ;;  %v3987_v16 = vsub.f32 %v3934_v43, %v7655_v46  ;;  %v3929_v8 = vpop.permute.xlu0 %3928  ;;  %v3853_v4 = vmul.f32 %v7646_v9, %v3833_v2  ;;  %v8105_v45 = vld [vmem:[#allocation14_spill] sm:$0xff]  ;;  %v8107_v63 = vld [vmem:[#allocation15_spill] sm:$0xff] }
 0x311   : >> { %v7716_v13 = vmin.f32 %v8101_v31, %v4034_v47   ;;  %v4020_v17 = vmul.f32 %v7671_v6, %v4000_v56  ;;  %v3986_v37 = vsub.f32 %v3929_v8, %v7655_v46  ;;  %v3854_v19 = vmul.f32 %v7646_v9, %v3834_v50 }
 0x312   : >> { %v8100_v22 = vmov %v7710_v12  ;;  %v4037_v41 = vadd.f32 %v4021_v30, %v3864_v32  ;;  %v4003_v57 = vand.u32 2147483647, %v3987_v16  ;;  %v3836_v12 = vand.u32 2147483647, %v3820_v24 }
 0x313   : >> { %v8102_v35 = vmov %v7716_v13  ;;  %v4036_v51 = vadd.f32 %v4020_v17, %v3863_v62  ;;  %v4002_v34 = vand.u32 2147483647, %v3986_v37  ;;  %v3944_v59 = vpop.permute.xlu1 %3943  ;;  %v8103_v13 = vld [vmem:[#allocation16_spill] sm:$0xff]  ;;  %v3835_v28 = vand.u32 2147483647, %v3819_v61  ;;  %4067 = vst [vmem:[%s5571_s12 + $0x18] sm:$0xff] (%p7789_p13), %v8100_v22 }
 0x314   : >> { %v7726_v40 = vmin.f32 %v8103_v13, %v4037_v41   ;;  %v4023_v7 = vmul.f32 %v7671_v6, %v4003_v57  ;;  %v3989_v11 = vsub.f32 %v3944_v59, %v7655_v46  ;;  %v3939_v32 = vpop.permute.xlu0 %3938  ;;  %v3822_v49 = vsub.f32 %v7648_v36, %v7627_v60  ;;  %v8108_v41 = vld [vmem:[#allocation12_spill] sm:$0xff]  ;;  %4066 = vst [vmem:[%s5571_s12 + $0x10] sm:$0xff] (%p7789_p13), %v8102_v35 }
 0x315   : >> { %v7732_v21 = vmin.f32 %v8104_v3, %v4036_v51   ;;  %v4022_v1 = vmul.f32 %v7671_v6, %v4002_v34  ;;  %v3988_v62 = vsub.f32 %v3939_v32, %v7655_v46  ;;  %v3870_v36 = vadd.f32 %v3854_v19, %v7609_v58 }
 0x316   : >> { %v4039_v15 = vadd.f32 %v4023_v7, %v3866_v0  ;;  %v4005_v42 = vand.u32 2147483647, %v3989_v11  ;;  %v3821_v0 = vsub.f32 %v7650_v14, %v7627_v60  ;;  %v3869_v25 = vadd.f32 %v3853_v4, %v7612_v52  ;;  %v8109_v52 = vld [vmem:[#allocation13_spill] sm:$0xff]  ;;  %4069 = vst [vmem:[%s5571_s12 + $0x28] sm:$0xff] (%p7789_p13), %v7726_v40 }
 0x317   : >> { %v4038_v53 = vadd.f32 %v4022_v1, %v3865_v23  ;;  %v4004_v33 = vand.u32 2147483647, %v3988_v62  ;;  %v3954_v54 = vpop.permute.xlu1 %3953  ;;  %v3856_v17 = vmul.f32 %v7646_v9, %v3836_v12  ;;  %v3855_v37 = vmul.f32 %v7646_v9, %v3835_v28  ;;  %4068 = vst [vmem:[%s5571_s12 + $0x20] sm:$0xff] (%p7789_p13), %v7732_v21 }
 0x318   : >> { %v7741_v8 = vmin.f32 %v8105_v45, %v4039_v15   ;;  %v4025_v56 = vmul.f32 %v7671_v6, %v4005_v42  ;;  %v3991_v43 = vsub.f32 %v3954_v54, %v7655_v46  ;;  %v3949_v27 = vpop.permute.xlu0 %3948  ;;  %v3838_v14 = vand.u32 2147483647, %v3822_v49  ;;  %v8111_v15 = vld [vmem:[#allocation10_spill] sm:$0xff] }
 0x319   : >> { %v7748_v30 = vmin.f32 %v8107_v63, %v4038_v53   ;;  %v4024_v23 = vmul.f32 %v7671_v6, %v4004_v33  ;;  %v3990_v16 = vsub.f32 %v3949_v27, %v7655_v46  ;;  %v3837_v51 = vand.u32 2147483647, %v3821_v0  ;;  %v8113_v0 = vld [vmem:[#allocation8_spill] sm:$0xff] }
 0x31a   : >> { %v8106_v47 = vmov %v7741_v8  ;;  %v4041_v8 = vadd.f32 %v4025_v56, %v3868_v44  ;;  %v4007_v31 = vand.u32 2147483647, %v3991_v43  ;;  %v3685_v13 = vmul.f32 %v7545_v29, %v7663_v26 }
 0x31b   : >> { %v4040_v50 = vadd.f32 %v4024_v23, %v3867_v5  ;;  %v4006_v2 = vand.u32 2147483647, %v3990_v16  ;;  %v3964_v60 = vpop.permute.xlu1 %3963  ;;  %v3684_v11 = vmul.f32 %v7545_v29, %v7665_v10  ;;  %v3872_v3 = vadd.f32 %v3856_v17, %v7617_v20  ;;  %v8112_v10 = vld [vmem:[#allocation11_spill] sm:$0xff]  ;;  %v8114_v16 = vld [vmem:[#allocation9_spill] sm:$0xff]  ;;  %4070 = vst [vmem:[%s5571_s12 + $0x30] sm:$0xff] (%p7789_p13), %v7748_v30  ;;  %4071 = vst [vmem:[%s5571_s12 + $0x38] sm:$0xff] (%p7789_p13), %v8106_v47 }
 0x31c   : >> { %v7757_v57 = vmin.f32 %v8108_v41, %v4041_v8   ;;  %v4027_v24 = vmul.f32 %v7671_v6, %v4007_v31  ;;  %v3993_v61 = vsub.f32 %v3964_v60, %v7655_v46  ;;  %v3959_v58 = vpop.permute.xlu0 %3958  ;;  %v3871_v1 = vadd.f32 %v3855_v37, %v7620_v38  ;;  %v8115_v31 = vld [vmem:[#allocation6_spill] sm:$0xff]  ;;  %v8116_v17 = vld [vmem:[#allocation7_spill] sm:$0xff] }
 0x31d   : >> { %v7762_v7 = vmin.f32 %v8109_v52, %v4040_v50   ;;  %v4026_v59 = vmul.f32 %v7671_v6, %v4006_v2  ;;  %v3992_v44 = vsub.f32 %v3959_v58, %v7655_v46  ;;  %v3857_v29 = vmul.f32 %v7646_v9, %v3837_v51 }
 0x31e   : >> { %v4043_v32 = vadd.f32 %v4027_v24, %v3870_v36  ;;  %v4009_v5 = vand.u32 2147483647, %v3993_v61  ;;  %v3701_v33 = vadd.f32 %v3685_v13, %v7549_v48  ;;  %v3700_v45 = vadd.f32 %v3684_v11, %v7552_v18  ;;  %4073 = vst [vmem:[%s5571_s12 + $0x48] sm:$0xff] (%p7789_p13), %v7757_v57 }
 0x31f   : >> { %v8110_v34 = vmov %v7762_v7  ;;  %v4042_v62 = vadd.f32 %v4026_v59, %v3869_v25  ;;  %v4008_v19 = vand.u32 2147483647, %v3992_v44  ;;  %v3974_v4 = vpop.permute.xlu1 %3973  ;;  %v3858_v7 = vmul.f32 %v7646_v9, %v3838_v14 }
 0x320   : >> { %v4059_v42 = vmin.f32 %v8111_v15, %v4043_v32   ;;  %v4029_v12 = vmul.f32 %v7671_v6, %v4009_v5  ;;  %v3995_v26 = vsub.f32 %v3974_v4, %v7655_v46  ;;  %v3969_v28 = vpop.permute.xlu0 %3968  ;;  %v3873_v9 = vadd.f32 %v3857_v29, %v3700_v45  ;;  %4072 = vst [vmem:[%s5571_s12 + $0x40] sm:$0xff] (%p7789_p13), %v8110_v34 }
 0x321   : >> { %v4058_v53 = vmin.f32 %v8112_v10, %v4042_v62   ;;  %v4028_v20 = vmul.f32 %v7671_v6, %v4008_v19  ;;  %v3994_v38 = vsub.f32 %v3969_v28, %v7655_v46  ;;  %v3874_v27 = vadd.f32 %v3858_v7, %v3701_v33 }
 0x322   : >> { %v4045_v54 = vadd.f32 %v4029_v12, %v3872_v3  ;;  %v4011_v49 = vand.u32 2147483647, %v3995_v26  ;;  %v8122_v4 = vmov %v4059_v42  ;;  %v8125_v7 = vmov %v8110_v34  ;;  %4075 = vst [vmem:[%s5571_s12 + $0x58] sm:$0xff] (%p7789_p13), %v4059_v42 }
 0x323   : >> { %v4044_v56 = vadd.f32 %v4028_v20, %v3871_v1  ;;  %v4010_v43 = vand.u32 2147483647, %v3994_v38  ;;  %v8123_v5 = vmov %v4058_v53  ;;  %v8128_v10 = vmov %v7726_v40  ;;  %4074 = vst [vmem:[%s5571_s12 + $0x50] sm:$0xff] (%p7789_p13), %v4058_v53 }
 0x324   : >> { %v4061_v63 = vmin.f32 %v8113_v0, %v4045_v54   ;;  %v4031_v23 = vmul.f32 %v7671_v6, %v4011_v49  ;;  %v8129_v11 = vmov %v7732_v21  ;;  %v8130_v12 = vmov %v8100_v22 }
 0x325   : >> { %v4060_v36 = vmin.f32 %v8114_v16, %v4044_v56   ;;  %v4030_v25 = vmul.f32 %v7671_v6, %v4010_v43  ;;  %v8124_v6 = vmov %v7757_v57  ;;  %v8131_v13 = vmov %v8102_v35  ;;  %1257 = sbr.rel (!%p7789_p13) target bundleno = 162 (0xa2), region = 153 }
 0x326   : >> { %v4047_v8 = vadd.f32 %v4031_v23, %v3874_v27  ;;  %v8120_v2 = vmov %v4061_v63  ;;  %v8132_v14 = vmov %v8097_v39  ;;  %v8133_v15 = vmov %v7698_v55  ;;  %4077 = vst [vmem:[%s5571_s12 + $0x68] sm:$0xff] (%p7789_p13), %v4061_v63 }
 0x327   : >> { %v4046_v46 = vadd.f32 %v4030_v25, %v3873_v9  ;;  %v8121_v3 = vmov %v4060_v36  ;;  %v8127_v9 = vmov %v7748_v30  ;;  %4076 = vst [vmem:[%s5571_s12 + $0x60] sm:$0xff] (%p7789_p13), %v4060_v36 }
 0x328   : >> { %v4063_v48 = vmin.f32 %v8115_v31, %v4047_v8   ;;  %v8126_v8 = vmov %v8106_v47 }
 0x329   : >> { %v4062_v37 = vmin.f32 %v8116_v17, %v4046_v46  }
 0x32a   : >> { %v8118_v0 = vmov %v4063_v48  ;;  %4079 = vst [vmem:[%s5571_s12 + $0x78] sm:$0xff] (%p7789_p13), %v4063_v48 }
 0x32b   : >> { %v8119_v1 = vmov %v4062_v37  ;;  %4078 = vst [vmem:[%s5571_s12 + $0x70] sm:$0xff] (%p7789_p13), %v4062_v37 }
 0x32c   : > { %4776 = shalt.err (!%p4773_p7)
}
 0x32d   : > { %s4777_s12 = scalar_lea.hbm %s7870_s27, 2048  ;;  %s4781_s10 = scalar_lea.hbm %s7921_s4, 4096 }
 0x32e   : > { %p4778_p10 = scmp.ne.s32.totalorder %s7870_s27, %s4777_s12  ;;  %p4782_p13 = scmp.lt.u32.totalorder %s7870_s27, %s7921_s4 }
 0x32f   : > { %p4783_p0 = scmp.lt.u32.totalorder %s4781_s10, %s4777_s12  ;;  %p4785_p2 = scmp.lt.u32.totalorder %s4777_s12, %s7870_s27 }
 0x330   : > { %p4779_p11 = pnand %p4778_p10, %p5030_p6 }
 0x331   : > { %p4784_p1 = por %p4783_p0, %p4782_p13 }
 0x332   : > { %p4780_p12 = pneg %p4779_p11 }
 0x333   : > { %p4786_p3 = por %p4785_p2, %p4784_p1 }
 0x335   : > { %p4787_p4 = pnand %p4786_p3, %p4780_p12 }
 0x337   : > { %4790 = shalt.err (!%p4787_p4)
}
 0x338   : > { %s4965_s20 = smov 128   ;;  %s4966_s11 = smov 8  }
 0x339   : > { %4583 = dma.vmem_to_hbm [thread:$0]  (%p5030_p6), %s7873_s28, 2048, %s7870_s27, %s4081_s29, %s4965_s20, %s4965_s20, %s4966_s11  }
 0x33a PF: > { %s4109_s13 = sand.u32 1, %s4881_s15   ;;  %p4586_p5 = pnand %p4265_p9, %p5034_p8 }
 0x33b   : > { %s4110_s22 = scalar_lea.sflag [#allocation4], %s4109_s13 }
 0x33c   : > { %4876 = dma.done.wait (!%p4586_p5), %s4110_s22, 2048  }
 0x33d   : > { %4878 = vsyncadd (!%p4586_p5), %s4110_s22, 4294965248  ;;  %p14_p7 = scmp.ge.s32.totalorder %s5015_s21, 4   ;;  %s8134_s15 = smov %s4885_s16 }
 0x33e   : > { %s8135_s16 = smov %s4889_s17  ;;  %s8136_s17 = smov %s5028_s24 }
 0x33f   : > { %s8137_s18 = smov %s5015_s21  ;;  %16 = sbr.rel (!%p14_p7) target bundleno = 3 (0x3), region = 164 }
 0x346   :  { %4115 = vsyncpa [#allocation4], 1 }
 0x347   :  { %4117 = vsyncpa [#allocation4 + $0x1], 1 }

</bundles_post_ra>
